<compile_context>
chip_gen: v7x
topology: tpu7x:2x2x1
jax: 0.10.0
libtpu: 0.0.40
codegen_flags: <defaults>
</compile_context>

<pallas_src>
import functools
import math

import jax
import jax.numpy as jnp
from jax.experimental import pallas as pl
from jax.experimental.pallas import tpu as pltpu

NUM_CLASSES = 2
N_MELS = 64
D_MODEL = 64
N_HEADS = 2
DIM_FF = 128
N_LAYERS = 2
LN_EPS = 1e-5
BN_EPS = 1e-5

MXU_DTYPE = jnp.bfloat16   # MXU operand dtype; accumulation is always f32.
FC_PAD = 128               # pad fc output lanes to 128 for a lane-dense store.


# ---------------------------------------------------------------------------
# Conv stage: fused GEMM kernel (matmul + bias + ReLU + eval-BatchNorm)
# ---------------------------------------------------------------------------

def _conv_gemm_kernel(w_ref, c_ref, b_ref, scale_ref, shift_ref, o_ref):
    # o = BN(ReLU(W @ cols + b)); per-channel params are (Cout, 1) columns.
    y = jnp.dot(w_ref[...], c_ref[...], preferred_element_type=jnp.float32)
    y = jnp.maximum(y + b_ref[...], 0.0)
    o_ref[...] = y * scale_ref[...] + shift_ref[...]


def _pick_tile(m):
    for cand in (2048, 1024, 512, 256):
        if m % cand == 0 and m // cand >= 2:
            return cand
    return m


def conv_gemm(w2, cols, bias, scale, shift):
    """w2: (Cout, K), cols: (K, M) -> (Cout, M).  Lane axis = M (lane-dense)."""
    cout, k = w2.shape
    m = cols.shape[1]
    tm = _pick_tile(m)
    grid = (m // tm,)
    return pl.pallas_call(
        _conv_gemm_kernel,
        out_shape=jax.ShapeDtypeStruct((cout, m), jnp.float32),
        grid_spec=pltpu.PrefetchScalarGridSpec(
            num_scalar_prefetch=0,
            grid=grid,
            in_specs=[
                pl.BlockSpec((cout, k), lambda i: (0, 0)),
                pl.BlockSpec((k, tm), lambda i: (0, i)),
                pl.BlockSpec((cout, 1), lambda i: (0, 0)),
                pl.BlockSpec((cout, 1), lambda i: (0, 0)),
                pl.BlockSpec((cout, 1), lambda i: (0, 0)),
            ],
            out_specs=pl.BlockSpec((cout, tm), lambda i: (0, i)),
        ),
        compiler_params=pltpu.CompilerParams(
            dimension_semantics=("parallel",)),
    )(w2.astype(MXU_DTYPE), cols.astype(MXU_DTYPE), bias, scale, shift)


def im2col_cf(a, stride):
    """a: (C, B, H, W) channel-first, k=3, pad=1 -> (C*9, B*Ho*Wo)."""
    # TODO(synk): replace this XLA-side patch extraction with a direct-conv
    # Pallas kernel reading the padded (C,B,H,W) tile from VMEM.
    c, b, h, w = a.shape
    ap = jnp.pad(a, ((0, 0), (0, 0), (1, 1), (1, 1)))
    ho = (h + 2 - 3) // stride + 1
    wo = (w + 2 - 3) // stride + 1
    patches = [ap[:, :, i:i + stride * ho:stride, j:j + stride * wo:stride]
               for i in range(3) for j in range(3)]
    cols = jnp.stack(patches, axis=1)          # (C, 9, B, Ho, Wo)
    return cols.reshape(c * 9, b * ho * wo), ho, wo


def conv_stage(x, conv_params):
    """x: (B, 1, H, W) NCHW.  Returns channel-first activations (64, B, H', W')."""
    b = x.shape[0]
    # (B,1,H,W) -> (1,B,H,W) is a free reshape since C == 1.
    a = x.reshape(1, b, x.shape[2], x.shape[3])
    for p, stride in zip(conv_params, (1, 2, 2)):
        cols, ho, wo = im2col_cf(a, stride)
        cout = p['w'].shape[0]
        w2 = p['w'].reshape(cout, -1)                         # (Cout, Cin*9)
        scale = p['gamma'] / jnp.sqrt(p['var'] + BN_EPS)
        shift = p['beta'] - p['mean'] * scale
        y = conv_gemm(w2, cols,
                      p['b'].reshape(-1, 1),
                      scale.reshape(-1, 1),
                      shift.reshape(-1, 1))                   # (Cout, B*Ho*Wo)
        a = y.reshape(cout, b, ho, wo)
    return a


# ---------------------------------------------------------------------------
# Fused transformer head: PE add + 2 encoder layers + mean pool + fc
# ---------------------------------------------------------------------------

def _layernorm(y, g, b):
    mu = jnp.mean(y, axis=-1, keepdims=True)
    var = jnp.mean(jnp.square(y - mu), axis=-1, keepdims=True)
    return (y - mu) * jax.lax.rsqrt(var + LN_EPS) * g + b


def _encoder_kernel(x_ref, pe_ref, *refs, n_layers, n_heads):
    o_ref = refs[-1]
    wrefs = refs[:-1]

    x = x_ref[0] + pe_ref[...]                    # (S, E), f32
    s_len, e = x.shape
    dh = e // n_heads
    inv_sqrt_dh = 1.0 / math.sqrt(dh)

    idx = 0
    for _ in range(n_layers):
        (in_w, in_b, out_w, out_b, ln1_g, ln1_b,
         lin1_w, lin1_b, lin2_w, lin2_b, ln2_g, ln2_b) = [
            wrefs[idx + t][...] for t in range(12)]
        idx += 12

        # --- self attention (both heads, all in VMEM) ------------------
        qkv = jnp.dot(x.astype(MXU_DTYPE), in_w,
                      preferred_element_type=jnp.float32) + in_b   # (S, 3E)
        q = qkv[:, :e]
        k = qkv[:, e:2 * e]
        v = qkv[:, 2 * e:]

        attn = None
        for h in range(n_heads):
            qh = q[:, h * dh:(h + 1) * dh].astype(MXU_DTYPE)
            kh = k[:, h * dh:(h + 1) * dh].astype(MXU_DTYPE)
            vh = v[:, h * dh:(h + 1) * dh].astype(MXU_DTYPE)
            sc = jax.lax.dot_general(
                qh, kh, (((1,), (1,)), ((), ())),
                preferred_element_type=jnp.float32) * inv_sqrt_dh  # (S, S)
            m = jnp.max(sc, axis=-1, keepdims=True)
            p = jnp.exp(sc - m)
            p = p * pl.reciprocal(jnp.sum(p, axis=-1, keepdims=True),
                                  approx=True)
            head = jnp.dot(p.astype(MXU_DTYPE), vh,
                           preferred_element_type=jnp.float32)     # (S, dh)
            # fold the output projection per head: concat(heads) @ out_w
            # == sum_h head_h @ out_w[h*dh:(h+1)*dh, :]  (sublane slice).
            part = jnp.dot(head.astype(MXU_DTYPE),
                           out_w[h * dh:(h + 1) * dh, :],
                           preferred_element_type=jnp.float32)     # (S, E)
            attn = part if attn is None else attn + part
        attn = attn + out_b

        x = _layernorm(x + attn, ln1_g, ln1_b)

        # --- feed forward ----------------------------------------------
        h1 = jnp.maximum(
            jnp.dot(x.astype(MXU_DTYPE), lin1_w,
                    preferred_element_type=jnp.float32) + lin1_b, 0.0)
        ff = jnp.dot(h1.astype(MXU_DTYPE), lin2_w,
                     preferred_element_type=jnp.float32) + lin2_b
        x = _layernorm(x + ff, ln2_g, ln2_b)

    # --- mean pool over sequence + fc (padded to 128 lanes) -------------
    fc_w = wrefs[idx][...]
    fc_b = wrefs[idx + 1][...]
    pooled = jnp.mean(x, axis=0, keepdims=True)                    # (1, E)
    logits = jnp.dot(pooled.astype(MXU_DTYPE), fc_w,
                     preferred_element_type=jnp.float32) + fc_b    # (1, FC_PAD)
    o_ref[0] = logits


def transformer_head(seq, pe, layer_params, fc_w, fc_b):
    """seq: (B, S, E) f32 -> logits (B, NUM_CLASSES).  One fused pallas_call."""
    b, s, e = seq.shape

    inputs = [seq, pe]
    in_specs = [
        pl.BlockSpec((1, s, e), lambda i: (i, 0, 0)),
        pl.BlockSpec((s, e), lambda i: (0, 0)),
    ]

    def add_full(arr):
        inputs.append(arr)
        nd = arr.ndim
        in_specs.append(pl.BlockSpec(arr.shape, lambda i, nd=nd: (0,) * nd))

    for p in layer_params:
        add_full(p['in_proj_w'].T.astype(MXU_DTYPE))      # (E, 3E)
        add_full(p['in_proj_b'].reshape(1, -1))
        add_full(p['out_w'].T.astype(MXU_DTYPE))          # (E, E)
        add_full(p['out_b'].reshape(1, -1))
        add_full(p['ln1_g'].reshape(1, -1))
        add_full(p['ln1_b'].reshape(1, -1))
        add_full(p['lin1_w'].T.astype(MXU_DTYPE))         # (E, FF)
        add_full(p['lin1_b'].reshape(1, -1))
        add_full(p['lin2_w'].T.astype(MXU_DTYPE))         # (FF, E)
        add_full(p['lin2_b'].reshape(1, -1))
        add_full(p['ln2_g'].reshape(1, -1))
        add_full(p['ln2_b'].reshape(1, -1))

    # fc padded to FC_PAD output lanes (lane-dense store); sliced below.
    fc_w_pad = jnp.zeros((e, FC_PAD), jnp.float32).at[:, :NUM_CLASSES].set(fc_w.T)
    fc_b_pad = jnp.zeros((1, FC_PAD), jnp.float32).at[:, :NUM_CLASSES].set(
        fc_b.reshape(1, -1))
    add_full(fc_w_pad.astype(MXU_DTYPE))
    add_full(fc_b_pad)

    out = pl.pallas_call(
        functools.partial(_encoder_kernel,
                          n_layers=len(layer_params), n_heads=N_HEADS),
        out_shape=jax.ShapeDtypeStruct((b, 1, FC_PAD), jnp.float32),
        grid_spec=pltpu.PrefetchScalarGridSpec(
            num_scalar_prefetch=0,
            grid=(b,),
            in_specs=in_specs,
            out_specs=pl.BlockSpec((1, 1, FC_PAD), lambda i: (i, 0, 0)),
        ),
        compiler_params=pltpu.CompilerParams(
            dimension_semantics=("parallel",)),
    )(*inputs)
    return out[:, 0, :NUM_CLASSES]


# ---------------------------------------------------------------------------
# Model assembly
# ---------------------------------------------------------------------------

def positional_encoding(seq_len, d_model):
    position = jnp.arange(seq_len, dtype=jnp.float32)[:, None]
    div_term = jnp.exp(jnp.arange(0, d_model, 2, dtype=jnp.float32)
                       * (-math.log(10000.0) / d_model))
    pe = jnp.zeros((seq_len, d_model), jnp.float32)
    pe = pe.at[:, 0::2].set(jnp.sin(position * div_term))
    pe = pe.at[:, 1::2].set(jnp.cos(position * div_term))
    return pe                                          # (S, E)


def forward(params, x):
    # Conv stack (Dropout = identity at inference), channel-first layout.
    a = conv_stage(x, params['convs'])                 # (64, B, H', W')
    # torch: x.mean(dim=2) over frequency -> (B, 64, W'); then permute(2,0,1).
    freq_mean = jnp.mean(a, axis=2)                    # (64, B, S=W')
    seq = jnp.transpose(freq_mean, (1, 2, 0))          # (B, S, 64)
    s_len = seq.shape[1]
    pe = positional_encoding(s_len, D_MODEL)
    return transformer_head(seq, pe, params['layers'],
                            params['fc_w'], params['fc_b'])


# ---------------------------------------------------------------------------
# Deterministic parameter initialization (synthetic, not a checkpoint)
# ---------------------------------------------------------------------------

def init_params(key):
    keys = iter(jax.random.split(key, 128))

    def nrm(shape, scale=0.05):
        return scale * jax.random.normal(next(keys), shape, jnp.float32)

    def pos(shape):
        return 0.5 + 0.5 * jax.random.uniform(next(keys), shape, jnp.float32)

    p = {'convs': [], 'layers': []}
    for cin, cout in ((1, 16), (16, 32), (32, 64)):
        p['convs'].append(dict(
            w=nrm((cout, cin, 3, 3), 0.1),
            b=nrm((cout,), 0.1),
            gamma=pos((cout,)),
            beta=nrm((cout,), 0.1),
            mean=nrm((cout,), 0.1),
            var=pos((cout,)),
        ))
    for _ in range(N_LAYERS):
        p['layers'].append(dict(
            in_proj_w=nrm((3 * D_MODEL, D_MODEL)),
            in_proj_b=nrm((3 * D_MODEL,)),
            out_w=nrm((D_MODEL, D_MODEL)),
            out_b=nrm((D_MODEL,)),
            lin1_w=nrm((DIM_FF, D_MODEL)),
            lin1_b=nrm((DIM_FF,)),
            lin2_w=nrm((D_MODEL, DIM_FF)),
            lin2_b=nrm((D_MODEL,)),
            ln1_g=pos((D_MODEL,)), ln1_b=nrm((D_MODEL,)),
            ln2_g=pos((D_MODEL,)), ln2_b=nrm((D_MODEL,)),
        ))
    p['fc_w'] = nrm((NUM_CLASSES, D_MODEL))
    p['fc_b'] = nrm((NUM_CLASSES,))
    return p


if __name__ == "__main__":
    key = jax.random.PRNGKey(0)
    pkey, xkey = jax.random.split(key)
    params = init_params(pkey)

    # input: (batch=2, channels=1, n_mels=64, time=16) NCHW, as in PyTorch.
    x = jax.random.normal(xkey, (2, 1, N_MELS, 16), jnp.float32)

    logits = jax.jit(forward)(params, x)
    jax.block_until_ready(logits)
    assert logits.shape == (2, NUM_CLASSES)
    assert bool(jnp.all(jnp.isfinite(logits)))
    print("KERNEL_OK")
</pallas_src>

<mosaic_0001>
module attributes {stable_mosaic.version = 11 : i64} {
  func.func @_conv_gemm_kernel(%arg0: i32, %arg1: memref<16x9xbf16, #tpu.memory_space<vmem>>, %arg2: memref<9x1024xbf16, #tpu.memory_space<vmem>>, %arg3: memref<16x1xf32, #tpu.memory_space<vmem>>, %arg4: memref<16x1xf32, #tpu.memory_space<vmem>>, %arg5: memref<16x1xf32, #tpu.memory_space<vmem>>, %arg6: memref<16x1024xf32, #tpu.memory_space<vmem>>) attributes {dimension_semantics = [#tpu.dimension_semantics<parallel>], iteration_bounds = array<i64: 2>, scalar_prefetch = 0 : i64, scratch_operands = 0 : i64, tpu.core_type = #tpu.core_type<tc>, window_params = [{pipeline_mode = #tpu.pipeline_mode<synchronous>, transform_indices = @transform_0, window_bounds = array<i64: 16, 9>}, {transform_indices = @transform_1, window_bounds = array<i64: 9, 1024>}, {pipeline_mode = #tpu.pipeline_mode<synchronous>, transform_indices = @transform_2, window_bounds = array<i64: 16, 1>}, {pipeline_mode = #tpu.pipeline_mode<synchronous>, transform_indices = @transform_3, window_bounds = array<i64: 16, 1>}, {pipeline_mode = #tpu.pipeline_mode<synchronous>, transform_indices = @transform_4, window_bounds = array<i64: 16, 1>}, {transform_indices = @transform_5, window_bounds = array<i64: 16, 1024>}]} {
    %c0 = arith.constant 0 : index
    %c0_0 = arith.constant 0 : index
    %0 = vector.load %arg1[%c0, %c0_0] : memref<16x9xbf16, #tpu.memory_space<vmem>>, vector<16x9xbf16>
    %c0_1 = arith.constant 0 : index
    %c0_2 = arith.constant 0 : index
    %1 = vector.load %arg2[%c0_1, %c0_2] : memref<9x1024xbf16, #tpu.memory_space<vmem>>, vector<9x1024xbf16>
    %cst = arith.constant dense<0.000000e+00> : vector<16x1024xf32>
    %2 = tpu.matmul %0, %1, %cst {dimension_numbers = #tpu.dot_dimension_numbers<[1], [0], [0], [1], [0, 0, 1, 1], [], []>} : vector<16x9xbf16>, vector<9x1024xbf16>, vector<16x1024xf32> -> vector<16x1024xf32>
    %c0_3 = arith.constant 0 : index
    %c0_4 = arith.constant 0 : index
    %3 = vector.load %arg3[%c0_3, %c0_4] : memref<16x1xf32, #tpu.memory_space<vmem>>, vector<16x1xf32>
    %4 = vector.broadcast %3 : vector<16x1xf32> to vector<16x1024xf32>
    %5 = arith.addf %2, %4 : vector<16x1024xf32>
    %cst_5 = arith.constant 0.000000e+00 : f32
    %6 = vector.broadcast %cst_5 : f32 to vector<16x1024xf32>
    %7 = arith.maximumf %5, %6 : vector<16x1024xf32>
    %c0_6 = arith.constant 0 : index
    %c0_7 = arith.constant 0 : index
    %8 = vector.load %arg4[%c0_6, %c0_7] : memref<16x1xf32, #tpu.memory_space<vmem>>, vector<16x1xf32>
    %9 = vector.broadcast %8 : vector<16x1xf32> to vector<16x1024xf32>
    %10 = arith.mulf %7, %9 : vector<16x1024xf32>
    %c0_8 = arith.constant 0 : index
    %c0_9 = arith.constant 0 : index
    %11 = vector.load %arg5[%c0_8, %c0_9] : memref<16x1xf32, #tpu.memory_space<vmem>>, vector<16x1xf32>
    %12 = vector.broadcast %11 : vector<16x1xf32> to vector<16x1024xf32>
    %13 = arith.addf %10, %12 : vector<16x1024xf32>
    %c0_10 = arith.constant 0 : index
    %c0_11 = arith.constant 0 : index
    %14 = vector.load %arg6[%c0_10, %c0_11] : memref<16x1024xf32, #tpu.memory_space<vmem>>, vector<16x1024xf32>
    tpu.vector_store %arg6[%c0_10, %c0_11], %13 {strides = array<i32>} : memref<16x1024xf32, #tpu.memory_space<vmem>>, vector<16x1024xf32>,
    return
  }
  func.func @transform_0(%arg0: i32) -> (i32, i32) {
    %c0_i32 = arith.constant 0 : i32
    %c0_i32_0 = arith.constant 0 : i32
    %c0_i32_1 = arith.constant 0 : i32
    return %c0_i32, %c0_i32_0 : i32, i32
  }
  func.func @transform_1(%arg0: i32) -> (i32, i32) {
    %c0_i32 = arith.constant 0 : i32
    %c0_i32_0 = arith.constant 0 : i32
    return %c0_i32, %arg0 : i32, i32
  }
  func.func @transform_2(%arg0: i32) -> (i32, i32) {
    %c0_i32 = arith.constant 0 : i32
    %c0_i32_0 = arith.constant 0 : i32
    %c0_i32_1 = arith.constant 0 : i32
    return %c0_i32, %c0_i32_0 : i32, i32
  }
  func.func @transform_3(%arg0: i32) -> (i32, i32) {
    %c0_i32 = arith.constant 0 : i32
    %c0_i32_0 = arith.constant 0 : i32
    %c0_i32_1 = arith.constant 0 : i32
    return %c0_i32, %c0_i32_0 : i32, i32
  }
  func.func @transform_4(%arg0: i32) -> (i32, i32) {
    %c0_i32 = arith.constant 0 : i32
    %c0_i32_0 = arith.constant 0 : i32
    %c0_i32_1 = arith.constant 0 : i32
    return %c0_i32, %c0_i32_0 : i32, i32
  }
  func.func @transform_5(%arg0: i32) -> (i32, i32) {
    %c0_i32 = arith.constant 0 : i32
    %c0_i32_0 = arith.constant 0 : i32
    return %c0_i32, %arg0 : i32, i32
  }
}

module attributes {stable_mosaic.version = 11 : i64} {
  func.func @_conv_gemm_kernel(%arg0: i32, %arg1: memref<32x144xbf16, #tpu.memory_space<vmem>>, %arg2: memref<144x256xbf16, #tpu.memory_space<vmem>>, %arg3: memref<32x1xf32, #tpu.memory_space<vmem>>, %arg4: memref<32x1xf32, #tpu.memory_space<vmem>>, %arg5: memref<32x1xf32, #tpu.memory_space<vmem>>, %arg6: memref<32x256xf32, #tpu.memory_space<vmem>>) attributes {dimension_semantics = [#tpu.dimension_semantics<parallel>], iteration_bounds = array<i64: 2>, scalar_prefetch = 0 : i64, scratch_operands = 0 : i64, tpu.core_type = #tpu.core_type<tc>, window_params = [{pipeline_mode = #tpu.pipeline_mode<synchronous>, transform_indices = @transform_0, window_bounds = array<i64: 32, 144>}, {transform_indices = @transform_1, window_bounds = array<i64: 144, 256>}, {pipeline_mode = #tpu.pipeline_mode<synchronous>, transform_indices = @transform_2, window_bounds = array<i64: 32, 1>}, {pipeline_mode = #tpu.pipeline_mode<synchronous>, transform_indices = @transform_3, window_bounds = array<i64: 32, 1>}, {pipeline_mode = #tpu.pipeline_mode<synchronous>, transform_indices = @transform_4, window_bounds = array<i64: 32, 1>}, {transform_indices = @transform_5, window_bounds = array<i64: 32, 256>}]} {
    %c0 = arith.constant 0 : index
    %c0_0 = arith.constant 0 : index
    %0 = vector.load %arg1[%c0, %c0_0] : memref<32x144xbf16, #tpu.memory_space<vmem>>, vector<32x144xbf16>
    %c0_1 = arith.constant 0 : index
    %c0_2 = arith.constant 0 : index
    %1 = vector.load %arg2[%c0_1, %c0_2] : memref<144x256xbf16, #tpu.memory_space<vmem>>, vector<144x256xbf16>
    %cst = arith.constant dense<0.000000e+00> : vector<32x256xf32>
    %2 = tpu.matmul %0, %1, %cst {dimension_numbers = #tpu.dot_dimension_numbers<[1], [0], [0], [1], [0, 0, 1, 1], [], []>} : vector<32x144xbf16>, vector<144x256xbf16>, vector<32x256xf32> -> vector<32x256xf32>
    %c0_3 = arith.constant 0 : index
    %c0_4 = arith.constant 0 : index
    %3 = vector.load %arg3[%c0_3, %c0_4] : memref<32x1xf32, #tpu.memory_space<vmem>>, vector<32x1xf32>
    %4 = vector.broadcast %3 : vector<32x1xf32> to vector<32x256xf32>
    %5 = arith.addf %2, %4 : vector<32x256xf32>
    %cst_5 = arith.constant 0.000000e+00 : f32
    %6 = vector.broadcast %cst_5 : f32 to vector<32x256xf32>
    %7 = arith.maximumf %5, %6 : vector<32x256xf32>
    %c0_6 = arith.constant 0 : index
    %c0_7 = arith.constant 0 : index
    %8 = vector.load %arg4[%c0_6, %c0_7] : memref<32x1xf32, #tpu.memory_space<vmem>>, vector<32x1xf32>
    %9 = vector.broadcast %8 : vector<32x1xf32> to vector<32x256xf32>
    %10 = arith.mulf %7, %9 : vector<32x256xf32>
    %c0_8 = arith.constant 0 : index
    %c0_9 = arith.constant 0 : index
    %11 = vector.load %arg5[%c0_8, %c0_9] : memref<32x1xf32, #tpu.memory_space<vmem>>, vector<32x1xf32>
    %12 = vector.broadcast %11 : vector<32x1xf32> to vector<32x256xf32>
    %13 = arith.addf %10, %12 : vector<32x256xf32>
    %c0_10 = arith.constant 0 : index
    %c0_11 = arith.constant 0 : index
    %14 = vector.load %arg6[%c0_10, %c0_11] : memref<32x256xf32, #tpu.memory_space<vmem>>, vector<32x256xf32>
    tpu.vector_store %arg6[%c0_10, %c0_11], %13 {strides = array<i32>} : memref<32x256xf32, #tpu.memory_space<vmem>>, vector<32x256xf32>,
    return
  }
  func.func @transform_0(%arg0: i32) -> (i32, i32) {
    %c0_i32 = arith.constant 0 : i32
    %c0_i32_0 = arith.constant 0 : i32
    %c0_i32_1 = arith.constant 0 : i32
    return %c0_i32, %c0_i32_0 : i32, i32
  }
  func.func @transform_1(%arg0: i32) -> (i32, i32) {
    %c0_i32 = arith.constant 0 : i32
    %c0_i32_0 = arith.constant 0 : i32
    return %c0_i32, %arg0 : i32, i32
  }
  func.func @transform_2(%arg0: i32) -> (i32, i32) {
    %c0_i32 = arith.constant 0 : i32
    %c0_i32_0 = arith.constant 0 : i32
    %c0_i32_1 = arith.constant 0 : i32
    return %c0_i32, %c0_i32_0 : i32, i32
  }
  func.func @transform_3(%arg0: i32) -> (i32, i32) {
    %c0_i32 = arith.constant 0 : i32
    %c0_i32_0 = arith.constant 0 : i32
    %c0_i32_1 = arith.constant 0 : i32
    return %c0_i32, %c0_i32_0 : i32, i32
  }
  func.func @transform_4(%arg0: i32) -> (i32, i32) {
    %c0_i32 = arith.constant 0 : i32
    %c0_i32_0 = arith.constant 0 : i32
    %c0_i32_1 = arith.constant 0 : i32
    return %c0_i32, %c0_i32_0 : i32, i32
  }
  func.func @transform_5(%arg0: i32) -> (i32, i32) {
    %c0_i32 = arith.constant 0 : i32
    %c0_i32_0 = arith.constant 0 : i32
    return %c0_i32, %arg0 : i32, i32
  }
}

module attributes {stable_mosaic.version = 11 : i64} {
  func.func @_conv_gemm_kernel(%arg0: i32, %arg1: memref<64x288xbf16, #tpu.memory_space<vmem>>, %arg2: memref<288x128xbf16, #tpu.memory_space<vmem>>, %arg3: memref<64x1xf32, #tpu.memory_space<vmem>>, %arg4: memref<64x1xf32, #tpu.memory_space<vmem>>, %arg5: memref<64x1xf32, #tpu.memory_space<vmem>>, %arg6: memref<64x128xf32, #tpu.memory_space<vmem>>) attributes {dimension_semantics = [#tpu.dimension_semantics<parallel>], iteration_bounds = array<i64: 1>, scalar_prefetch = 0 : i64, scratch_operands = 0 : i64, tpu.core_type = #tpu.core_type<tc>, window_params = [{pipeline_mode = #tpu.pipeline_mode<synchronous>, transform_indices = @transform_0, window_bounds = array<i64: 64, 288>}, {transform_indices = @transform_1, window_bounds = array<i64: 288, 128>}, {pipeline_mode = #tpu.pipeline_mode<synchronous>, transform_indices = @transform_2, window_bounds = array<i64: 64, 1>}, {pipeline_mode = #tpu.pipeline_mode<synchronous>, transform_indices = @transform_3, window_bounds = array<i64: 64, 1>}, {pipeline_mode = #tpu.pipeline_mode<synchronous>, transform_indices = @transform_4, window_bounds = array<i64: 64, 1>}, {transform_indices = @transform_5, window_bounds = array<i64: 64, 128>}]} {
    %c0 = arith.constant 0 : index
    %c0_0 = arith.constant 0 : index
    %0 = vector.load %arg1[%c0, %c0_0] : memref<64x288xbf16, #tpu.memory_space<vmem>>, vector<64x288xbf16>
    %c0_1 = arith.constant 0 : index
    %c0_2 = arith.constant 0 : index
    %1 = vector.load %arg2[%c0_1, %c0_2] : memref<288x128xbf16, #tpu.memory_space<vmem>>, vector<288x128xbf16>
    %cst = arith.constant dense<0.000000e+00> : vector<64x128xf32>
    %2 = tpu.matmul %0, %1, %cst {dimension_numbers = #tpu.dot_dimension_numbers<[1], [0], [0], [1], [0, 0, 1, 1], [], []>} : vector<64x288xbf16>, vector<288x128xbf16>, vector<64x128xf32> -> vector<64x128xf32>
    %c0_3 = arith.constant 0 : index
    %c0_4 = arith.constant 0 : index
    %3 = vector.load %arg3[%c0_3, %c0_4] : memref<64x1xf32, #tpu.memory_space<vmem>>, vector<64x1xf32>
    %4 = vector.broadcast %3 : vector<64x1xf32> to vector<64x128xf32>
    %5 = arith.addf %2, %4 : vector<64x128xf32>
    %cst_5 = arith.constant 0.000000e+00 : f32
    %6 = vector.broadcast %cst_5 : f32 to vector<64x128xf32>
    %7 = arith.maximumf %5, %6 : vector<64x128xf32>
    %c0_6 = arith.constant 0 : index
    %c0_7 = arith.constant 0 : index
    %8 = vector.load %arg4[%c0_6, %c0_7] : memref<64x1xf32, #tpu.memory_space<vmem>>, vector<64x1xf32>
    %9 = vector.broadcast %8 : vector<64x1xf32> to vector<64x128xf32>
    %10 = arith.mulf %7, %9 : vector<64x128xf32>
    %c0_8 = arith.constant 0 : index
    %c0_9 = arith.constant 0 : index
    %11 = vector.load %arg5[%c0_8, %c0_9] : memref<64x1xf32, #tpu.memory_space<vmem>>, vector<64x1xf32>
    %12 = vector.broadcast %11 : vector<64x1xf32> to vector<64x128xf32>
    %13 = arith.addf %10, %12 : vector<64x128xf32>
    %c0_10 = arith.constant 0 : index
    %c0_11 = arith.constant 0 : index
    %14 = vector.load %arg6[%c0_10, %c0_11] : memref<64x128xf32, #tpu.memory_space<vmem>>, vector<64x128xf32>
    tpu.vector_store %arg6[%c0_10, %c0_11], %13 {strides = array<i32>} : memref<64x128xf32, #tpu.memory_space<vmem>>, vector<64x128xf32>,
    return
  }
  func.func @transform_0(%arg0: i32) -> (i32, i32) {
    %c0_i32 = arith.constant 0 : i32
    %c0_i32_0 = arith.constant 0 : i32
    %c0_i32_1 = arith.constant 0 : i32
    return %c0_i32, %c0_i32_0 : i32, i32
  }
  func.func @transform_1(%arg0: i32) -> (i32, i32) {
    %c0_i32 = arith.constant 0 : i32
    %c0_i32_0 = arith.constant 0 : i32
    return %c0_i32, %arg0 : i32, i32
  }
  func.func @transform_2(%arg0: i32) -> (i32, i32) {
    %c0_i32 = arith.constant 0 : i32
    %c0_i32_0 = arith.constant 0 : i32
    %c0_i32_1 = arith.constant 0 : i32
    return %c0_i32, %c0_i32_0 : i32, i32
  }
  func.func @transform_3(%arg0: i32) -> (i32, i32) {
    %c0_i32 = arith.constant 0 : i32
    %c0_i32_0 = arith.constant 0 : i32
    %c0_i32_1 = arith.constant 0 : i32
    return %c0_i32, %c0_i32_0 : i32, i32
  }
  func.func @transform_4(%arg0: i32) -> (i32, i32) {
    %c0_i32 = arith.constant 0 : i32
    %c0_i32_0 = arith.constant 0 : i32
    %c0_i32_1 = arith.constant 0 : i32
    return %c0_i32, %c0_i32_0 : i32, i32
  }
  func.func @transform_5(%arg0: i32) -> (i32, i32) {
    %c0_i32 = arith.constant 0 : i32
    %c0_i32_0 = arith.constant 0 : i32
    return %c0_i32, %arg0 : i32, i32
  }
}

module attributes {stable_mosaic.version = 11 : i64} {
  func.func @_encoder_kernel(%arg0: i32, %arg1: memref<1x4x64xf32, #tpu.memory_space<vmem>>, %arg2: memref<4x64xf32, #tpu.memory_space<vmem>>, %arg3: memref<64x192xbf16, #tpu.memory_space<vmem>>, %arg4: memref<1x192xf32, #tpu.memory_space<vmem>>, %arg5: memref<64x64xbf16, #tpu.memory_space<vmem>>, %arg6: memref<1x64xf32, #tpu.memory_space<vmem>>, %arg7: memref<1x64xf32, #tpu.memory_space<vmem>>, %arg8: memref<1x64xf32, #tpu.memory_space<vmem>>, %arg9: memref<64x128xbf16, #tpu.memory_space<vmem>>, %arg10: memref<1x128xf32, #tpu.memory_space<vmem>>, %arg11: memref<128x64xbf16, #tpu.memory_space<vmem>>, %arg12: memref<1x64xf32, #tpu.memory_space<vmem>>, %arg13: memref<1x64xf32, #tpu.memory_space<vmem>>, %arg14: memref<1x64xf32, #tpu.memory_space<vmem>>, %arg15: memref<64x192xbf16, #tpu.memory_space<vmem>>, %arg16: memref<1x192xf32, #tpu.memory_space<vmem>>, %arg17: memref<64x64xbf16, #tpu.memory_space<vmem>>, %arg18: memref<1x64xf32, #tpu.memory_space<vmem>>, %arg19: memref<1x64xf32, #tpu.memory_space<vmem>>, %arg20: memref<1x64xf32, #tpu.memory_space<vmem>>, %arg21: memref<64x128xbf16, #tpu.memory_space<vmem>>, %arg22: memref<1x128xf32, #tpu.memory_space<vmem>>, %arg23: memref<128x64xbf16, #tpu.memory_space<vmem>>, %arg24: memref<1x64xf32, #tpu.memory_space<vmem>>, %arg25: memref<1x64xf32, #tpu.memory_space<vmem>>, %arg26: memref<1x64xf32, #tpu.memory_space<vmem>>, %arg27: memref<64x128xbf16, #tpu.memory_space<vmem>>, %arg28: memref<1x128xf32, #tpu.memory_space<vmem>>, %arg29: memref<1x1x128xf32, #tpu.memory_space<vmem>>) attributes {dimension_semantics = [#tpu.dimension_semantics<parallel>], iteration_bounds = array<i64: 2>, scalar_prefetch = 0 : i64, scratch_operands = 0 : i64, tpu.core_type = #tpu.core_type<tc>, window_params = [{transform_indices = @transform_0, window_bounds = array<i64: 1, 4, 64>}, {pipeline_mode = #tpu.pipeline_mode<synchronous>, transform_indices = @transform_1, window_bounds = array<i64: 4, 64>}, {pipeline_mode = #tpu.pipeline_mode<synchronous>, transform_indices = @transform_2, window_bounds = array<i64: 64, 192>}, {pipeline_mode = #tpu.pipeline_mode<synchronous>, transform_indices = @transform_3, window_bounds = array<i64: 1, 192>}, {pipeline_mode = #tpu.pipeline_mode<synchronous>, transform_indices = @transform_4, window_bounds = array<i64: 64, 64>}, {pipeline_mode = #tpu.pipeline_mode<synchronous>, transform_indices = @transform_5, window_bounds = array<i64: 1, 64>}, {pipeline_mode = #tpu.pipeline_mode<synchronous>, transform_indices = @transform_6, window_bounds = array<i64: 1, 64>}, {pipeline_mode = #tpu.pipeline_mode<synchronous>, transform_indices = @transform_7, window_bounds = array<i64: 1, 64>}, {pipeline_mode = #tpu.pipeline_mode<synchronous>, transform_indices = @transform_8, window_bounds = array<i64: 64, 128>}, {pipeline_mode = #tpu.pipeline_mode<synchronous>, transform_indices = @transform_9, window_bounds = array<i64: 1, 128>}, {pipeline_mode = #tpu.pipeline_mode<synchronous>, transform_indices = @transform_10, window_bounds = array<i64: 128, 64>}, {pipeline_mode = #tpu.pipeline_mode<synchronous>, transform_indices = @transform_11, window_bounds = array<i64: 1, 64>}, {pipeline_mode = #tpu.pipeline_mode<synchronous>, transform_indices = @transform_12, window_bounds = array<i64: 1, 64>}, {pipeline_mode = #tpu.pipeline_mode<synchronous>, transform_indices = @transform_13, window_bounds = array<i64: 1, 64>}, {pipeline_mode = #tpu.pipeline_mode<synchronous>, transform_indices = @transform_14, window_bounds = array<i64: 64, 192>}, {pipeline_mode = #tpu.pipeline_mode<synchronous>, transform_indices = @transform_15, window_bounds = array<i64: 1, 192>}, {pipeline_mode = #tpu.pipeline_mode<synchronous>, transform_indices = @transform_16, window_bounds = array<i64: 64, 64>}, {pipeline_mode = #tpu.pipeline_mode<synchronous>, transform_indices = @transform_17, window_bounds = array<i64: 1, 64>}, {pipeline_mode = #tpu.pipeline_mode<synchronous>, transform_indices = @transform_18, window_bounds = array<i64: 1, 64>}, {pipeline_mode = #tpu.pipeline_mode<synchronous>, transform_indices = @transform_19, window_bounds = array<i64: 1, 64>}, {pipeline_mode = #tpu.pipeline_mode<synchronous>, transform_indices = @transform_20, window_bounds = array<i64: 64, 128>}, {pipeline_mode = #tpu.pipeline_mode<synchronous>, transform_indices = @transform_21, window_bounds = array<i64: 1, 128>}, {pipeline_mode = #tpu.pipeline_mode<synchronous>, transform_indices = @transform_22, window_bounds = array<i64: 128, 64>}, {pipeline_mode = #tpu.pipeline_mode<synchronous>, transform_indices = @transform_23, window_bounds = array<i64: 1, 64>}, {pipeline_mode = #tpu.pipeline_mode<synchronous>, transform_indices = @transform_24, window_bounds = array<i64: 1, 64>}, {pipeline_mode = #tpu.pipeline_mode<synchronous>, transform_indices = @transform_25, window_bounds = array<i64: 1, 64>}, {pipeline_mode = #tpu.pipeline_mode<synchronous>, transform_indices = @transform_26, window_bounds = array<i64: 64, 128>}, {pipeline_mode = #tpu.pipeline_mode<synchronous>, transform_indices = @transform_27, window_bounds = array<i64: 1, 128>}, {transform_indices = @transform_28, window_bounds = array<i64: 1, 1, 128>}]} {
    %c0 = arith.constant 0 : index
    %c0_0 = arith.constant 0 : index
    %c0_1 = arith.constant 0 : index
    %0 = vector.load %arg1[%c0, %c0_0, %c0_1] : memref<1x4x64xf32, #tpu.memory_space<vmem>>, vector<1x4x64xf32>
    %1 = vector.shape_cast %0 : vector<1x4x64xf32> to vector<4x64xf32>
    %c0_2 = arith.constant 0 : index
    %c0_3 = arith.constant 0 : index
    %2 = vector.load %arg2[%c0_2, %c0_3] : memref<4x64xf32, #tpu.memory_space<vmem>>, vector<4x64xf32>
    %3 = arith.addf %1, %2 : vector<4x64xf32>
    %c0_4 = arith.constant 0 : index
    %c0_5 = arith.constant 0 : index
    %4 = vector.load %arg3[%c0_4, %c0_5] : memref<64x192xbf16, #tpu.memory_space<vmem>>, vector<64x192xbf16>
    %c0_6 = arith.constant 0 : index
    %c0_7 = arith.constant 0 : index
    %5 = vector.load %arg4[%c0_6, %c0_7] : memref<1x192xf32, #tpu.memory_space<vmem>>, vector<1x192xf32>
    %c0_8 = arith.constant 0 : index
    %c0_9 = arith.constant 0 : index
    %6 = vector.load %arg5[%c0_8, %c0_9] : memref<64x64xbf16, #tpu.memory_space<vmem>>, vector<64x64xbf16>
    %c0_10 = arith.constant 0 : index
    %c0_11 = arith.constant 0 : index
    %7 = vector.load %arg6[%c0_10, %c0_11] : memref<1x64xf32, #tpu.memory_space<vmem>>, vector<1x64xf32>
    %c0_12 = arith.constant 0 : index
    %c0_13 = arith.constant 0 : index
    %8 = vector.load %arg7[%c0_12, %c0_13] : memref<1x64xf32, #tpu.memory_space<vmem>>, vector<1x64xf32>
    %c0_14 = arith.constant 0 : index
    %c0_15 = arith.constant 0 : index
    %9 = vector.load %arg8[%c0_14, %c0_15] : memref<1x64xf32, #tpu.memory_space<vmem>>, vector<1x64xf32>
    %c0_16 = arith.constant 0 : index
    %c0_17 = arith.constant 0 : index
    %10 = vector.load %arg9[%c0_16, %c0_17] : memref<64x128xbf16, #tpu.memory_space<vmem>>, vector<64x128xbf16>
    %c0_18 = arith.constant 0 : index
    %c0_19 = arith.constant 0 : index
    %11 = vector.load %arg10[%c0_18, %c0_19] : memref<1x128xf32, #tpu.memory_space<vmem>>, vector<1x128xf32>
    %c0_20 = arith.constant 0 : index
    %c0_21 = arith.constant 0 : index
    %12 = vector.load %arg11[%c0_20, %c0_21] : memref<128x64xbf16, #tpu.memory_space<vmem>>, vector<128x64xbf16>
    %c0_22 = arith.constant 0 : index
    %c0_23 = arith.constant 0 : index
    %13 = vector.load %arg12[%c0_22, %c0_23] : memref<1x64xf32, #tpu.memory_space<vmem>>, vector<1x64xf32>
    %c0_24 = arith.constant 0 : index
    %c0_25 = arith.constant 0 : index
    %14 = vector.load %arg13[%c0_24, %c0_25] : memref<1x64xf32, #tpu.memory_space<vmem>>, vector<1x64xf32>
    %c0_26 = arith.constant 0 : index
    %c0_27 = arith.constant 0 : index
    %15 = vector.load %arg14[%c0_26, %c0_27] : memref<1x64xf32, #tpu.memory_space<vmem>>, vector<1x64xf32>
    %16 = arith.truncf %3 : vector<4x64xf32> to vector<4x64xbf16>
    %cst = arith.constant dense<0.000000e+00> : vector<4x192xf32>
    %17 = tpu.matmul %16, %4, %cst {dimension_numbers = #tpu.dot_dimension_numbers<[1], [0], [0], [1], [0, 0, 1, 1], [], []>} : vector<4x64xbf16>, vector<64x192xbf16>, vector<4x192xf32> -> vector<4x192xf32>
    %18 = vector.broadcast %5 : vector<1x192xf32> to vector<4x192xf32>
    %19 = arith.addf %17, %18 : vector<4x192xf32>
    %20 = vector.extract_strided_slice %19 {offsets = [0, 0], sizes = [4, 64], strides = [1, 1]} : vector<4x192xf32> to vector<4x64xf32>
    %21 = vector.extract_strided_slice %19 {offsets = [0, 64], sizes = [4, 64], strides = [1, 1]} : vector<4x192xf32> to vector<4x64xf32>
    %22 = vector.extract_strided_slice %19 {offsets = [0, 128], sizes = [4, 64], strides = [1, 1]} : vector<4x192xf32> to vector<4x64xf32>
    %23 = vector.extract_strided_slice %20 {offsets = [0, 0], sizes = [4, 32], strides = [1, 1]} : vector<4x64xf32> to vector<4x32xf32>
    %24 = arith.truncf %23 : vector<4x32xf32> to vector<4x32xbf16>
    %25 = vector.extract_strided_slice %21 {offsets = [0, 0], sizes = [4, 32], strides = [1, 1]} : vector<4x64xf32> to vector<4x32xf32>
    %26 = arith.truncf %25 : vector<4x32xf32> to vector<4x32xbf16>
    %27 = vector.extract_strided_slice %22 {offsets = [0, 0], sizes = [4, 32], strides = [1, 1]} : vector<4x64xf32> to vector<4x32xf32>
    %28 = arith.truncf %27 : vector<4x32xf32> to vector<4x32xbf16>
    %cst_28 = arith.constant dense<0.000000e+00> : vector<4x4xf32>
    %29 = tpu.matmul %24, %26, %cst_28 {dimension_numbers = #tpu.dot_dimension_numbers<[1], [1], [0], [0], [0, 0, 1, 0], [], []>} : vector<4x32xbf16>, vector<4x32xbf16>, vector<4x4xf32> -> vector<4x4xf32>
    %cst_29 = arith.constant 0.176776692 : f32
    %30 = vector.broadcast %cst_29 : f32 to vector<4x4xf32>
    %31 = arith.mulf %29, %30 : vector<4x4xf32>
    %cst_30 = arith.constant dense<0xFF800000> : vector<4xf32>
    %32 = vector.multi_reduction <maximumf>, %31, %cst_30 [1] : vector<4x4xf32> to vector<4xf32>
    %33 = vector.shape_cast %32 : vector<4xf32> to vector<4x1xf32>
    %34 = vector.broadcast %33 : vector<4x1xf32> to vector<4x4xf32>
    %35 = arith.subf %31, %34 : vector<4x4xf32>
    %36 = math.exp %35 : vector<4x4xf32>
    %cst_31 = arith.constant dense<0.000000e+00> : vector<4xf32>
    %37 = vector.multi_reduction <add>, %36, %cst_31 [1] : vector<4x4xf32> to vector<4xf32>
    %38 = vector.shape_cast %37 : vector<4xf32> to vector<4x1xf32>
    %39 = tpu.reciprocal %38 {approx = true} : vector<4x1xf32> -> vector<4x1xf32>
    %40 = vector.broadcast %39 : vector<4x1xf32> to vector<4x4xf32>
    %41 = arith.mulf %36, %40 : vector<4x4xf32>
    %42 = arith.truncf %41 : vector<4x4xf32> to vector<4x4xbf16>
    %cst_32 = arith.constant dense<0.000000e+00> : vector<4x32xf32>
    %43 = tpu.matmul %42, %28, %cst_32 {dimension_numbers = #tpu.dot_dimension_numbers<[1], [0], [0], [1], [0, 0, 1, 1], [], []>} : vector<4x4xbf16>, vector<4x32xbf16>, vector<4x32xf32> -> vector<4x32xf32>
    %44 = arith.truncf %43 : vector<4x32xf32> to vector<4x32xbf16>
    %45 = vector.extract_strided_slice %6 {offsets = [0, 0], sizes = [32, 64], strides = [1, 1]} : vector<64x64xbf16> to vector<32x64xbf16>
    %cst_33 = arith.constant dense<0.000000e+00> : vector<4x64xf32>
    %46 = tpu.matmul %44, %45, %cst_33 {dimension_numbers = #tpu.dot_dimension_numbers<[1], [0], [0], [1], [0, 0, 1, 1], [], []>} : vector<4x32xbf16>, vector<32x64xbf16>, vector<4x64xf32> -> vector<4x64xf32>
    %47 = vector.extract_strided_slice %20 {offsets = [0, 32], sizes = [4, 32], strides = [1, 1]} : vector<4x64xf32> to vector<4x32xf32>
    %48 = arith.truncf %47 : vector<4x32xf32> to vector<4x32xbf16>
    %49 = vector.extract_strided_slice %21 {offsets = [0, 32], sizes = [4, 32], strides = [1, 1]} : vector<4x64xf32> to vector<4x32xf32>
    %50 = arith.truncf %49 : vector<4x32xf32> to vector<4x32xbf16>
    %51 = vector.extract_strided_slice %22 {offsets = [0, 32], sizes = [4, 32], strides = [1, 1]} : vector<4x64xf32> to vector<4x32xf32>
    %52 = arith.truncf %51 : vector<4x32xf32> to vector<4x32xbf16>
    %cst_34 = arith.constant dense<0.000000e+00> : vector<4x4xf32>
    %53 = tpu.matmul %48, %50, %cst_34 {dimension_numbers = #tpu.dot_dimension_numbers<[1], [1], [0], [0], [0, 0, 1, 0], [], []>} : vector<4x32xbf16>, vector<4x32xbf16>, vector<4x4xf32> -> vector<4x4xf32>
    %cst_35 = arith.constant 0.176776692 : f32
    %54 = vector.broadcast %cst_35 : f32 to vector<4x4xf32>
    %55 = arith.mulf %53, %54 : vector<4x4xf32>
    %cst_36 = arith.constant dense<0xFF800000> : vector<4xf32>
    %56 = vector.multi_reduction <maximumf>, %55, %cst_36 [1] : vector<4x4xf32> to vector<4xf32>
    %57 = vector.shape_cast %56 : vector<4xf32> to vector<4x1xf32>
    %58 = vector.broadcast %57 : vector<4x1xf32> to vector<4x4xf32>
    %59 = arith.subf %55, %58 : vector<4x4xf32>
    %60 = math.exp %59 : vector<4x4xf32>
    %cst_37 = arith.constant dense<0.000000e+00> : vector<4xf32>
    %61 = vector.multi_reduction <add>, %60, %cst_37 [1] : vector<4x4xf32> to vector<4xf32>
    %62 = vector.shape_cast %61 : vector<4xf32> to vector<4x1xf32>
    %63 = tpu.reciprocal %62 {approx = true} : vector<4x1xf32> -> vector<4x1xf32>
    %64 = vector.broadcast %63 : vector<4x1xf32> to vector<4x4xf32>
    %65 = arith.mulf %60, %64 : vector<4x4xf32>
    %66 = arith.truncf %65 : vector<4x4xf32> to vector<4x4xbf16>
    %cst_38 = arith.constant dense<0.000000e+00> : vector<4x32xf32>
    %67 = tpu.matmul %66, %52, %cst_38 {dimension_numbers = #tpu.dot_dimension_numbers<[1], [0], [0], [1], [0, 0, 1, 1], [], []>} : vector<4x4xbf16>, vector<4x32xbf16>, vector<4x32xf32> -> vector<4x32xf32>
    %68 = arith.truncf %67 : vector<4x32xf32> to vector<4x32xbf16>
    %69 = vector.extract_strided_slice %6 {offsets = [32, 0], sizes = [32, 64], strides = [1, 1]} : vector<64x64xbf16> to vector<32x64xbf16>
    %cst_39 = arith.constant dense<0.000000e+00> : vector<4x64xf32>
    %70 = tpu.matmul %68, %69, %cst_39 {dimension_numbers = #tpu.dot_dimension_numbers<[1], [0], [0], [1], [0, 0, 1, 1], [], []>} : vector<4x32xbf16>, vector<32x64xbf16>, vector<4x64xf32> -> vector<4x64xf32>
    %71 = arith.addf %46, %70 : vector<4x64xf32>
    %72 = vector.broadcast %7 : vector<1x64xf32> to vector<4x64xf32>
    %73 = arith.addf %71, %72 : vector<4x64xf32>
    %74 = arith.addf %3, %73 : vector<4x64xf32>
    %cst_40 = arith.constant dense<0.000000e+00> : vector<4xf32>
    %75 = vector.multi_reduction <add>, %74, %cst_40 [1] : vector<4x64xf32> to vector<4xf32>
    %76 = vector.shape_cast %75 : vector<4xf32> to vector<4x1xf32>
    %cst_41 = arith.constant 6.400000e+01 : f32
    %77 = vector.broadcast %cst_41 : f32 to vector<4x1xf32>
    %78 = arith.divf %76, %77 : vector<4x1xf32>
    %79 = vector.broadcast %78 : vector<4x1xf32> to vector<4x64xf32>
    %80 = arith.subf %74, %79 : vector<4x64xf32>
    %81 = arith.mulf %80, %80 : vector<4x64xf32>
    %cst_42 = arith.constant dense<0.000000e+00> : vector<4xf32>
    %82 = vector.multi_reduction <add>, %81, %cst_42 [1] : vector<4x64xf32> to vector<4xf32>
    %83 = vector.shape_cast %82 : vector<4xf32> to vector<4x1xf32>
    %cst_43 = arith.constant 6.400000e+01 : f32
    %84 = vector.broadcast %cst_43 : f32 to vector<4x1xf32>
    %85 = arith.divf %83, %84 : vector<4x1xf32>
    %86 = vector.broadcast %78 : vector<4x1xf32> to vector<4x64xf32>
    %87 = arith.subf %74, %86 : vector<4x64xf32>
    %cst_44 = arith.constant 9.99999974E-6 : f32
    %88 = vector.broadcast %cst_44 : f32 to vector<4x1xf32>
    %89 = arith.addf %85, %88 : vector<4x1xf32>
    %90 = math.rsqrt %89 : vector<4x1xf32>
    %91 = vector.broadcast %90 : vector<4x1xf32> to vector<4x64xf32>
    %92 = arith.mulf %87, %91 : vector<4x64xf32>
    %93 = vector.broadcast %8 : vector<1x64xf32> to vector<4x64xf32>
    %94 = arith.mulf %92, %93 : vector<4x64xf32>
    %95 = vector.broadcast %9 : vector<1x64xf32> to vector<4x64xf32>
    %96 = arith.addf %94, %95 : vector<4x64xf32>
    %97 = arith.truncf %96 : vector<4x64xf32> to vector<4x64xbf16>
    %cst_45 = arith.constant dense<0.000000e+00> : vector<4x128xf32>
    %98 = tpu.matmul %97, %10, %cst_45 {dimension_numbers = #tpu.dot_dimension_numbers<[1], [0], [0], [1], [0, 0, 1, 1], [], []>} : vector<4x64xbf16>, vector<64x128xbf16>, vector<4x128xf32> -> vector<4x128xf32>
    %99 = vector.broadcast %11 : vector<1x128xf32> to vector<4x128xf32>
    %100 = arith.addf %98, %99 : vector<4x128xf32>
    %cst_46 = arith.constant 0.000000e+00 : f32
    %101 = vector.broadcast %cst_46 : f32 to vector<4x128xf32>
    %102 = arith.maximumf %100, %101 : vector<4x128xf32>
    %103 = arith.truncf %102 : vector<4x128xf32> to vector<4x128xbf16>
    %cst_47 = arith.constant dense<0.000000e+00> : vector<4x64xf32>
    %104 = tpu.matmul %103, %12, %cst_47 {dimension_numbers = #tpu.dot_dimension_numbers<[1], [0], [0], [1], [0, 0, 1, 1], [], []>} : vector<4x128xbf16>, vector<128x64xbf16>, vector<4x64xf32> -> vector<4x64xf32>
    %105 = vector.broadcast %13 : vector<1x64xf32> to vector<4x64xf32>
    %106 = arith.addf %104, %105 : vector<4x64xf32>
    %107 = arith.addf %96, %106 : vector<4x64xf32>
    %cst_48 = arith.constant dense<0.000000e+00> : vector<4xf32>
    %108 = vector.multi_reduction <add>, %107, %cst_48 [1] : vector<4x64xf32> to vector<4xf32>
    %109 = vector.shape_cast %108 : vector<4xf32> to vector<4x1xf32>
    %cst_49 = arith.constant 6.400000e+01 : f32
    %110 = vector.broadcast %cst_49 : f32 to vector<4x1xf32>
    %111 = arith.divf %109, %110 : vector<4x1xf32>
    %112 = vector.broadcast %111 : vector<4x1xf32> to vector<4x64xf32>
    %113 = arith.subf %107, %112 : vector<4x64xf32>
    %114 = arith.mulf %113, %113 : vector<4x64xf32>
    %cst_50 = arith.constant dense<0.000000e+00> : vector<4xf32>
    %115 = vector.multi_reduction <add>, %114, %cst_50 [1] : vector<4x64xf32> to vector<4xf32>
    %116 = vector.shape_cast %115 : vector<4xf32> to vector<4x1xf32>
    %cst_51 = arith.constant 6.400000e+01 : f32
    %117 = vector.broadcast %cst_51 : f32 to vector<4x1xf32>
    %118 = arith.divf %116, %117 : vector<4x1xf32>
    %119 = vector.broadcast %111 : vector<4x1xf32> to vector<4x64xf32>
    %120 = arith.subf %107, %119 : vector<4x64xf32>
    %cst_52 = arith.constant 9.99999974E-6 : f32
    %121 = vector.broadcast %cst_52 : f32 to vector<4x1xf32>
    %122 = arith.addf %118, %121 : vector<4x1xf32>
    %123 = math.rsqrt %122 : vector<4x1xf32>
    %124 = vector.broadcast %123 : vector<4x1xf32> to vector<4x64xf32>
    %125 = arith.mulf %120, %124 : vector<4x64xf32>
    %126 = vector.broadcast %14 : vector<1x64xf32> to vector<4x64xf32>
    %127 = arith.mulf %125, %126 : vector<4x64xf32>
    %128 = vector.broadcast %15 : vector<1x64xf32> to vector<4x64xf32>
    %129 = arith.addf %127, %128 : vector<4x64xf32>
    %c0_53 = arith.constant 0 : index
    %c0_54 = arith.constant 0 : index
    %130 = vector.load %arg15[%c0_53, %c0_54] : memref<64x192xbf16, #tpu.memory_space<vmem>>, vector<64x192xbf16>
    %c0_55 = arith.constant 0 : index
    %c0_56 = arith.constant 0 : index
    %131 = vector.load %arg16[%c0_55, %c0_56] : memref<1x192xf32, #tpu.memory_space<vmem>>, vector<1x192xf32>
    %c0_57 = arith.constant 0 : index
    %c0_58 = arith.constant 0 : index
    %132 = vector.load %arg17[%c0_57, %c0_58] : memref<64x64xbf16, #tpu.memory_space<vmem>>, vector<64x64xbf16>
    %c0_59 = arith.constant 0 : index
    %c0_60 = arith.constant 0 : index
    %133 = vector.load %arg18[%c0_59, %c0_60] : memref<1x64xf32, #tpu.memory_space<vmem>>, vector<1x64xf32>
    %c0_61 = arith.constant 0 : index
    %c0_62 = arith.constant 0 : index
    %134 = vector.load %arg19[%c0_61, %c0_62] : memref<1x64xf32, #tpu.memory_space<vmem>>, vector<1x64xf32>
    %c0_63 = arith.constant 0 : index
    %c0_64 = arith.constant 0 : index
    %135 = vector.load %arg20[%c0_63, %c0_64] : memref<1x64xf32, #tpu.memory_space<vmem>>, vector<1x64xf32>
    %c0_65 = arith.constant 0 : index
    %c0_66 = arith.constant 0 : index
    %136 = vector.load %arg21[%c0_65, %c0_66] : memref<64x128xbf16, #tpu.memory_space<vmem>>, vector<64x128xbf16>
    %c0_67 = arith.constant 0 : index
    %c0_68 = arith.constant 0 : index
    %137 = vector.load %arg22[%c0_67, %c0_68] : memref<1x128xf32, #tpu.memory_space<vmem>>, vector<1x128xf32>
    %c0_69 = arith.constant 0 : index
    %c0_70 = arith.constant 0 : index
    %138 = vector.load %arg23[%c0_69, %c0_70] : memref<128x64xbf16, #tpu.memory_space<vmem>>, vector<128x64xbf16>
    %c0_71 = arith.constant 0 : index
    %c0_72 = arith.constant 0 : index
    %139 = vector.load %arg24[%c0_71, %c0_72] : memref<1x64xf32, #tpu.memory_space<vmem>>, vector<1x64xf32>
    %c0_73 = arith.constant 0 : index
    %c0_74 = arith.constant 0 : index
    %140 = vector.load %arg25[%c0_73, %c0_74] : memref<1x64xf32, #tpu.memory_space<vmem>>, vector<1x64xf32>
    %c0_75 = arith.constant 0 : index
    %c0_76 = arith.constant 0 : index
    %141 = vector.load %arg26[%c0_75, %c0_76] : memref<1x64xf32, #tpu.memory_space<vmem>>, vector<1x64xf32>
    %142 = arith.truncf %129 : vector<4x64xf32> to vector<4x64xbf16>
    %cst_77 = arith.constant dense<0.000000e+00> : vector<4x192xf32>
    %143 = tpu.matmul %142, %130, %cst_77 {dimension_numbers = #tpu.dot_dimension_numbers<[1], [0], [0], [1], [0, 0, 1, 1], [], []>} : vector<4x64xbf16>, vector<64x192xbf16>, vector<4x192xf32> -> vector<4x192xf32>
    %144 = vector.broadcast %131 : vector<1x192xf32> to vector<4x192xf32>
    %145 = arith.addf %143, %144 : vector<4x192xf32>
    %146 = vector.extract_strided_slice %145 {offsets = [0, 0], sizes = [4, 64], strides = [1, 1]} : vector<4x192xf32> to vector<4x64xf32>
    %147 = vector.extract_strided_slice %145 {offsets = [0, 64], sizes = [4, 64], strides = [1, 1]} : vector<4x192xf32> to vector<4x64xf32>
    %148 = vector.extract_strided_slice %145 {offsets = [0, 128], sizes = [4, 64], strides = [1, 1]} : vector<4x192xf32> to vector<4x64xf32>
    %149 = vector.extract_strided_slice %146 {offsets = [0, 0], sizes = [4, 32], strides = [1, 1]} : vector<4x64xf32> to vector<4x32xf32>
    %150 = arith.truncf %149 : vector<4x32xf32> to vector<4x32xbf16>
    %151 = vector.extract_strided_slice %147 {offsets = [0, 0], sizes = [4, 32], strides = [1, 1]} : vector<4x64xf32> to vector<4x32xf32>
    %152 = arith.truncf %151 : vector<4x32xf32> to vector<4x32xbf16>
    %153 = vector.extract_strided_slice %148 {offsets = [0, 0], sizes = [4, 32], strides = [1, 1]} : vector<4x64xf32> to vector<4x32xf32>
    %154 = arith.truncf %153 : vector<4x32xf32> to vector<4x32xbf16>
    %cst_78 = arith.constant dense<0.000000e+00> : vector<4x4xf32>
    %155 = tpu.matmul %150, %152, %cst_78 {dimension_numbers = #tpu.dot_dimension_numbers<[1], [1], [0], [0], [0, 0, 1, 0], [], []>} : vector<4x32xbf16>, vector<4x32xbf16>, vector<4x4xf32> -> vector<4x4xf32>
    %cst_79 = arith.constant 0.176776692 : f32
    %156 = vector.broadcast %cst_79 : f32 to vector<4x4xf32>
    %157 = arith.mulf %155, %156 : vector<4x4xf32>
    %cst_80 = arith.constant dense<0xFF800000> : vector<4xf32>
    %158 = vector.multi_reduction <maximumf>, %157, %cst_80 [1] : vector<4x4xf32> to vector<4xf32>
    %159 = vector.shape_cast %158 : vector<4xf32> to vector<4x1xf32>
    %160 = vector.broadcast %159 : vector<4x1xf32> to vector<4x4xf32>
    %161 = arith.subf %157, %160 : vector<4x4xf32>
    %162 = math.exp %161 : vector<4x4xf32>
    %cst_81 = arith.constant dense<0.000000e+00> : vector<4xf32>
    %163 = vector.multi_reduction <add>, %162, %cst_81 [1] : vector<4x4xf32> to vector<4xf32>
    %164 = vector.shape_cast %163 : vector<4xf32> to vector<4x1xf32>
    %165 = tpu.reciprocal %164 {approx = true} : vector<4x1xf32> -> vector<4x1xf32>
    %166 = vector.broadcast %165 : vector<4x1xf32> to vector<4x4xf32>
    %167 = arith.mulf %162, %166 : vector<4x4xf32>
    %168 = arith.truncf %167 : vector<4x4xf32> to vector<4x4xbf16>
    %cst_82 = arith.constant dense<0.000000e+00> : vector<4x32xf32>
    %169 = tpu.matmul %168, %154, %cst_82 {dimension_numbers = #tpu.dot_dimension_numbers<[1], [0], [0], [1], [0, 0, 1, 1], [], []>} : vector<4x4xbf16>, vector<4x32xbf16>, vector<4x32xf32> -> vector<4x32xf32>
    %170 = arith.truncf %169 : vector<4x32xf32> to vector<4x32xbf16>
    %171 = vector.extract_strided_slice %132 {offsets = [0, 0], sizes = [32, 64], strides = [1, 1]} : vector<64x64xbf16> to vector<32x64xbf16>
    %cst_83 = arith.constant dense<0.000000e+00> : vector<4x64xf32>
    %172 = tpu.matmul %170, %171, %cst_83 {dimension_numbers = #tpu.dot_dimension_numbers<[1], [0], [0], [1], [0, 0, 1, 1], [], []>} : vector<4x32xbf16>, vector<32x64xbf16>, vector<4x64xf32> -> vector<4x64xf32>
    %173 = vector.extract_strided_slice %146 {offsets = [0, 32], sizes = [4, 32], strides = [1, 1]} : vector<4x64xf32> to vector<4x32xf32>
    %174 = arith.truncf %173 : vector<4x32xf32> to vector<4x32xbf16>
    %175 = vector.extract_strided_slice %147 {offsets = [0, 32], sizes = [4, 32], strides = [1, 1]} : vector<4x64xf32> to vector<4x32xf32>
    %176 = arith.truncf %175 : vector<4x32xf32> to vector<4x32xbf16>
    %177 = vector.extract_strided_slice %148 {offsets = [0, 32], sizes = [4, 32], strides = [1, 1]} : vector<4x64xf32> to vector<4x32xf32>
    %178 = arith.truncf %177 : vector<4x32xf32> to vector<4x32xbf16>
    %cst_84 = arith.constant dense<0.000000e+00> : vector<4x4xf32>
    %179 = tpu.matmul %174, %176, %cst_84 {dimension_numbers = #tpu.dot_dimension_numbers<[1], [1], [0], [0], [0, 0, 1, 0], [], []>} : vector<4x32xbf16>, vector<4x32xbf16>, vector<4x4xf32> -> vector<4x4xf32>
    %cst_85 = arith.constant 0.176776692 : f32
    %180 = vector.broadcast %cst_85 : f32 to vector<4x4xf32>
    %181 = arith.mulf %179, %180 : vector<4x4xf32>
    %cst_86 = arith.constant dense<0xFF800000> : vector<4xf32>
    %182 = vector.multi_reduction <maximumf>, %181, %cst_86 [1] : vector<4x4xf32> to vector<4xf32>
    %183 = vector.shape_cast %182 : vector<4xf32> to vector<4x1xf32>
    %184 = vector.broadcast %183 : vector<4x1xf32> to vector<4x4xf32>
    %185 = arith.subf %181, %184 : vector<4x4xf32>
    %186 = math.exp %185 : vector<4x4xf32>
    %cst_87 = arith.constant dense<0.000000e+00> : vector<4xf32>
    %187 = vector.multi_reduction <add>, %186, %cst_87 [1] : vector<4x4xf32> to vector<4xf32>
    %188 = vector.shape_cast %187 : vector<4xf32> to vector<4x1xf32>
    %189 = tpu.reciprocal %188 {approx = true} : vector<4x1xf32> -> vector<4x1xf32>
    %190 = vector.broadcast %189 : vector<4x1xf32> to vector<4x4xf32>
    %191 = arith.mulf %186, %190 : vector<4x4xf32>
    %192 = arith.truncf %191 : vector<4x4xf32> to vector<4x4xbf16>
    %cst_88 = arith.constant dense<0.000000e+00> : vector<4x32xf32>
    %193 = tpu.matmul %192, %178, %cst_88 {dimension_numbers = #tpu.dot_dimension_numbers<[1], [0], [0], [1], [0, 0, 1, 1], [], []>} : vector<4x4xbf16>, vector<4x32xbf16>, vector<4x32xf32> -> vector<4x32xf32>
    %194 = arith.truncf %193 : vector<4x32xf32> to vector<4x32xbf16>
    %195 = vector.extract_strided_slice %132 {offsets = [32, 0], sizes = [32, 64], strides = [1, 1]} : vector<64x64xbf16> to vector<32x64xbf16>
    %cst_89 = arith.constant dense<0.000000e+00> : vector<4x64xf32>
    %196 = tpu.matmul %194, %195, %cst_89 {dimension_numbers = #tpu.dot_dimension_numbers<[1], [0], [0], [1], [0, 0, 1, 1], [], []>} : vector<4x32xbf16>, vector<32x64xbf16>, vector<4x64xf32> -> vector<4x64xf32>
    %197 = arith.addf %172, %196 : vector<4x64xf32>
    %198 = vector.broadcast %133 : vector<1x64xf32> to vector<4x64xf32>
    %199 = arith.addf %197, %198 : vector<4x64xf32>
    %200 = arith.addf %129, %199 : vector<4x64xf32>
    %cst_90 = arith.constant dense<0.000000e+00> : vector<4xf32>
    %201 = vector.multi_reduction <add>, %200, %cst_90 [1] : vector<4x64xf32> to vector<4xf32>
    %202 = vector.shape_cast %201 : vector<4xf32> to vector<4x1xf32>
    %cst_91 = arith.constant 6.400000e+01 : f32
    %203 = vector.broadcast %cst_91 : f32 to vector<4x1xf32>
    %204 = arith.divf %202, %203 : vector<4x1xf32>
    %205 = vector.broadcast %204 : vector<4x1xf32> to vector<4x64xf32>
    %206 = arith.subf %200, %205 : vector<4x64xf32>
    %207 = arith.mulf %206, %206 : vector<4x64xf32>
    %cst_92 = arith.constant dense<0.000000e+00> : vector<4xf32>
    %208 = vector.multi_reduction <add>, %207, %cst_92 [1] : vector<4x64xf32> to vector<4xf32>
    %209 = vector.shape_cast %208 : vector<4xf32> to vector<4x1xf32>
    %cst_93 = arith.constant 6.400000e+01 : f32
    %210 = vector.broadcast %cst_93 : f32 to vector<4x1xf32>
    %211 = arith.divf %209, %210 : vector<4x1xf32>
    %212 = vector.broadcast %204 : vector<4x1xf32> to vector<4x64xf32>
    %213 = arith.subf %200, %212 : vector<4x64xf32>
    %cst_94 = arith.constant 9.99999974E-6 : f32
    %214 = vector.broadcast %cst_94 : f32 to vector<4x1xf32>
    %215 = arith.addf %211, %214 : vector<4x1xf32>
    %216 = math.rsqrt %215 : vector<4x1xf32>
    %217 = vector.broadcast %216 : vector<4x1xf32> to vector<4x64xf32>
    %218 = arith.mulf %213, %217 : vector<4x64xf32>
    %219 = vector.broadcast %134 : vector<1x64xf32> to vector<4x64xf32>
    %220 = arith.mulf %218, %219 : vector<4x64xf32>
    %221 = vector.broadcast %135 : vector<1x64xf32> to vector<4x64xf32>
    %222 = arith.addf %220, %221 : vector<4x64xf32>
    %223 = arith.truncf %222 : vector<4x64xf32> to vector<4x64xbf16>
    %cst_95 = arith.constant dense<0.000000e+00> : vector<4x128xf32>
    %224 = tpu.matmul %223, %136, %cst_95 {dimension_numbers = #tpu.dot_dimension_numbers<[1], [0], [0], [1], [0, 0, 1, 1], [], []>} : vector<4x64xbf16>, vector<64x128xbf16>, vector<4x128xf32> -> vector<4x128xf32>
    %225 = vector.broadcast %137 : vector<1x128xf32> to vector<4x128xf32>
    %226 = arith.addf %224, %225 : vector<4x128xf32>
    %cst_96 = arith.constant 0.000000e+00 : f32
    %227 = vector.broadcast %cst_96 : f32 to vector<4x128xf32>
    %228 = arith.maximumf %226, %227 : vector<4x128xf32>
    %229 = arith.truncf %228 : vector<4x128xf32> to vector<4x128xbf16>
    %cst_97 = arith.constant dense<0.000000e+00> : vector<4x64xf32>
    %230 = tpu.matmul %229, %138, %cst_97 {dimension_numbers = #tpu.dot_dimension_numbers<[1], [0], [0], [1], [0, 0, 1, 1], [], []>} : vector<4x128xbf16>, vector<128x64xbf16>, vector<4x64xf32> -> vector<4x64xf32>
    %231 = vector.broadcast %139 : vector<1x64xf32> to vector<4x64xf32>
    %232 = arith.addf %230, %231 : vector<4x64xf32>
    %233 = arith.addf %222, %232 : vector<4x64xf32>
    %cst_98 = arith.constant dense<0.000000e+00> : vector<4xf32>
    %234 = vector.multi_reduction <add>, %233, %cst_98 [1] : vector<4x64xf32> to vector<4xf32>
    %235 = vector.shape_cast %234 : vector<4xf32> to vector<4x1xf32>
    %cst_99 = arith.constant 6.400000e+01 : f32
    %236 = vector.broadcast %cst_99 : f32 to vector<4x1xf32>
    %237 = arith.divf %235, %236 : vector<4x1xf32>
    %238 = vector.broadcast %237 : vector<4x1xf32> to vector<4x64xf32>
    %239 = arith.subf %233, %238 : vector<4x64xf32>
    %240 = arith.mulf %239, %239 : vector<4x64xf32>
    %cst_100 = arith.constant dense<0.000000e+00> : vector<4xf32>
    %241 = vector.multi_reduction <add>, %240, %cst_100 [1] : vector<4x64xf32> to vector<4xf32>
    %242 = vector.shape_cast %241 : vector<4xf32> to vector<4x1xf32>
    %cst_101 = arith.constant 6.400000e+01 : f32
    %243 = vector.broadcast %cst_101 : f32 to vector<4x1xf32>
    %244 = arith.divf %242, %243 : vector<4x1xf32>
    %245 = vector.broadcast %237 : vector<4x1xf32> to vector<4x64xf32>
    %246 = arith.subf %233, %245 : vector<4x64xf32>
    %cst_102 = arith.constant 9.99999974E-6 : f32
    %247 = vector.broadcast %cst_102 : f32 to vector<4x1xf32>
    %248 = arith.addf %244, %247 : vector<4x1xf32>
    %249 = math.rsqrt %248 : vector<4x1xf32>
    %250 = vector.broadcast %249 : vector<4x1xf32> to vector<4x64xf32>
    %251 = arith.mulf %246, %250 : vector<4x64xf32>
    %252 = vector.broadcast %140 : vector<1x64xf32> to vector<4x64xf32>
    %253 = arith.mulf %251, %252 : vector<4x64xf32>
    %254 = vector.broadcast %141 : vector<1x64xf32> to vector<4x64xf32>
    %255 = arith.addf %253, %254 : vector<4x64xf32>
    %c0_103 = arith.constant 0 : index
    %c0_104 = arith.constant 0 : index
    %256 = vector.load %arg27[%c0_103, %c0_104] : memref<64x128xbf16, #tpu.memory_space<vmem>>, vector<64x128xbf16>
    %c0_105 = arith.constant 0 : index
    %c0_106 = arith.constant 0 : index
    %257 = vector.load %arg28[%c0_105, %c0_106] : memref<1x128xf32, #tpu.memory_space<vmem>>, vector<1x128xf32>
    %cst_107 = arith.constant dense<0.000000e+00> : vector<64xf32>
    %258 = vector.multi_reduction <add>, %255, %cst_107 [0] : vector<4x64xf32> to vector<64xf32>
    %259 = vector.shape_cast %258 : vector<64xf32> to vector<1x64xf32>
    %cst_108 = arith.constant 4.000000e+00 : f32
    %260 = vector.broadcast %cst_108 : f32 to vector<1x64xf32>
    %261 = arith.divf %259, %260 : vector<1x64xf32>
    %262 = arith.truncf %261 : vector<1x64xf32> to vector<1x64xbf16>
    %cst_109 = arith.constant dense<0.000000e+00> : vector<1x128xf32>
    %263 = tpu.matmul %262, %256, %cst_109 {dimension_numbers = #tpu.dot_dimension_numbers<[1], [0], [0], [1], [0, 0, 1, 1], [], []>} : vector<1x64xbf16>, vector<64x128xbf16>, vector<1x128xf32> -> vector<1x128xf32>
    %264 = arith.addf %263, %257 : vector<1x128xf32>
    %c0_110 = arith.constant 0 : index
    %c0_111 = arith.constant 0 : index
    %c0_112 = arith.constant 0 : index
    %265 = vector.load %arg29[%c0_110, %c0_111, %c0_112] : memref<1x1x128xf32, #tpu.memory_space<vmem>>, vector<1x1x128xf32>
    %266 = vector.shape_cast %265 : vector<1x1x128xf32> to vector<1x128xf32>
    %267 = vector.shape_cast %264 : vector<1x128xf32> to vector<1x1x128xf32>
    tpu.vector_store %arg29[%c0_110, %c0_111, %c0_112], %267 {strides = array<i32>} : memref<1x1x128xf32, #tpu.memory_space<vmem>>, vector<1x1x128xf32>,
    return
  }
  func.func @transform_0(%arg0: i32) -> (i32, i32, i32) {
    %c0_i32 = arith.constant 0 : i32
    %c0_i32_0 = arith.constant 0 : i32
    %c0_i32_1 = arith.constant 0 : i32
    return %arg0, %c0_i32, %c0_i32_0 : i32, i32, i32
  }
  func.func @transform_1(%arg0: i32) -> (i32, i32) {
    %c0_i32 = arith.constant 0 : i32
    %c0_i32_0 = arith.constant 0 : i32
    %c0_i32_1 = arith.constant 0 : i32
    return %c0_i32, %c0_i32_0 : i32, i32
  }
  func.func @transform_2(%arg0: i32) -> (i32, i32) {
    %c0_i32 = arith.constant 0 : i32
    %c0_i32_0 = arith.constant 0 : i32
    %c0_i32_1 = arith.constant 0 : i32
    return %c0_i32, %c0_i32_0 : i32, i32
  }
  func.func @transform_3(%arg0: i32) -> (i32, i32) {
    %c0_i32 = arith.constant 0 : i32
    %c0_i32_0 = arith.constant 0 : i32
    %c0_i32_1 = arith.constant 0 : i32
    return %c0_i32, %c0_i32_0 : i32, i32
  }
  func.func @transform_4(%arg0: i32) -> (i32, i32) {
    %c0_i32 = arith.constant 0 : i32
    %c0_i32_0 = arith.constant 0 : i32
    %c0_i32_1 = arith.constant 0 : i32
    return %c0_i32, %c0_i32_0 : i32, i32
  }
  func.func @transform_5(%arg0: i32) -> (i32, i32) {
    %c0_i32 = arith.constant 0 : i32
    %c0_i32_0 = arith.constant 0 : i32
    %c0_i32_1 = arith.constant 0 : i32
    return %c0_i32, %c0_i32_0 : i32, i32
  }
  func.func @transform_6(%arg0: i32) -> (i32, i32) {
    %c0_i32 = arith.constant 0 : i32
    %c0_i32_0 = arith.constant 0 : i32
    %c0_i32_1 = arith.constant 0 : i32
    return %c0_i32, %c0_i32_0 : i32, i32
  }
  func.func @transform_7(%arg0: i32) -> (i32, i32) {
    %c0_i32 = arith.constant 0 : i32
    %c0_i32_0 = arith.constant 0 : i32
    %c0_i32_1 = arith.constant 0 : i32
    return %c0_i32, %c0_i32_0 : i32, i32
  }
  func.func @transform_8(%arg0: i32) -> (i32, i32) {
    %c0_i32 = arith.constant 0 : i32
    %c0_i32_0 = arith.constant 0 : i32
    %c0_i32_1 = arith.constant 0 : i32
    return %c0_i32, %c0_i32_0 : i32, i32
  }
  func.func @transform_9(%arg0: i32) -> (i32, i32) {
    %c0_i32 = arith.constant 0 : i32
    %c0_i32_0 = arith.constant 0 : i32
    %c0_i32_1 = arith.constant 0 : i32
    return %c0_i32, %c0_i32_0 : i32, i32
  }
  func.func @transform_10(%arg0: i32) -> (i32, i32) {
    %c0_i32 = arith.constant 0 : i32
    %c0_i32_0 = arith.constant 0 : i32
    %c0_i32_1 = arith.constant 0 : i32
    return %c0_i32, %c0_i32_0 : i32, i32
  }
  func.func @transform_11(%arg0: i32) -> (i32, i32) {
    %c0_i32 = arith.constant 0 : i32
    %c0_i32_0 = arith.constant 0 : i32
    %c0_i32_1 = arith.constant 0 : i32
    return %c0_i32, %c0_i32_0 : i32, i32
  }
  func.func @transform_12(%arg0: i32) -> (i32, i32) {
    %c0_i32 = arith.constant 0 : i32
    %c0_i32_0 = arith.constant 0 : i32
    %c0_i32_1 = arith.constant 0 : i32
    return %c0_i32, %c0_i32_0 : i32, i32
  }
  func.func @transform_13(%arg0: i32) -> (i32, i32) {
    %c0_i32 = arith.constant 0 : i32
    %c0_i32_0 = arith.constant 0 : i32
    %c0_i32_1 = arith.constant 0 : i32
    return %c0_i32, %c0_i32_0 : i32, i32
  }
  func.func @transform_14(%arg0: i32) -> (i32, i32) {
    %c0_i32 = arith.constant 0 : i32
    %c0_i32_0 = arith.constant 0 : i32
    %c0_i32_1 = arith.constant 0 : i32
    return %c0_i32, %c0_i32_0 : i32, i32
  }
  func.func @transform_15(%arg0: i32) -> (i32, i32) {
    %c0_i32 = arith.constant 0 : i32
    %c0_i32_0 = arith.constant 0 : i32
    %c0_i32_1 = arith.constant 0 : i32
    return %c0_i32, %c0_i32_0 : i32, i32
  }
  func.func @transform_16(%arg0: i32) -> (i32, i32) {
    %c0_i32 = arith.constant 0 : i32
    %c0_i32_0 = arith.constant 0 : i32
    %c0_i32_1 = arith.constant 0 : i32
    return %c0_i32, %c0_i32_0 : i32, i32
  }
  func.func @transform_17(%arg0: i32) -> (i32, i32) {
    %c0_i32 = arith.constant 0 : i32
    %c0_i32_0 = arith.constant 0 : i32
    %c0_i32_1 = arith.constant 0 : i32
    return %c0_i32, %c0_i32_0 : i32, i32
  }
  func.func @transform_18(%arg0: i32) -> (i32, i32) {
    %c0_i32 = arith.constant 0 : i32
    %c0_i32_0 = arith.constant 0 : i32
    %c0_i32_1 = arith.constant 0 : i32
    return %c0_i32, %c0_i32_0 : i32, i32
  }
  func.func @transform_19(%arg0: i32) -> (i32, i32) {
    %c0_i32 = arith.constant 0 : i32
    %c0_i32_0 = arith.constant 0 : i32
    %c0_i32_1 = arith.constant 0 : i32
    return %c0_i32, %c0_i32_0 : i32, i32
  }
  func.func @transform_20(%arg0: i32) -> (i32, i32) {
    %c0_i32 = arith.constant 0 : i32
    %c0_i32_0 = arith.constant 0 : i32
    %c0_i32_1 = arith.constant 0 : i32
    return %c0_i32, %c0_i32_0 : i32, i32
  }
  func.func @transform_21(%arg0: i32) -> (i32, i32) {
    %c0_i32 = arith.constant 0 : i32
    %c0_i32_0 = arith.constant 0 : i32
    %c0_i32_1 = arith.constant 0 : i32
    return %c0_i32, %c0_i32_0 : i32, i32
  }
  func.func @transform_22(%arg0: i32) -> (i32, i32) {
    %c0_i32 = arith.constant 0 : i32
    %c0_i32_0 = arith.constant 0 : i32
    %c0_i32_1 = arith.constant 0 : i32
    return %c0_i32, %c0_i32_0 : i32, i32
  }
  func.func @transform_23(%arg0: i32) -> (i32, i32) {
    %c0_i32 = arith.constant 0 : i32
    %c0_i32_0 = arith.constant 0 : i32
    %c0_i32_1 = arith.constant 0 : i32
    return %c0_i32, %c0_i32_0 : i32, i32
  }
  func.func @transform_24(%arg0: i32) -> (i32, i32) {
    %c0_i32 = arith.constant 0 : i32
    %c0_i32_0 = arith.constant 0 : i32
    %c0_i32_1 = arith.constant 0 : i32
    return %c0_i32, %c0_i32_0 : i32, i32
  }
  func.func @transform_25(%arg0: i32) -> (i32, i32) {
    %c0_i32 = arith.constant 0 : i32
    %c0_i32_0 = arith.constant 0 : i32
    %c0_i32_1 = arith.constant 0 : i32
    return %c0_i32, %c0_i32_0 : i32, i32
  }
  func.func @transform_26(%arg0: i32) -> (i32, i32) {
    %c0_i32 = arith.constant 0 : i32
    %c0_i32_0 = arith.constant 0 : i32
    %c0_i32_1 = arith.constant 0 : i32
    return %c0_i32, %c0_i32_0 : i32, i32
  }
  func.func @transform_27(%arg0: i32) -> (i32, i32) {
    %c0_i32 = arith.constant 0 : i32
    %c0_i32_0 = arith.constant 0 : i32
    %c0_i32_1 = arith.constant 0 : i32
    return %c0_i32, %c0_i32_0 : i32, i32
  }
  func.func @transform_28(%arg0: i32) -> (i32, i32, i32) {
    %c0_i32 = arith.constant 0 : i32
    %c0_i32_0 = arith.constant 0 : i32
    %c0_i32_1 = arith.constant 0 : i32
    return %arg0, %c0_i32, %c0_i32_0 : i32, i32, i32
  }
}

</mosaic_0001>

<bundles_post_ra>
// kernel: forward.4
= control target key start
LH: loop header
LB: loop body
LE: loop exit
PB: predicated region body
PF: predicated region fallthrough
CT: control target
= control target key end

     0   :  { %s835_s18 = smov 0   ;;  %s837_s19 = smov 0   ;;  %s1011_s0 = inlined_call_operand.vmem [shape: bf16[16,9], index: 0, kind: input, shape index: {}]   ;;  %s1012_s1 = inlined_call_operand.vmem [shape: bf16[9,2048], index: 1, kind: input, shape index: {}]   ;;  %s1013_s2 = inlined_call_operand.vmem [shape: f32[16,1], index: 2, kind: input, shape index: {}]   ;;  %s1014_s3 = inlined_call_operand.vmem [shape: f32[16,1], index: 3, kind: input, shape index: {}]   ;;  %s1015_s4 = inlined_call_operand.vmem [shape: f32[16,1], index: 4, kind: input, shape index: {}]   ;;  %s1016_s5 = inlined_call_operand.vmem [shape: f32[16,2048], index: 5, kind: output, shape index: {}]  }
   0x1   :  { %s839_s20 = smov 0  }
   0x2 LB: > { %s720_s21 = sadd.s32 4294967295, %s801_s20   ;;  %s852_s22 = sadd.s32 1, %s801_s20   ;;  %s801_s20 = sphi %s839_s20, %s1020_s20   ;;  %s797_s19 = sphi %s837_s19, %s1019_s19   ;;  %s793_s18 = sphi %s835_s18, %s1018_s18  }
   0x3   : > { %s40_s23 = ssub.s32 %s801_s20, %s852_s22  ;;  %s43_s24 = sadd.s32 1, %s797_s19 }
   0x4   : > { %p41_p0 = scmp.eq.s32.totalorder %s40_s23, 0  ;;  %p50_p1 = scmp.ne.s32.totalorder %s797_s19, %s793_s18 }
   0x5   : > { %p51_p2 = scmp.eq.s32.totalorder %s801_s20, 0  ;;  %p143_p3 = scmp.eq.s32.totalorder %s720_s21, 1 }
   0x6   : > { %s863_s25 = scalar_select %p41_p0, %s797_s19, %s43_s24  }
   0x7   : > { %p52_p4 = por %p51_p2, %p50_p1  ;;  %p865_p5 = por %p143_p3, %p50_p1 }
   0x8   : > { %p723_p6 = scmp.ge.s32.totalorder %s801_s20, 2 }
   0xa   : > { %177 = sbr.rel (%p723_p6) target bundleno = 25 (0x19), region = 32 }
  0x11   : > { %180 = sbr.rel (!%p52_p4) target bundleno = 25 (0x19), region = 36  ;;  %s182_s27 = sand.u32 (%p52_p4), 1, %s797_s19  }
  0x12   : > { %s748_s28 = sshll.u32 (%p52_p4), %s801_s20, 5  ;;  %s724_s29 = sshll.u32 (%p52_p4), %s182_s27, 6 }
  0x13   : > { %s187_s7 = scalar_lea.vmem (%p52_p4), %s1012_s1, %s748_s28  ;;  %s184_s8 = scalar_lea.vmem (%p52_p4), [#allocation2], %s724_s29 }
  0x14   : > { %v200_v0 = vld [vmem:[%s187_s7] sm:$0xff] (%p52_p4)  ;;  %v202_v1 = vld [vmem:[%s187_s7 + $0x8] sm:$0xff] (%p52_p4)  ;;  %v204_v2 = vld [vmem:[%s187_s7 + $0x10] sm:$0xff] (%p52_p4) }
  0x15   : > { %201 = vst [vmem:[%s184_s8] sm:$0xff] (%p52_p4), %v200_v0  ;;  %203 = vst [vmem:[%s184_s8 + $0x8] sm:$0xff] (%p52_p4), %v202_v1  ;;  %v206_v3 = vld [vmem:[%s187_s7 + $0x18] sm:$0xff] (%p52_p4)  ;;  %v208_v4 = vld [vmem:[%s187_s7 + $0x40] sm:$0xff] (%p52_p4) }
  0x16   : > { %205 = vst [vmem:[%s184_s8 + $0x10] sm:$0xff] (%p52_p4), %v204_v2  ;;  %v210_v5 = vld [vmem:[%s187_s7 + $0x48] sm:$0xff] (%p52_p4)  ;;  %207 = vst [vmem:[%s184_s8 + $0x18] sm:$0xff] (%p52_p4), %v206_v3  ;;  %v212_v6 = vld [vmem:[%s187_s7 + $0x50] sm:$0xff] (%p52_p4) }
  0x17   : > { %209 = vst [vmem:[%s184_s8 + $0x20] sm:$0xff] (%p52_p4), %v208_v4  ;;  %211 = vst [vmem:[%s184_s8 + $0x28] sm:$0xff] (%p52_p4), %v210_v5  ;;  %v214_v7 = vld [vmem:[%s187_s7 + $0x58] sm:$0xff] (%p52_p4) }
  0x18   : > { %213 = vst [vmem:[%s184_s8 + $0x30] sm:$0xff] %v212_v6  ;;  %215 = vst [vmem:[%s184_s8 + $0x38] sm:$0xff] %v214_v7 }
  0x19 PF: > { %p727_p7 = scmp.ge.s32.totalorder %s801_s20, 1  ;;  %p220_p8 = scmp.lt.s32.totalorder %s801_s20, 3 }
  0x1b   : > { %p221_p9 = pnand %p727_p7, %p220_p8 }
  0x1c   : > { %s227_s9 = sand.u32 (!%p221_p9), 1, %s793_s18   ;;  %vm319_vm0 = vcmask (!%p221_p9), 1043456   ;;  %vm320_vm1 = vcmask (!%p221_p9), 1044480   ;;  %v803_v8 = vmov (!%p221_p9), 65535   ;;  %v804_v10 = vmov (!%p221_p9), 0   ;;  %v266_v11 = vld [vmem:[%s1013_s2] sm:$0xff] (!%p221_p9) }
  0x1d   : > { %224 = sbr.rel (%p221_p9) target bundleno = 282 (0x11a), region = 59  ;;  %s728_s10 = sshll.u32 (!%p221_p9), %s227_s9, 6  ;;  %v321_v9 = vsel (!%p221_p9), %vm319_vm0, 4294967295, %v803_v8  ;;  %379 = vmatprep.mubr.bf16.mxu0 (!%p221_p9), %v804_v10  ;;  %422 = vmatprep.mubr.bf16.mxu1 (!%p221_p9), %v804_v10  ;;  %v535_v27 = vld [vmem:[%s1014_s3] sm:$0xff] (!%p221_p9)  ;;  %v267_v32 = vld [vmem:[%s1013_s2 + $0x8] sm:$0xff] (!%p221_p9)  ;;  %vm315_vm2 = vcmask (!%p221_p9), 72704  }
  0x1e   : > { %776 = vset.pattern.permute.xlu0 (!%p221_p9), %v804_v10  ;;  %777 = vset.pattern.permute.xlu1 (!%p221_p9), %v804_v10  ;;  %s229_s13 = scalar_lea.vmem (!%p221_p9), [#allocation2], %s728_s10  ;;  %v322_v14 = vsel (!%p221_p9), %vm320_vm1, %v321_v9, 0  ;;  %v778_v36 = vld [vmem:[%s1011_s0] sm:$0xff] (!%p221_p9)   ;;  %v536_v38 = vld [vmem:[%s1014_s3 + $0x8] sm:$0xff] (!%p221_p9)  ;;  %s913_s8 = sshll.u32 (!%p221_p9), %s227_s9, 7 }
  0x1f   : > { %v258_v12 = vld [vmem:[%s229_s13] sm:$0xff] (!%p221_p9)  ;;  %v259_v15 = vld [vmem:[%s229_s13 + $0x8] sm:$0xff] (!%p221_p9)  ;;  %270 = vperm.xlu0 (!%p221_p9), %776, %v266_v11   ;;  %v260_v19 = vld [vmem:[%s229_s13 + $0x10] sm:$0xff] (!%p221_p9)  ;;  %539 = vperm.xlu1 (!%p221_p9), %777, %v535_v27   ;;  %s935_s18 = scalar_lea.vmem (!%p221_p9), [#allocation3], %s913_s8 }
  0x20   : > { %v262_v13 = vld [vmem:[%s229_s13 + $0x20] sm:$0x11] (!%p221_p9)  ;;  %v263_v17 = vld [vmem:[%s229_s13 + $0x28] sm:$0x11] (!%p221_p9)  ;;  %v264_v20 = vld [vmem:[%s229_s13 + $0x30] sm:$0x11] (!%p221_p9) }
  0x21   : > { %v732_v16 = vcombine.high (!%p221_p9), %v258_v12, %v262_v13  ;;  %v731_v18 = vcombine.low (!%p221_p9), %v258_v12, %v262_v13  ;;  %v734_v21 = vcombine.high (!%p221_p9), %v259_v15, %v263_v17  ;;  %v733_v22 = vcombine.low (!%p221_p9), %v259_v15, %v263_v17  ;;  %v261_v25 = vld [vmem:[%s229_s13 + $0x18] sm:$0xff] (!%p221_p9)  ;;  %v563_v40 = vld [vmem:[%s1015_s4] sm:$0xff] (!%p221_p9)  ;;  %v564_v42 = vld [vmem:[%s1015_s4 + $0x8] sm:$0xff] (!%p221_p9) }
  0x22   : > { %v735_v23 = vcombine.low (!%p221_p9), %v260_v19, %v264_v20  ;;  %v736_v24 = vcombine.high (!%p221_p9), %v260_v19, %v264_v20  ;;  %v265_v26 = vld [vmem:[%s229_s13 + $0x38] sm:$0x11] (!%p221_p9) }
  0x23   : > { %v327_v28 = vand.u32 (!%p221_p9), %v732_v16, %v322_v14  ;;  %v324_v29 = vand.u32 (!%p221_p9), %v731_v18, %v322_v14  ;;  %v737_v30 = vcombine.low (!%p221_p9), %v261_v25, %v265_v26  ;;  %v738_v31 = vcombine.high (!%p221_p9), %v261_v25, %v265_v26  ;;  %275 = vperm.xlu0 (!%p221_p9), %776, %v267_v32  }
  0x24   : > { %v333_v33 = vand.u32 %v734_v21, %v322_v14  ;;  %v330_v34 = vand.u32 %v733_v22, %v322_v14  ;;  %v339_v35 = vand.u32 %v736_v24, %v322_v14  ;;  %v336_v39 = vand.u32 %v735_v23, %v322_v14  ;;  %544 = vperm.xlu1 %777, %v536_v38   ;;  %s749_s9 = sshll.u32 (%p865_p5), %s720_s21, 6 }
  0x25   : > { %347 = vmatprep.subr.bf16.mxu0 %v327_v28  ;;  %v345_v37 = vand.u32 %v738_v31, %v322_v14  ;;  %v342_v41 = vand.u32 %v737_v30, %v322_v14  ;;  %s616_s26 = scalar_lea.vmem (%p865_p5), %s1016_s5, %s749_s9 }
  0x26   : > { %390 = vmatprep.subr.bf16.mxu1 %v333_v33  ;;  %348 = vmatpush1.bf16.msra.mxu0 %v324_v29 }
  0x27   : > { %391 = vmatpush1.bf16.msra.mxu1 %v330_v34  ;;  %433 = vmatprep.subr.bf16.mxu0 %v339_v35 }
  0x28   : > { %476 = vmatprep.subr.bf16.mxu1 %v345_v37  ;;  %567 = vperm.xlu0 %776, %v563_v40  }
  0x29   : > { %739 = vmatmul.mubr.msk.bf16.vlgmr.msra.gmra.mrb[0].mxu0 %vm315_vm2, %v778_v36  ;;  %572 = vperm.xlu1 %777, %v564_v42  }
  0x2a   : > { %740 = vmatmul.mubr.msk.bf16.vlgmr.msra.gmra.mrb[0].mxu1 %vm315_vm2, %v778_v36  ;;  %434 = vmatpush1.bf16.msra.mxu0 %v336_v39 }
  0x2b   : > { %477 = vmatpush1.bf16.msra.mxu1 %v342_v41  ;;  %465 = vmatprep.mubr.bf16.mxu0 %v804_v10 }
  0x2c   : > { %508 = vmatprep.mubr.bf16.mxu1 %v804_v10 }
  0x31   : > { %741 = vmatmul.mubr.msk.bf16.vlgmr.msra.gmra.mrb[4].mxu0 %vm315_vm2, %v778_v36 }
  0x32   : > { %742 = vmatmul.mubr.msk.bf16.vlgmr.msra.gmra.mrb[4].mxu1 %vm315_vm2, %v778_v36 }
  0x9e   : > { %v271_v43 = vpop.permute.xlu0 %270  ;;  %v905_v44 = vpop.permute.xlu1 %539 }
  0xa2   : > { %v907_v45 = vpop.permute.xlu0 %275 }
  0xa3   : > { %v909_v47 = vpop.permute.xlu1 %544 }
  0xa7   : > { %v918_v1 = vpop.permute.xlu0 %567 }
  0xa8   : > { %v924_v10 = vpop.permute.xlu1 %572 }
  0xfc   : > { %v381_v46 = vpop.f32.mrb[0].mxu0 }
  0xfd   : > { %v382_v48 = vadd.f32 %v381_v46, %v271_v43  ;;  %v424_v49 = vpop.f32.mrb[0].mxu1  ;;  %v383_v50 = vpop.f32.mrb[1].mxu0 }
  0xfe   : > { %v425_v51 = vadd.f32 %v424_v49, %v271_v43  ;;  %v384_v52 = vadd.f32 %v383_v50, %v271_v43  ;;  %v426_v53 = vpop.f32.mrb[1].mxu1  ;;  %v385_v54 = vpop.f32.mrb[2].mxu0 }
  0xff   : > { %v519_v55 = vmax.f32 %v382_v48, 0.0  ;;  %v427_v56 = vadd.f32 %v426_v53, %v271_v43  ;;  %v386_v57 = vadd.f32 %v385_v54, %v907_v45  ;;  %v428_v58 = vpop.f32.mrb[2].mxu1  ;;  %v387_v59 = vpop.f32.mrb[3].mxu0 }
 0x100   : > { %v521_v60 = vmax.f32 %v425_v51, 0.0  ;;  %v520_v61 = vmax.f32 %v384_v52, 0.0  ;;  %v429_v62 = vadd.f32 %v428_v58, %v907_v45  ;;  %v388_v63 = vadd.f32 %v387_v59, %v907_v45  ;;  %v430_v0 = vpop.f32.mrb[3].mxu1 }
 0x101   : > { %v547_v2 = vmul.f32 %v905_v44, %v519_v55  ;;  %v522_v3 = vmax.f32 %v427_v56, 0.0  ;;  %v527_v4 = vmax.f32 %v386_v57, 0.0  ;;  %v431_v5 = vadd.f32 %v430_v0, %v907_v45 }
 0x102   : > { %v549_v6 = vmul.f32 %v905_v44, %v521_v60  ;;  %v548_v7 = vmul.f32 %v905_v44, %v520_v61  ;;  %v529_v8 = vmax.f32 %v429_v62, 0.0  ;;  %v528_v9 = vmax.f32 %v388_v63, 0.0 }
 0x103   : > { %v550_v11 = vmul.f32 %v905_v44, %v522_v3  ;;  %v530_v12 = vmax.f32 %v431_v5, 0.0  ;;  %v575_v13 = vadd.f32 %v918_v1, %v547_v2  ;;  %v555_v14 = vmul.f32 %v909_v47, %v527_v4 }
 0x104   : > { %v576_v15 = vadd.f32 %v918_v1, %v548_v7  ;;  %v577_v16 = vadd.f32 %v918_v1, %v549_v6  ;;  %v556_v17 = vmul.f32 %v909_v47, %v528_v9  ;;  %v557_v18 = vmul.f32 %v909_v47, %v529_v8  ;;  %v467_v19 = vpop.f32.mrb[4].mxu0 }
 0x105   : > { %v578_v20 = vadd.f32 %v918_v1, %v550_v11  ;;  %591 = vst [vmem:[%s935_s18] sm:$0xff] %v575_v13  ;;  %v558_v21 = vmul.f32 %v909_v47, %v530_v12  ;;  %v583_v22 = vadd.f32 %v924_v10, %v555_v14  ;;  %v468_v23 = vadd.f32 %v467_v19, %v271_v43  ;;  %v510_v24 = vpop.f32.mrb[4].mxu1  ;;  %v469_v25 = vpop.f32.mrb[5].mxu0 }
 0x106   : > { %592 = vst [vmem:[%s935_s18 + $0x8] sm:$0xff] %v576_v15  ;;  %593 = vst [vmem:[%s935_s18 + $0x10] sm:$0xff] %v577_v16  ;;  %v584_v26 = vadd.f32 %v924_v10, %v556_v17  ;;  %v585_v27 = vadd.f32 %v924_v10, %v557_v18  ;;  %v511_v28 = vadd.f32 %v510_v24, %v271_v43  ;;  %v512_v30 = vpop.f32.mrb[5].mxu1  ;;  %v471_v31 = vpop.f32.mrb[6].mxu0 }
 0x107   : > { %v470_v29 = vadd.f32 %v469_v25, %v271_v43  ;;  %594 = vst [vmem:[%s935_s18 + $0x18] sm:$0xff] %v578_v20  ;;  %v586_v32 = vadd.f32 %v924_v10, %v558_v21  ;;  %599 = vst [vmem:[%s935_s18 + $0x40] sm:$0xff] %v583_v22  ;;  %v523_v33 = vmax.f32 %v468_v23, 0.0  ;;  %v513_v34 = vadd.f32 %v512_v30, %v271_v43  ;;  %v514_v36 = vpop.f32.mrb[6].mxu1  ;;  %v473_v37 = vpop.f32.mrb[7].mxu0 }
 0x108   : > { %v472_v35 = vadd.f32 %v471_v31, %v907_v45  ;;  %600 = vst [vmem:[%s935_s18 + $0x48] sm:$0xff] %v584_v26  ;;  %601 = vst [vmem:[%s935_s18 + $0x50] sm:$0xff] %v585_v27  ;;  %v525_v38 = vmax.f32 %v511_v28, 0.0  ;;  %v515_v40 = vadd.f32 %v514_v36, %v907_v45  ;;  %v474_v41 = vadd.f32 %v473_v37, %v907_v45  ;;  %v516_v42 = vpop.f32.mrb[7].mxu1 }
 0x109   : > { %v524_v39 = vmax.f32 %v470_v29, 0.0  ;;  %602 = vst [vmem:[%s935_s18 + $0x58] sm:$0xff] %v586_v32  ;;  %v551_v46 = vmul.f32 %v905_v44, %v523_v33  ;;  %v526_v48 = vmax.f32 %v513_v34, 0.0  ;;  %v517_v43 = vadd.f32 %v516_v42, %v907_v45 }
 0x10a   : > { %v531_v49 = vmax.f32 %v472_v35, 0.0  ;;  %v553_v50 = vmul.f32 %v905_v44, %v525_v38  ;;  %v533_v52 = vmax.f32 %v515_v40, 0.0  ;;  %v532_v53 = vmax.f32 %v474_v41, 0.0 }
 0x10b   : > { %v552_v51 = vmul.f32 %v905_v44, %v524_v39  ;;  %v579_v54 = vadd.f32 %v918_v1, %v551_v46  ;;  %v554_v55 = vmul.f32 %v905_v44, %v526_v48  ;;  %v534_v57 = vmax.f32 %v517_v43, 0.0  ;;  %613 = sbr.rel (!%p865_p5) target bundleno = 282 (0x11a), region = 67 }
 0x10c   : > { %v559_v56 = vmul.f32 %v909_v47, %v531_v49  ;;  %v581_v45 = vadd.f32 %v918_v1, %v553_v50  ;;  %v561_v59 = vmul.f32 %v909_v47, %v533_v52  ;;  %v560_v60 = vmul.f32 %v909_v47, %v532_v53 }
 0x10d   : > { %v580_v58 = vadd.f32 %v918_v1, %v552_v51  ;;  %595 = vst [vmem:[%s935_s18 + $0x20] sm:$0xff] %v579_v54  ;;  %v582_v61 = vadd.f32 %v918_v1, %v554_v55  ;;  %v562_v62 = vmul.f32 %v909_v47, %v534_v57  ;;  %v629_v47 = vld [vmem:[%s935_s18] sm:$0xff] (%p865_p5)  ;;  %v631_v1 = vld [vmem:[%s935_s18 + $0x8] sm:$0xff] (%p865_p5)  ;;  %v633_v3 = vld [vmem:[%s935_s18 + $0x10] sm:$0xff] (%p865_p5) }
 0x10e   : > { %v587_v44 = vadd.f32 %v924_v10, %v559_v56  ;;  %597 = vst [vmem:[%s935_s18 + $0x30] sm:$0xff] %v581_v45  ;;  %v589_v63 = vadd.f32 %v924_v10, %v561_v59  ;;  %v588_v0 = vadd.f32 %v924_v10, %v560_v60  ;;  %v635_v4 = vld [vmem:[%s935_s18 + $0x18] sm:$0xff] (%p865_p5)  ;;  %630 = vst [vmem:[%s616_s26] sm:$0xff] (%p865_p5), %v629_v47  ;;  %v645_v9 = vld [vmem:[%s935_s18 + $0x40] sm:$0xff] (%p865_p5) }
 0x10f   : > { %596 = vst [vmem:[%s935_s18 + $0x28] sm:$0xff] %v580_v58  ;;  %598 = vst [vmem:[%s935_s18 + $0x38] sm:$0xff] %v582_v61  ;;  %v590_v2 = vadd.f32 %v924_v10, %v562_v62  ;;  %v647_v10 = vld [vmem:[%s935_s18 + $0x48] sm:$0xff] (%p865_p5)  ;;  %v649_v11 = vld [vmem:[%s935_s18 + $0x50] sm:$0xff] (%p865_p5) }
 0x110   : > { %603 = vst [vmem:[%s935_s18 + $0x60] sm:$0xff] %v587_v44  ;;  %605 = vst [vmem:[%s935_s18 + $0x70] sm:$0xff] %v589_v63  ;;  %v651_v12 = vld [vmem:[%s935_s18 + $0x58] sm:$0xff] (%p865_p5) }
 0x111   : > { %604 = vst [vmem:[%s935_s18 + $0x68] sm:$0xff] %v588_v0  ;;  %606 = vst [vmem:[%s935_s18 + $0x78] sm:$0xff] %v590_v2 }
 0x112   : > { %632 = vst [vmem:[%s616_s26 + $0x8] sm:$0xff] %v631_v1  ;;  %634 = vst [vmem:[%s616_s26 + $0x10] sm:$0xff] %v633_v3 }
 0x113   : > { %636 = vst [vmem:[%s616_s26 + $0x18] sm:$0xff] %v635_v4  ;;  %646 = vst [vmem:[%s616_s26 + $0x80] sm:$0xff] %v645_v9 }
 0x114   : > { %v637_v5 = vld [vmem:[%s935_s18 + $0x20] sm:$0xff]  ;;  %648 = vst [vmem:[%s616_s26 + $0x88] sm:$0xff] %v647_v10  ;;  %650 = vst [vmem:[%s616_s26 + $0x90] sm:$0xff] %v649_v11 }
 0x115   : > { %638 = vst [vmem:[%s616_s26 + $0x20] sm:$0xff] %v637_v5  ;;  %v641_v7 = vld [vmem:[%s935_s18 + $0x30] sm:$0xff]  ;;  %652 = vst [vmem:[%s616_s26 + $0x98] sm:$0xff] %v651_v12 }
 0x116   : > { %v639_v6 = vld [vmem:[%s935_s18 + $0x28] sm:$0xff]  ;;  %v643_v8 = vld [vmem:[%s935_s18 + $0x38] sm:$0xff]  ;;  %642 = vst [vmem:[%s616_s26 + $0x30] sm:$0xff] %v641_v7 }
 0x117   : > { %640 = vst [vmem:[%s616_s26 + $0x28] sm:$0xff] %v639_v6  ;;  %644 = vst [vmem:[%s616_s26 + $0x38] sm:$0xff] %v643_v8  ;;  %v653_v13 = vld [vmem:[%s935_s18 + $0x60] sm:$0xff]  ;;  %v657_v15 = vld [vmem:[%s935_s18 + $0x70] sm:$0xff] }
 0x118   : > { %v655_v14 = vld [vmem:[%s935_s18 + $0x68] sm:$0xff]  ;;  %654 = vst [vmem:[%s616_s26 + $0xa0] sm:$0xff] %v653_v13  ;;  %658 = vst [vmem:[%s616_s26 + $0xb0] sm:$0xff] %v657_v15  ;;  %v659_v16 = vld [vmem:[%s935_s18 + $0x78] sm:$0xff] }
 0x119   : > { %656 = vst [vmem:[%s616_s26 + $0xa8] sm:$0xff] %v655_v14  ;;  %660 = vst [vmem:[%s616_s26 + $0xb8] sm:$0xff] %v659_v16 }
 0x11a PF: > { %p12_p10 = scmp.ge.s32.totalorder %s852_s22, 4   ;;  %s1018_s18 = smov %s797_s19 }
 0x11b   : > { %s1019_s19 = smov %s863_s25  ;;  %s1020_s20 = smov %s852_s22 }
 0x11c   :  { %14 = sbr.rel (!%p12_p10) target bundleno = 2 (0x2), region = 121 }

// kernel: forward.5
= control target key start
LH: loop header
LB: loop body
LE: loop exit
PB: predicated region body
PF: predicated region fallthrough
CT: control target
= control target key end

     0   :  { %s890_s18 = smov 0   ;;  %s892_s19 = smov 0   ;;  %s1042_s0 = inlined_call_operand.vmem [shape: bf16[32,144], index: 0, kind: input, shape index: {}]   ;;  %s1043_s1 = inlined_call_operand.vmem [shape: bf16[144,512], index: 1, kind: input, shape index: {}]   ;;  %s1044_s2 = inlined_call_operand.vmem [shape: f32[32,1], index: 2, kind: input, shape index: {}]   ;;  %s1045_s3 = inlined_call_operand.vmem [shape: f32[32,1], index: 3, kind: input, shape index: {}]   ;;  %s1046_s4 = inlined_call_operand.vmem [shape: f32[32,1], index: 4, kind: input, shape index: {}]   ;;  %s1047_s5 = inlined_call_operand.vmem [shape: f32[32,512], index: 5, kind: output, shape index: {}]  }
   0x1   :  { %s894_s20 = smov 0  }
   0x2 LB: > { %s716_s21 = sadd.s32 4294967295, %s857_s20   ;;  %s907_s22 = sadd.s32 1, %s857_s20   ;;  %s857_s20 = sphi %s894_s20, %s1051_s20   ;;  %s853_s19 = sphi %s892_s19, %s1050_s19   ;;  %s849_s18 = sphi %s890_s18, %s1049_s18  }
   0x3   : > { %s40_s23 = ssub.s32 %s857_s20, %s907_s22  ;;  %s43_s24 = sadd.s32 1, %s853_s19 }
   0x4   : > { %p41_p0 = scmp.eq.s32.totalorder %s40_s23, 0  ;;  %p50_p1 = scmp.ne.s32.totalorder %s853_s19, %s849_s18 }
   0x5   : > { %p51_p2 = scmp.eq.s32.totalorder %s857_s20, 0  ;;  %p143_p3 = scmp.eq.s32.totalorder %s716_s21, 1 }
   0x6   : > { %s918_s25 = scalar_select %p41_p0, %s853_s19, %s43_s24  }
   0x7   : > { %p52_p4 = por %p51_p2, %p50_p1  ;;  %p920_p5 = por %p143_p3, %p50_p1 }
   0x8   : > { %p719_p6 = scmp.ge.s32.totalorder %s857_s20, 2 }
   0xa   : > { %177 = sbr.rel (%p719_p6) target bundleno = 30 (0x1e), region = 32 }
  0x11   : > { %180 = sbr.rel (!%p52_p4) target bundleno = 30 (0x1e), region = 36  ;;  %s182_s27 = sand.u32 (%p52_p4), 1, %s853_s19  }
  0x12   : > { %s753_s28 = sshll.u32 (%p52_p4), %s857_s20, 3  ;;  %s773_s29 = smul.u32 (%p52_p4), 144, %s182_s27 }
  0x13   : > { %s930_s7 = scalar_lea.vmem (%p52_p4), %s1043_s1, %s753_s28 }
  0x14   : > { %v249_v0 = vld [vmem:[%s930_s7] sm:$0xff] (%p52_p4)  ;;  %v251_v1 = vld [vmem:[%s930_s7 + $0x10] sm:$0xff] (%p52_p4)  ;;  %s184_s8 = scalar_lea.vmem (%p52_p4), [#allocation2], %s773_s29 }
  0x15   : > { %v253_v2 = vld [vmem:[%s930_s7 + $0x20] sm:$0xff] (%p52_p4)  ;;  %v255_v3 = vld [vmem:[%s930_s7 + $0x30] sm:$0xff] (%p52_p4)  ;;  %250 = vst [vmem:[%s184_s8] sm:$0xff] (%p52_p4), %v249_v0  ;;  %252 = vst [vmem:[%s184_s8 + $0x8] sm:$0xff] (%p52_p4), %v251_v1 }
  0x16   : > { %v257_v4 = vld [vmem:[%s930_s7 + $0x40] sm:$0xff] (%p52_p4)  ;;  %v259_v5 = vld [vmem:[%s930_s7 + $0x50] sm:$0xff] (%p52_p4)  ;;  %254 = vst [vmem:[%s184_s8 + $0x10] sm:$0xff] (%p52_p4), %v253_v2  ;;  %256 = vst [vmem:[%s184_s8 + $0x18] sm:$0xff] (%p52_p4), %v255_v3 }
  0x17   : > { %258 = vst [vmem:[%s184_s8 + $0x20] sm:$0xff] (%p52_p4), %v257_v4  ;;  %260 = vst [vmem:[%s184_s8 + $0x28] sm:$0xff] (%p52_p4), %v259_v5  ;;  %v261_v6 = vld [vmem:[%s930_s7 + $0x60] sm:$0xff] (%p52_p4)  ;;  %v263_v7 = vld [vmem:[%s930_s7 + $0x70] sm:$0xff] (%p52_p4) }
  0x18   : > { %v265_v8 = vld [vmem:[%s930_s7 + $0x80] sm:$0xff]  ;;  %262 = vst [vmem:[%s184_s8 + $0x30] sm:$0xff] %v261_v6  ;;  %264 = vst [vmem:[%s184_s8 + $0x38] sm:$0xff] %v263_v7  ;;  %v267_v9 = vld [vmem:[%s930_s7 + $0x90] sm:$0xff] }
  0x19   : > { %266 = vst [vmem:[%s184_s8 + $0x40] sm:$0xff] %v265_v8  ;;  %v269_v10 = vld [vmem:[%s930_s7 + $0xa0] sm:$0xff]  ;;  %v271_v11 = vld [vmem:[%s930_s7 + $0xb0] sm:$0xff]  ;;  %268 = vst [vmem:[%s184_s8 + $0x48] sm:$0xff] %v267_v9 }
  0x1a   : > { %270 = vst [vmem:[%s184_s8 + $0x50] sm:$0xff] %v269_v10  ;;  %272 = vst [vmem:[%s184_s8 + $0x58] sm:$0xff] %v271_v11  ;;  %v273_v12 = vld [vmem:[%s930_s7 + $0xc0] sm:$0xff]  ;;  %v275_v13 = vld [vmem:[%s930_s7 + $0xd0] sm:$0xff] }
  0x1b   : > { %v277_v14 = vld [vmem:[%s930_s7 + $0xe0] sm:$0xff]  ;;  %274 = vst [vmem:[%s184_s8 + $0x60] sm:$0xff] %v273_v12  ;;  %276 = vst [vmem:[%s184_s8 + $0x68] sm:$0xff] %v275_v13  ;;  %v279_v15 = vld [vmem:[%s930_s7 + $0xf0] sm:$0xff] }
  0x1c   : > { %278 = vst [vmem:[%s184_s8 + $0x70] sm:$0xff] %v277_v14  ;;  %v281_v16 = vld [vmem:[%s930_s7 + $0x100] sm:$0xff]  ;;  %v283_v17 = vld [vmem:[%s930_s7 + $0x110] sm:$0xff]  ;;  %280 = vst [vmem:[%s184_s8 + $0x78] sm:$0xff] %v279_v15 }
  0x1d   : > { %282 = vst [vmem:[%s184_s8 + $0x80] sm:$0xff] %v281_v16  ;;  %284 = vst [vmem:[%s184_s8 + $0x88] sm:$0xff] %v283_v17 }
  0x1e PF: > { %p722_p7 = scmp.ge.s32.totalorder %s857_s20, 1  ;;  %p289_p8 = scmp.lt.s32.totalorder %s857_s20, 3 }
  0x20   : > { %p290_p9 = pnand %p722_p7, %p289_p8 }
  0x21   : > { %s296_s9 = sand.u32 (!%p290_p9), 1, %s849_s18   ;;  %vm479_vm0 = vcmask (!%p290_p9), 130048   ;;  %v831_v18 = vld [vmem:[%s1042_s0 + $0x4] ss:$8 sps:$4 sm:$0xff] (!%p290_p9)   ;;  %v834_v19 = vld [vmem:[%s1042_s0 + $0x14] ss:$8 sps:$4 sm:$0xff] (!%p290_p9)  }
  0x22   : > { %293 = sbr.rel (%p290_p9) target bundleno = 308 (0x134), region = 74  ;;  %v859_v20 = vmov (!%p290_p9), 0   ;;  %v349_v21 = vld [vmem:[%s1044_s2 + $0x10] sm:$0xff] (!%p290_p9)  ;;  %746 = vmatprep.mubr.msk.bf16.mxu0 (!%p290_p9), %vm479_vm0, %v831_v18  ;;  %v347_v22 = vld [vmem:[%s1044_s2] sm:$0xff] (!%p290_p9)  ;;  %747 = vmatprep.mubr.msk.bf16.mxu1 (!%p290_p9), %vm479_vm0, %v834_v19  ;;  %v350_v24 = vld [vmem:[%s1044_s2 + $0x18] sm:$0xff] (!%p290_p9) }
  0x23   : > { %s774_s10 = smul.u32 (!%p290_p9), 144, %s296_s9  ;;  %801 = vset.pattern.permute.xlu1 (!%p290_p9), %v859_v20  ;;  %800 = vset.pattern.permute.xlu0 (!%p290_p9), %v859_v20  ;;  %v348_v27 = vld [vmem:[%s1044_s2 + $0x8] sm:$0xff] (!%p290_p9)  ;;  %v547_v35 = vld [vmem:[%s1045_s3] sm:$0xff] (!%p290_p9)  ;;  %v550_v36 = vld [vmem:[%s1045_s3 + $0x18] sm:$0xff] (!%p290_p9) }
  0x24   : > { %363 = vperm.xlu1 (!%p290_p9), %801, %v349_v21   ;;  %353 = vperm.xlu0 (!%p290_p9), %800, %v347_v22   ;;  %v548_v34 = vld [vmem:[%s1045_s3 + $0x8] sm:$0xff] (!%p290_p9)  ;;  %v549_v37 = vld [vmem:[%s1045_s3 + $0x10] sm:$0xff] (!%p290_p9)  ;;  %v579_v41 = vld [vmem:[%s1046_s4] sm:$0xff] (!%p290_p9) }
  0x25   : > { %s967_s24 = scalar_lea.vmem (!%p290_p9), [#allocation2], %s774_s10  ;;  %v580_v40 = vld [vmem:[%s1046_s4 + $0x8] sm:$0xff] (!%p290_p9)  ;;  %v582_v44 = vld [vmem:[%s1046_s4 + $0x18] sm:$0xff] (!%p290_p9)  ;;  %v581_v45 = vld [vmem:[%s1046_s4 + $0x10] sm:$0xff] (!%p290_p9) }
  0x26   : > { %v802_v23 = vld [vmem:[%s967_s24 + $0x4] ss:$8 sps:$4 sm:$0xff] (!%p290_p9)   ;;  %v804_v25 = vld [vmem:[%s967_s24] ss:$8 sps:$4 sm:$0xff] (!%p290_p9)   ;;  %v805_v26 = vld [vmem:[%s967_s24 + $0x14] ss:$8 sps:$4 sm:$0xff] (!%p290_p9)  }
  0x27   : > { %486 = vmatprep.subr.bf16.mxu0 (!%p290_p9), %v802_v23  ;;  %755 = vmatprep.subr.bf16.mxu1 (!%p290_p9), %v802_v23  ;;  %v807_v28 = vld [vmem:[%s967_s24 + $0x10] ss:$8 sps:$4 sm:$0xff] (!%p290_p9)   ;;  %v808_v29 = vld [vmem:[%s967_s24 + $0x24] ss:$8 sps:$4 sm:$0xff] (!%p290_p9)   ;;  %v810_v30 = vld [vmem:[%s967_s24 + $0x20] ss:$8 sps:$4 sm:$0xff] (!%p290_p9)  }
  0x28   : > { %487 = vmatpush1.bf16.msra.mxu0 (!%p290_p9), %v804_v25  ;;  %764 = vmatpush1.bf16.msra.mxu1 (!%p290_p9), %v804_v25  ;;  %v811_v31 = vld [vmem:[%s967_s24 + $0x34] ss:$8 sps:$4 sm:$0xff] (!%p290_p9)   ;;  %v813_v32 = vld [vmem:[%s967_s24 + $0x30] ss:$8 sps:$4 sm:$0xff] (!%p290_p9)   ;;  %v814_v33 = vld [vmem:[%s967_s24 + $0x44] ss:$8 sps:$4 sm:$0xff] (!%p290_p9)  }
  0x29   : > { %488 = vmatprep.subr.bf16.mxu0 %v805_v26  ;;  %756 = vmatprep.subr.bf16.mxu1 %v805_v26  ;;  %v816_v38 = vld [vmem:[%s967_s24 + $0x40] ss:$8 sps:$4 sm:$0xff]   ;;  %v817_v39 = vld [vmem:[%s967_s24 + $0x54] ss:$8 sps:$4 sm:$0xff]   ;;  %v819_v42 = vld [vmem:[%s967_s24 + $0x50] ss:$8 sps:$4 sm:$0xff]  }
  0x2a   : > { %368 = vperm.xlu1 %801, %v350_v24   ;;  %358 = vperm.xlu0 %800, %v348_v27   ;;  %v820_v43 = vld [vmem:[%s967_s24 + $0x64] ss:$8 sps:$4 sm:$0xff]   ;;  %v822_v46 = vld [vmem:[%s967_s24 + $0x60] ss:$8 sps:$4 sm:$0xff]   ;;  %v823_v47 = vld [vmem:[%s967_s24 + $0x74] ss:$8 sps:$4 sm:$0xff]  }
  0x2b   : > { %v825_v48 = vld [vmem:[%s967_s24 + $0x70] ss:$8 sps:$4 sm:$0xff]   ;;  %v826_v49 = vld [vmem:[%s967_s24 + $0x84] ss:$8 sps:$4 sm:$0xff]   ;;  %v828_v50 = vld [vmem:[%s967_s24 + $0x80] ss:$8 sps:$4 sm:$0xff]  }
  0x2c   : > { %489 = vmatpush1.bf16.msra.mxu0 %v807_v28  ;;  %765 = vmatpush1.bf16.msra.mxu1 %v807_v28  ;;  %v829_v51 = vld [vmem:[%s1042_s0] ss:$8 sps:$4 sm:$0xff]   ;;  %v832_v52 = vld [vmem:[%s1042_s0 + $0x10] ss:$8 sps:$4 sm:$0xff]   ;;  %s723_s24 = sshll.u32 %s296_s9, 6  ;;  %s754_s9 = sshll.u32 (%p920_p5), %s716_s21, 4 }
  0x2d   : > { %490 = vmatprep.subr.bf16.mxu0 %v808_v29  ;;  %757 = vmatprep.subr.bf16.mxu1 %v808_v29  ;;  %s321_s18 = scalar_lea.vmem [#allocation3], %s723_s24  ;;  %s628_s13 = scalar_lea.vmem (%p920_p5), %s1047_s5, %s754_s9 }
  0x2e   : > { %558 = vperm.xlu1 %801, %v548_v34   ;;  %553 = vperm.xlu0 %800, %v547_v35  }
  0x30   : > { %491 = vmatpush1.bf16.msra.mxu0 %v810_v30  ;;  %766 = vmatpush1.bf16.msra.mxu1 %v810_v30 }
  0x31   : > { %492 = vmatprep.subr.bf16.mxu0 %v811_v31  ;;  %758 = vmatprep.subr.bf16.mxu1 %v811_v31 }
  0x32   : > { %568 = vperm.xlu1 %801, %v550_v36   ;;  %563 = vperm.xlu0 %800, %v549_v37  }
  0x34   : > { %493 = vmatpush1.bf16.msra.mxu0 %v813_v32  ;;  %767 = vmatpush1.bf16.msra.mxu1 %v813_v32 }
  0x35   : > { %494 = vmatprep.subr.bf16.mxu0 %v814_v33  ;;  %759 = vmatprep.subr.bf16.mxu1 %v814_v33 }
  0x36   : > { %590 = vperm.xlu1 %801, %v580_v40   ;;  %585 = vperm.xlu0 %800, %v579_v41  }
  0x38   : > { %495 = vmatpush1.bf16.msra.mxu0 %v816_v38  ;;  %768 = vmatpush1.bf16.msra.mxu1 %v816_v38 }
  0x39   : > { %496 = vmatprep.subr.bf16.mxu0 %v817_v39  ;;  %760 = vmatprep.subr.bf16.mxu1 %v817_v39 }
  0x3a   : > { %600 = vperm.xlu1 %801, %v582_v44   ;;  %595 = vperm.xlu0 %800, %v581_v45  }
  0x3c   : > { %497 = vmatpush1.bf16.msra.mxu0 %v819_v42  ;;  %769 = vmatpush1.bf16.msra.mxu1 %v819_v42 }
  0x3d   : > { %498 = vmatprep.subr.bf16.mxu0 %v820_v43  ;;  %761 = vmatprep.subr.bf16.mxu1 %v820_v43 }
  0x40   : > { %499 = vmatpush1.bf16.msra.mxu0 %v822_v46  ;;  %770 = vmatpush1.bf16.msra.mxu1 %v822_v46 }
  0x41   : > { %500 = vmatprep.subr.bf16.mxu0 %v823_v47  ;;  %762 = vmatprep.subr.bf16.mxu1 %v823_v47 }
  0x44   : > { %501 = vmatpush1.bf16.msra.mxu0 %v825_v48  ;;  %771 = vmatpush1.bf16.msra.mxu1 %v825_v48 }
  0x45   : > { %502 = vmatprep.subr.bf16.mxu0 %v826_v49  ;;  %763 = vmatprep.subr.bf16.mxu1 %v826_v49 }
  0x48   : > { %503 = vmatpush1.bf16.msra.mxu0 %v828_v50  ;;  %772 = vmatpush1.bf16.msra.mxu1 %v828_v50 }
  0x4b   : > { %519 = vmatmul.mubr.bf16.vlgmr.msra.gmra.mrb[0].mxu0 %v829_v51  ;;  %529 = vmatmul.mubr.bf16.vlgmr.msra.gmra.mrb[0].mxu1 %v832_v52 }
  0xa3   : > { %v364_v53 = vpop.permute.xlu1 %363  ;;  %v354_v54 = vpop.permute.xlu0 %353 }
  0xa9   : > { %v369_v55 = vpop.permute.xlu1 %368  ;;  %v359_v56 = vpop.permute.xlu0 %358 }
  0xad   : > { %v559_v57 = vpop.permute.xlu1 %558  ;;  %v554_v58 = vpop.permute.xlu0 %553 }
  0xb1   : > { %v569_v59 = vpop.permute.xlu1 %568  ;;  %v564_v60 = vpop.permute.xlu0 %563 }
  0xb5   : > { %v591_v61 = vpop.permute.xlu1 %590  ;;  %v586_v62 = vpop.permute.xlu0 %585 }
  0xb9   : > { %v596_v23 = vpop.permute.xlu0 %595  ;;  %v601_v32 = vpop.permute.xlu1 %600 }
 0x11e   : > { %v520_v63 = vpop.f32.mrb[0].mxu0  ;;  %v530_v0 = vpop.f32.mrb[0].mxu1 }
 0x11f   : > { %v521_v1 = vadd.f32 %v520_v63, %v354_v54  ;;  %v531_v2 = vadd.f32 %v530_v0, %v364_v53  ;;  %v522_v3 = vpop.f32.mrb[1].mxu0  ;;  %v532_v4 = vpop.f32.mrb[1].mxu1 }
 0x120   : > { %v523_v5 = vadd.f32 %v522_v3, %v354_v54  ;;  %v533_v6 = vadd.f32 %v532_v4, %v364_v53  ;;  %v524_v7 = vpop.f32.mrb[2].mxu0  ;;  %v534_v8 = vpop.f32.mrb[2].mxu1 }
 0x121   : > { %v539_v9 = vmax.f32 %v521_v1, 0.0  ;;  %v543_v10 = vmax.f32 %v531_v2, 0.0  ;;  %v525_v11 = vadd.f32 %v524_v7, %v359_v56  ;;  %v535_v12 = vadd.f32 %v534_v8, %v369_v55  ;;  %v526_v13 = vpop.f32.mrb[3].mxu0  ;;  %v536_v14 = vpop.f32.mrb[3].mxu1 }
 0x122   : > { %v540_v15 = vmax.f32 %v523_v5, 0.0  ;;  %v544_v16 = vmax.f32 %v533_v6, 0.0  ;;  %v527_v17 = vadd.f32 %v526_v13, %v359_v56  ;;  %v537_v18 = vadd.f32 %v536_v14, %v369_v55 }
 0x123   : > { %v571_v19 = vmul.f32 %v554_v58, %v539_v9  ;;  %v575_v20 = vmul.f32 %v564_v60, %v543_v10  ;;  %v541_v21 = vmax.f32 %v525_v11, 0.0  ;;  %v545_v22 = vmax.f32 %v535_v12, 0.0 }
 0x124   : > { %v572_v24 = vmul.f32 %v554_v58, %v540_v15  ;;  %v576_v25 = vmul.f32 %v564_v60, %v544_v16  ;;  %v542_v26 = vmax.f32 %v527_v17, 0.0  ;;  %v546_v27 = vmax.f32 %v537_v18, 0.0  ;;  %625 = sbr.rel (!%p920_p5) target bundleno = 308 (0x134), region = 82 }
 0x125   : > { %v603_v28 = vadd.f32 %v586_v62, %v571_v19  ;;  %v607_v29 = vadd.f32 %v596_v23, %v575_v20  ;;  %v573_v30 = vmul.f32 %v559_v57, %v541_v21  ;;  %v577_v31 = vmul.f32 %v569_v59, %v545_v22 }
 0x126   : > { %v604_v33 = vadd.f32 %v586_v62, %v572_v24  ;;  %v608_v34 = vadd.f32 %v596_v23, %v576_v25  ;;  %v574_v35 = vmul.f32 %v559_v57, %v542_v26  ;;  %v578_v36 = vmul.f32 %v569_v59, %v546_v27 }
 0x127   : > { %611 = vst [vmem:[%s321_s18] sm:$0xff] %v603_v28  ;;  %615 = vst [vmem:[%s321_s18 + $0x20] sm:$0xff] %v607_v29  ;;  %v605_v37 = vadd.f32 %v591_v61, %v573_v30  ;;  %v609_v38 = vadd.f32 %v601_v32, %v577_v31 }
 0x128   : > { %612 = vst [vmem:[%s321_s18 + $0x8] sm:$0xff] %v604_v33  ;;  %616 = vst [vmem:[%s321_s18 + $0x28] sm:$0xff] %v608_v34  ;;  %v606_v39 = vadd.f32 %v591_v61, %v574_v35  ;;  %v610_v40 = vadd.f32 %v601_v32, %v578_v36 }
 0x129   : > { %613 = vst [vmem:[%s321_s18 + $0x10] sm:$0xff] %v605_v37  ;;  %617 = vst [vmem:[%s321_s18 + $0x30] sm:$0xff] %v609_v38 }
 0x12a   : > { %614 = vst [vmem:[%s321_s18 + $0x18] sm:$0xff] %v606_v39  ;;  %618 = vst [vmem:[%s321_s18 + $0x38] sm:$0xff] %v610_v40 }
 0x12e   : > { %v641_v41 = vld [vmem:[%s321_s18] sm:$0xff] }
 0x12f   : > { %v643_v42 = vld [vmem:[%s321_s18 + $0x8] sm:$0xff]  ;;  %v649_v45 = vld [vmem:[%s321_s18 + $0x20] sm:$0xff]  ;;  %642 = vst [vmem:[%s628_s13] sm:$0xff] %v641_v41 }
 0x130   : > { %v645_v43 = vld [vmem:[%s321_s18 + $0x10] sm:$0xff]  ;;  %v651_v46 = vld [vmem:[%s321_s18 + $0x28] sm:$0xff]  ;;  %644 = vst [vmem:[%s628_s13 + $0x8] sm:$0xff] %v643_v42  ;;  %650 = vst [vmem:[%s628_s13 + $0x40] sm:$0xff] %v649_v45 }
 0x131   : > { %v647_v44 = vld [vmem:[%s321_s18 + $0x18] sm:$0xff]  ;;  %646 = vst [vmem:[%s628_s13 + $0x20] sm:$0xff] %v645_v43  ;;  %652 = vst [vmem:[%s628_s13 + $0x48] sm:$0xff] %v651_v46  ;;  %v653_v47 = vld [vmem:[%s321_s18 + $0x30] sm:$0xff] }
 0x132   : > { %648 = vst [vmem:[%s628_s13 + $0x28] sm:$0xff] %v647_v44  ;;  %v655_v48 = vld [vmem:[%s321_s18 + $0x38] sm:$0xff]  ;;  %654 = vst [vmem:[%s628_s13 + $0x60] sm:$0xff] %v653_v47 }
 0x133   : > { %656 = vst [vmem:[%s628_s13 + $0x68] sm:$0xff] %v655_v48 }
 0x134 PF: > { %p12_p10 = scmp.ge.s32.totalorder %s907_s22, 4   ;;  %s1049_s18 = smov %s853_s19 }
 0x135   : > { %s1050_s19 = smov %s918_s25  ;;  %s1051_s20 = smov %s907_s22 }
 0x136   :  { %14 = sbr.rel (!%p12_p10) target bundleno = 2 (0x2), region = 136 }

// kernel: forward.6
= control target key start
LH: loop header
LB: loop body
LE: loop exit
PB: predicated region body
PF: predicated region fallthrough
CT: control target
= control target key end

     0   :  { %v709_v1 = vmov 0   ;;  %vm289_vm0 = vcmask 261120   ;;  %s951_s1 = inlined_call_operand.vmem [shape: bf16[288,128], index: 1, kind: input, shape index: {}]   ;;  %s952_s0 = inlined_call_operand.vmem [shape: bf16[64,288], index: 0, kind: input, shape index: {}]   ;;  %s953_s2 = inlined_call_operand.vmem [shape: f32[64,1], index: 2, kind: input, shape index: {}]   ;;  %s954_s3 = inlined_call_operand.vmem [shape: f32[64,1], index: 3, kind: input, shape index: {}]   ;;  %s955_s4 = inlined_call_operand.vmem [shape: f32[64,1], index: 4, kind: input, shape index: {}]   ;;  %s956_s5 = inlined_call_operand.vmem [shape: f32[64,128], index: 5, kind: output, shape index: {}]  }
   0x1   :  { %v675_v0 = vld [vmem:[%s951_s1 + $0x40] sm:$0xff]   ;;  %674 = vset.pattern.permute.xlu1 %v709_v1  ;;  %673 = vset.pattern.permute.xlu0 %v709_v1  ;;  %v677_v3 = vld [vmem:[%s951_s1 + $0x48] sm:$0xff]   ;;  %v679_v5 = vld [vmem:[%s951_s1 + $0x50] sm:$0xff]  }
   0x2   :  { %v676_v2 = vld [vmem:[%s951_s1] sm:$0xff]   ;;  %598 = vmatprep.subr.bf16.mxu0 %v675_v0  ;;  %656 = vmatprep.subr.bf16.mxu1 %v675_v0  ;;  %v678_v4 = vld [vmem:[%s951_s1 + $0x8] sm:$0xff]   ;;  %v680_v6 = vld [vmem:[%s951_s1 + $0x10] sm:$0xff]  }
   0x3   :  { %599 = vmatpush3.bf16.msra.mxu0 %v676_v2  ;;  %664 = vmatpush3.bf16.msra.mxu1 %v676_v2  ;;  %v681_v7 = vld [vmem:[%s951_s1 + $0x58] sm:$0xff]   ;;  %v683_v9 = vld [vmem:[%s951_s1 + $0x60] sm:$0xff]   ;;  %v685_v11 = vld [vmem:[%s951_s1 + $0x68] sm:$0xff]  }
   0x4   :  { %600 = vmatprep.subr.bf16.mxu0 %v677_v3  ;;  %657 = vmatprep.subr.bf16.mxu1 %v677_v3  ;;  %v682_v8 = vld [vmem:[%s951_s1 + $0x18] sm:$0xff]   ;;  %v684_v10 = vld [vmem:[%s951_s1 + $0x20] sm:$0xff]   ;;  %v686_v14 = vld [vmem:[%s951_s1 + $0x28] sm:$0xff]  }
   0x5   :  { %v693_v12 = vld [vmem:[%s952_s0 + $0x4] ss:$12 sps:$4 sm:$0xff]   ;;  %v696_v13 = vld [vmem:[%s952_s0 + $0x4c] ss:$12 sps:$4 sm:$0xff]   ;;  %v694_v23 = vld [vmem:[%s952_s0 + $0x48] ss:$12 sps:$4 sm:$0xff]  }
   0x6   :  { %v687_v15 = vld [vmem:[%s951_s1 + $0x70] sm:$0xff]   ;;  %334 = vmatprep.mubr.bf16.mxu0 %v693_v12  ;;  %358 = vmatprep.mubr.bf16.mxu1 %v696_v13  ;;  %v689_v17 = vld [vmem:[%s951_s1 + $0x78] sm:$0xff]   ;;  %v73_v20 = vld [vmem:[%s953_s2] sm:$0xff] }
   0x7   :  { %601 = vmatpush3.bf16.msra.mxu0 %v678_v4  ;;  %665 = vmatpush3.bf16.msra.mxu1 %v678_v4  ;;  %v688_v16 = vld [vmem:[%s951_s1 + $0x30] sm:$0xff]   ;;  %v690_v18 = vld [vmem:[%s951_s1 + $0x38] sm:$0xff]   ;;  %v697_v21 = vld [vmem:[%s951_s1 + $0x80] sm:$0xff]  }
   0x8   :  { %602 = vmatprep.subr.bf16.mxu0 %v679_v5  ;;  %658 = vmatprep.subr.bf16.mxu1 %v679_v5  ;;  %v75_v19 = vld [vmem:[%s953_s2 + $0x10] sm:$0xff]  ;;  %v691_v22 = vld [vmem:[%s952_s0] ss:$12 sps:$4 sm:$0xff]   ;;  %v76_v24 = vld [vmem:[%s953_s2 + $0x18] sm:$0xff] }
   0x9   :  { %93 = vperm.xlu1 %674, %v75_v19   ;;  %83 = vperm.xlu0 %673, %v73_v20   ;;  %v74_v25 = vld [vmem:[%s953_s2 + $0x8] sm:$0xff]  ;;  %v77_v30 = vld [vmem:[%s953_s2 + $0x20] sm:$0xff]  ;;  %v80_v33 = vld [vmem:[%s953_s2 + $0x38] sm:$0xff] }
   0xa   :  { %v699_v26 = vld [vmem:[%s952_s0 + $0x1c] ss:$12 sps:$4 sm:$0xff]   ;;  %v702_v31 = vld [vmem:[%s952_s0 + $0x18] ss:$12 sps:$4 sm:$0xff]   ;;  %v703_v32 = vld [vmem:[%s952_s0 + $0x20] ss:$12 sps:$4 sm:$0xff]  }
   0xb   :  { %603 = vmatpush3.bf16.msra.mxu0 %v680_v6  ;;  %666 = vmatpush3.bf16.msra.mxu1 %v680_v6  ;;  %v698_v27 = vld [vmem:[%s951_s1 + $0x88] sm:$0xff]   ;;  %v79_v34 = vld [vmem:[%s953_s2 + $0x30] sm:$0xff]  ;;  %v706_v36 = vld [vmem:[%s952_s0 + $0x38] ss:$12 sps:$4 sm:$0xff]  }
   0xc   :  { %604 = vmatprep.subr.bf16.mxu0 %v681_v7  ;;  %659 = vmatprep.subr.bf16.mxu1 %v681_v7  ;;  %v701_v28 = vld [vmem:[%s952_s0 + $0x8] ss:$12 sps:$4 sm:$0xff]   ;;  %v440_v38 = vld [vmem:[%s954_s3] sm:$0xff]  ;;  %v707_v39 = vld [vmem:[%s952_s0 + $0x30] ss:$12 sps:$4 sm:$0xff]  }
   0xd   :  { %98 = vperm.xlu1 %674, %v76_v24   ;;  %88 = vperm.xlu0 %673, %v74_v25   ;;  %v78_v29 = vld [vmem:[%s953_s2 + $0x28] sm:$0xff]  ;;  %v704_v35 = vld [vmem:[%s952_s0 + $0x34] ss:$12 sps:$4 sm:$0xff]   ;;  %v708_v40 = vld [vmem:[%s952_s0 + $0x50] ss:$12 sps:$4 sm:$0xff]  }
   0xe   :  { %v441_v37 = vld [vmem:[%s954_s3 + $0x8] sm:$0xff]  ;;  %v443_v41 = vld [vmem:[%s954_s3 + $0x18] sm:$0xff]  ;;  %v442_v42 = vld [vmem:[%s954_s3 + $0x10] sm:$0xff] }
   0xf   :  { %605 = vmatpush3.bf16.msra.mxu0 %v682_v8  ;;  %667 = vmatpush3.bf16.msra.mxu1 %v682_v8  ;;  %v445_v43 = vld [vmem:[%s954_s3 + $0x28] sm:$0xff]  ;;  %v444_v44 = vld [vmem:[%s954_s3 + $0x20] sm:$0xff]  ;;  %v447_v45 = vld [vmem:[%s954_s3 + $0x38] sm:$0xff] }
  0x10   :  { %606 = vmatprep.subr.bf16.mxu0 %v683_v9  ;;  %660 = vmatprep.subr.bf16.mxu1 %v683_v9  ;;  %v446_v46 = vld [vmem:[%s954_s3 + $0x30] sm:$0xff]  ;;  %v497_v47 = vld [vmem:[%s955_s4 + $0x8] sm:$0xff]  ;;  %v496_v48 = vld [vmem:[%s955_s4] sm:$0xff] }
  0x11   :  { %108 = vperm.xlu1 %674, %v78_v29   ;;  %103 = vperm.xlu0 %673, %v77_v30   ;;  %v499_v49 = vld [vmem:[%s955_s4 + $0x18] sm:$0xff]  ;;  %v498_v50 = vld [vmem:[%s955_s4 + $0x10] sm:$0xff]  ;;  %v501_v51 = vld [vmem:[%s955_s4 + $0x28] sm:$0xff] }
  0x12   :  { %v500_v52 = vld [vmem:[%s955_s4 + $0x20] sm:$0xff]  ;;  %v503_v53 = vld [vmem:[%s955_s4 + $0x38] sm:$0xff]  ;;  %v502_v54 = vld [vmem:[%s955_s4 + $0x30] sm:$0xff] }
  0x13   :  { %607 = vmatpush3.bf16.msra.mxu0 %v684_v10  ;;  %668 = vmatpush3.bf16.msra.mxu1 %v684_v10 }
  0x14   :  { %608 = vmatprep.subr.bf16.mxu0 %v685_v11  ;;  %661 = vmatprep.subr.bf16.mxu1 %v685_v11 }
  0x15   :  { %118 = vperm.xlu1 %674, %v80_v33   ;;  %113 = vperm.xlu0 %673, %v79_v34  }
  0x17   :  { %609 = vmatpush3.bf16.msra.mxu0 %v686_v14  ;;  %669 = vmatpush3.bf16.msra.mxu1 %v686_v14 }
  0x18   :  { %610 = vmatprep.subr.bf16.mxu0 %v687_v15  ;;  %662 = vmatprep.subr.bf16.mxu1 %v687_v15 }
  0x19   :  { %455 = vperm.xlu1 %674, %v441_v37   ;;  %450 = vperm.xlu0 %673, %v440_v38  }
  0x1b   :  { %611 = vmatpush3.bf16.msra.mxu0 %v688_v16  ;;  %670 = vmatpush3.bf16.msra.mxu1 %v688_v16 }
  0x1c   :  { %612 = vmatprep.subr.bf16.mxu0 %v689_v17  ;;  %663 = vmatprep.subr.bf16.mxu1 %v689_v17 }
  0x1d   :  { %465 = vperm.xlu1 %674, %v443_v41   ;;  %460 = vperm.xlu0 %673, %v442_v42  }
  0x1f   :  { %613 = vmatpush3.bf16.msra.mxu0 %v690_v18  ;;  %671 = vmatpush3.bf16.msra.mxu1 %v690_v18 }
  0x20   :  { %644 = vmatprep.subr.bf16.mxu1 %v697_v21 }
  0x21   :  { %475 = vperm.xlu1 %674, %v445_v43   ;;  %470 = vperm.xlu0 %673, %v444_v44  }
  0x22   :  { %335 = vmatmul.mubr.bf16.vlgmr.msra.gmra.mrb[0].mxu0 %v691_v22  ;;  %359 = vmatmul.mubr.bf16.vlgmr.msra.gmra.mrb[0].mxu1 %v694_v23 }
  0x23   :  { %645 = vmatpush3.bf16.msra.mxu1 %v697_v21  ;;  %342 = vmatprep.mubr.bf16.mxu0 %v699_v26 }
  0x24   :  { %646 = vmatprep.subr.bf16.mxu1 %v698_v27  ;;  %648 = vmatprep.mubr.msk.bf16.mxu1 %vm289_vm0, %v701_v28 }
  0x25   :  { %485 = vperm.xlu1 %674, %v447_v45   ;;  %480 = vperm.xlu0 %673, %v446_v46  }
  0x27   :  { %647 = vmatpush3.bf16.msra.mxu1 %v698_v27 }
  0x29   :  { %511 = vperm.xlu1 %674, %v497_v47   ;;  %506 = vperm.xlu0 %673, %v496_v48  }
  0x2a   :  { %343 = vmatmul.mubr.bf16.gmra.mrb[4].mxu0 %v702_v31  ;;  %649 = vmatmul.mubr.msk.bf16.vlgmr.msra.gmra.mrb[4].mxu1 %vm289_vm0, %v703_v32 }
  0x2b   :  { %350 = vmatprep.mubr.bf16.mxu0 %v704_v35  ;;  %652 = vmatprep.mubr.msk.bf16.mxu1 %vm289_vm0, %v706_v36 }
  0x2d   :  { %521 = vperm.xlu1 %674, %v499_v49   ;;  %516 = vperm.xlu0 %673, %v498_v50  }
  0x31   :  { %531 = vperm.xlu1 %674, %v501_v51   ;;  %526 = vperm.xlu0 %673, %v500_v52  }
  0x32   :  { %351 = vmatmul.mubr.bf16.gmra.mrb[8].mxu0 %v707_v39  ;;  %653 = vmatmul.mubr.msk.bf16.gmra.mrb[8].mxu1 %vm289_vm0, %v708_v40 }
  0x35   :  { %541 = vperm.xlu1 %674, %v503_v53   ;;  %536 = vperm.xlu0 %673, %v502_v54  }
  0x88   :  { %v94_v55 = vpop.permute.xlu1 %93  ;;  %v84_v56 = vpop.permute.xlu0 %83 }
  0x8c   :  { %v99_v57 = vpop.permute.xlu1 %98  ;;  %v89_v58 = vpop.permute.xlu0 %88 }
  0x90   :  { %v906_v59 = vpop.permute.xlu1 %108  ;;  %v908_v60 = vpop.permute.xlu0 %103 }
  0x94   :  { %v119_v61 = vpop.permute.xlu1 %118  ;;  %v114_v62 = vpop.permute.xlu0 %113 }
  0x98   :  { %v456_v63 = vpop.permute.xlu1 %455  ;;  %v451_v0 = vpop.permute.xlu0 %450 }
  0x9c   :  { %v910_v1 = vpop.permute.xlu1 %465  ;;  %v461_v2 = vpop.permute.xlu0 %460 }
  0xa0   :  { %v912_v3 = vpop.permute.xlu1 %475  ;;  %v914_v4 = vpop.permute.xlu0 %470 }
  0xa4   :  { %v916_v5 = vpop.permute.xlu1 %485  ;;  %v918_v6 = vpop.permute.xlu0 %480 }
  0xa8   :  { %v512_v7 = vpop.permute.xlu1 %511  ;;  %v507_v8 = vpop.permute.xlu0 %506 }
  0xac   :  { %v522_v21 = vpop.permute.xlu1 %521  ;;  %v517_v22 = vpop.permute.xlu0 %516 }
  0xb0   :  { %v532_v43 = vpop.permute.xlu1 %531  ;;  %v527_v44 = vpop.permute.xlu0 %526 }
  0xf5   :  { %v614_v9 = vpop.f32.mrb[0].mxu0  ;;  %v632_v10 = vpop.f32.mrb[0].mxu1 }
  0xf6   :  { %v615_v11 = vpop.f32.mrb[1].mxu0  ;;  %v633_v12 = vpop.f32.mrb[1].mxu1 }
  0xf7   :  { %v616_v13 = vadd.f32 %v615_v11, %v614_v9  ;;  %v634_v14 = vadd.f32 %v633_v12, %v632_v10  ;;  %v617_v15 = vpop.f32.mrb[2].mxu0  ;;  %v635_v16 = vpop.f32.mrb[2].mxu1 }
  0xf8   :  { %v618_v17 = vpop.f32.mrb[3].mxu0  ;;  %v636_v18 = vpop.f32.mrb[3].mxu1 }
  0xf9   :  { %v619_v19 = vadd.f32 %v618_v17, %v617_v15  ;;  %v637_v20 = vadd.f32 %v636_v18, %v635_v16  ;;  %v337_v25 = vadd.f32 %v616_v13, %v84_v56  ;;  %v361_v45 = vadd.f32 %v634_v14, %v114_v62  ;;  %v537_v15 = vpop.permute.xlu0 %536 }
  0xfb   :  { %v340_v32 = vadd.f32 %v619_v19, %v89_v58 }
  0xfd   :  { %v620_v23 = vpop.f32.mrb[4].mxu0  ;;  %v650_v24 = vpop.f32.mrb[4].mxu1 }
  0xfe   :  { %v621_v26 = vpop.f32.mrb[5].mxu0  ;;  %v401_v27 = vpop.f32.mrb[5].mxu1 }
  0xff   :  { %v622_v28 = vadd.f32 %v621_v26, %v620_v23  ;;  %v402_v29 = vadd.f32 %v401_v27, %v337_v25  ;;  %v623_v30 = vpop.f32.mrb[6].mxu0  ;;  %v651_v31 = vpop.f32.mrb[6].mxu1 }
 0x100   :  { %v624_v33 = vpop.f32.mrb[7].mxu0  ;;  %v404_v34 = vpop.f32.mrb[7].mxu1 }
 0x101   :  { %v345_v35 = vadd.f32 %v622_v28, %v94_v55  ;;  %v432_v36 = vmax.f32 %v402_v29, 0.0  ;;  %v625_v37 = vadd.f32 %v624_v33, %v623_v30  ;;  %v405_v38 = vadd.f32 %v404_v34, %v340_v32 }
 0x102   :  { %v364_v55 = vadd.f32 %v637_v20, %v119_v61  ;;  %v542_v20 = vpop.permute.xlu1 %541 }
 0x103   :  { %v410_v39 = vadd.f32 %v650_v24, %v345_v35  ;;  %v488_v40 = vmul.f32 %v451_v0, %v432_v36  ;;  %v348_v41 = vadd.f32 %v625_v37, %v99_v57  ;;  %v433_v42 = vmax.f32 %v405_v38, 0.0 }
 0x105   :  { %v434_v46 = vmax.f32 %v410_v39, 0.0  ;;  %v544_v47 = vadd.f32 %v507_v8, %v488_v40  ;;  %v413_v48 = vadd.f32 %v651_v31, %v348_v41  ;;  %v489_v49 = vmul.f32 %v456_v63, %v433_v42  ;;  %v626_v50 = vpop.f32.mrb[8].mxu0  ;;  %v654_v51 = vpop.f32.mrb[8].mxu1 }
 0x106   :  { %v426_v52 = vadd.f32 %v654_v51, %v361_v45  ;;  %v627_v53 = vpop.f32.mrb[9].mxu0  ;;  %v417_v54 = vpop.f32.mrb[9].mxu1 }
 0x107   :  { %v490_v56 = vmul.f32 %v461_v2, %v434_v46  ;;  %552 = vst [vmem:[%s956_s5] sm:$0xff] %v544_v47  ;;  %v435_v57 = vmax.f32 %v413_v48, 0.0  ;;  %v545_v58 = vadd.f32 %v512_v7, %v489_v49  ;;  %v628_v0 = vadd.f32 %v627_v53, %v626_v50  ;;  %v629_v9 = vpop.f32.mrb[10].mxu0  ;;  %v655_v62 = vpop.f32.mrb[10].mxu1 }
 0x108   :  { %v438_v10 = vmax.f32 %v426_v52, 0.0  ;;  %v429_v8 = vadd.f32 %v655_v62, %v364_v55  ;;  %v630_v11 = vpop.f32.mrb[11].mxu0  ;;  %v420_v63 = vpop.f32.mrb[11].mxu1 }
 0x109   :  { %v546_v12 = vadd.f32 %v517_v22, %v490_v56  ;;  %v491_v13 = vmul.f32 %v910_v1, %v435_v57  ;;  %553 = vst [vmem:[%s956_s5 + $0x8] sm:$0xff] %v545_v58  ;;  %v353_v61 = vadd.f32 %v628_v0, %v908_v60  ;;  %v631_v2 = vadd.f32 %v630_v11, %v629_v9 }
 0x10a   :  { %v494_v14 = vmul.f32 %v918_v6, %v438_v10  ;;  %v439_v7 = vmax.f32 %v429_v8, 0.0 }
 0x10b   :  { %554 = vst [vmem:[%s956_s5 + $0x10] sm:$0xff] %v546_v12  ;;  %v547_v16 = vadd.f32 %v522_v21, %v491_v13  ;;  %v418_v17 = vadd.f32 %v417_v54, %v353_v61  ;;  %v356_v18 = vadd.f32 %v631_v2, %v906_v59 }
 0x10c   :  { %v550_v1 = vadd.f32 %v537_v15, %v494_v14  ;;  %v495_v19 = vmul.f32 %v916_v5, %v439_v7 }
 0x10d   :  { %555 = vst [vmem:[%s956_s5 + $0x18] sm:$0xff] %v547_v16  ;;  %v436_v60 = vmax.f32 %v418_v17, 0.0  ;;  %v421_v6 = vadd.f32 %v420_v63, %v356_v18 }
 0x10e   :  { %558 = vst [vmem:[%s956_s5 + $0x30] sm:$0xff] %v550_v1  ;;  %v551_v22 = vadd.f32 %v542_v20, %v495_v19 }
 0x10f   :  { %v492_v21 = vmul.f32 %v914_v4, %v436_v60  ;;  %v437_v23 = vmax.f32 %v421_v6, 0.0 }
 0x110   :  { %559 = vst [vmem:[%s956_s5 + $0x38] sm:$0xff] %v551_v22 }
 0x111   :  { %v548_v59 = vadd.f32 %v527_v44, %v492_v21  ;;  %v493_v5 = vmul.f32 %v912_v3, %v437_v23 }
 0x113   :  { %556 = vst [vmem:[%s956_s5 + $0x20] sm:$0xff] %v548_v59  ;;  %v549_v24 = vadd.f32 %v532_v43, %v493_v5 }
 0x115   :  { %557 = vst [vmem:[%s956_s5 + $0x28] sm:$0xff] %v549_v24 }

// kernel: forward.7
= control target key start
LH: loop header
LB: loop body
LE: loop exit
PB: predicated region body
PF: predicated region fallthrough
CT: control target
= control target key end

     0   :  { %s3543_s0 = inlined_call_operand.vmem [shape: f32[2,4,64], index: 0, kind: input, shape index: {}]   ;;  %s3544_s1 = inlined_call_operand.vmem [shape: f32[4,64], index: 1, kind: input, shape index: {}]   ;;  %s3545_s2 = inlined_call_operand.vmem [shape: bf16[64,192], index: 2, kind: input, shape index: {}]   ;;  %s3546_s3 = inlined_call_operand.vmem [shape: f32[1,192], index: 3, kind: input, shape index: {}]   ;;  %s3547_s4 = inlined_call_operand.vmem [shape: bf16[64,64], index: 4, kind: input, shape index: {}]   ;;  %s3548_s5 = inlined_call_operand.vmem [shape: f32[1,64], index: 5, kind: input, shape index: {}]   ;;  %s3549_s6 = inlined_call_operand.vmem [shape: f32[1,64], index: 6, kind: input, shape index: {}]   ;;  %s3550_s7 = inlined_call_operand.vmem [shape: f32[1,64], index: 7, kind: input, shape index: {}]   ;;  %s3551_s8 = inlined_call_operand.vmem [shape: bf16[64,128], index: 8, kind: input, shape index: {}]   ;;  %s3552_s9 = inlined_call_operand.vmem [shape: f32[1,128], index: 9, kind: input, shape index: {}]   ;;  %s3553_s10 = inlined_call_operand.vmem [shape: bf16[128,64], index: 10, kind: input, shape index: {}]   ;;  %s3554_s11 = inlined_call_operand.vmem [shape: f32[1,64], index: 11, kind: input, shape index: {}]   ;;  %s3555_s12 = inlined_call_operand.vmem [shape: f32[1,64], index: 12, kind: input, shape index: {}]   ;;  %s3556_s13 = inlined_call_operand.vmem [shape: f32[1,64], index: 13, kind: input, shape index: {}]   ;;  %s3557_s14 = inlined_call_operand.vmem [shape: bf16[64,192], index: 14, kind: input, shape index: {}]   ;;  %s3558_s15 = inlined_call_operand.vmem [shape: f32[1,192], index: 15, kind: input, shape index: {}]   ;;  %s3559_s16 = inlined_call_operand.vmem [shape: bf16[64,64], index: 16, kind: input, shape index: {}]   ;;  %s3560_s17 = inlined_call_operand.vmem [shape: f32[1,64], index: 17, kind: input, shape index: {}]   ;;  %s3561_s18 = inlined_call_operand.vmem [shape: f32[1,64], index: 18, kind: input, shape index: {}]   ;;  %s3562_s19 = inlined_call_operand.vmem [shape: f32[1,64], index: 19, kind: input, shape index: {}]   ;;  %s3563_s20 = inlined_call_operand.vmem [shape: bf16[64,128], index: 20, kind: input, shape index: {}]   ;;  %s3564_s21 = inlined_call_operand.vmem [shape: f32[1,128], index: 21, kind: input, shape index: {}]   ;;  %s3565_s22 = inlined_call_operand.vmem [shape: bf16[128,64], index: 22, kind: input, shape index: {}]   ;;  %s3566_s23 = inlined_call_operand.vmem [shape: f32[1,64], index: 23, kind: input, shape index: {}]   ;;  %s3567_s24 = inlined_call_operand.vmem [shape: f32[1,64], index: 24, kind: input, shape index: {}]   ;;  %s3568_s25 = inlined_call_operand.vmem [shape: f32[1,64], index: 25, kind: input, shape index: {}]   ;;  %s3569_s26 = inlined_call_operand.vmem [shape: bf16[64,128], index: 26, kind: input, shape index: {}]   ;;  %s3570_s27 = inlined_call_operand.vmem [shape: f32[1,128], index: 27, kind: input, shape index: {}]   ;;  %s3571_s28 = inlined_call_operand.hbm [shape: f32[2,1,128], index: 28, kind: output, shape index: {}]  }
   0x1   :  { %3589 = sst [smem:[#allocation13_spill]] %s3543_s0 }
   0x2   :  { %3590 = sst [smem:[#allocation14_spill]] %s3544_s1 }
   0x3   :  { %3591 = sst [smem:[#allocation15_spill]] %s3545_s2 }
   0x4   :  { %3592 = sst [smem:[#allocation16_spill]] %s3546_s3 }
   0x5   :  { %3593 = sst [smem:[#allocation17_spill]] %s3547_s4 }
   0x6   :  { %3594 = sst [smem:[#allocation18_spill]] %s3548_s5 }
   0x7   :  { %3595 = sst [smem:[#allocation19_spill]] %s3549_s6 }
   0x8   :  { %3596 = sst [smem:[#allocation20_spill]] %s3550_s7 }
   0x9   :  { %3597 = sst [smem:[#allocation21_spill]] %s3551_s8 }
   0xa   :  { %3598 = sst [smem:[#allocation22_spill]] %s3552_s9 }
   0xb   :  { %3599 = sst [smem:[#allocation23_spill]] %s3553_s10 }
   0xc   :  { %3600 = sst [smem:[#allocation24_spill]] %s3554_s11 }
   0xd   :  { %3601 = sst [smem:[#allocation25_spill]] %s3555_s12 }
   0xe   :  { %3602 = sst [smem:[#allocation26_spill]] %s3570_s27 }
   0xf   :  { %3603 = sst [smem:[#allocation27_spill]] %s3571_s28 }
  0x10   :  { %33 = vsyncpa [#allocation3], 0 }
  0x11   :  { %35 = vsyncpa [#allocation3 + $0x1], 0  ;;  %s3081_s8 = smov 0   ;;  %s3083_s5 = smov 0  }
  0x12   :  { %s3085_s9 = smov 0   ;;  %s3087_s30 = smov 0  }
  0x13 LB: > { %3604 = sst [smem:[#allocation5_spill]] %s2915_s8  ;;  %s3102_s3 = sadd.s32 4294967295, %s2927_s30   ;;  %s2927_s30 = sphi %s3087_s30, %s3635_s30   ;;  %s2923_s9 = sphi %s3085_s9, %s3637_s9   ;;  %s2919_s5 = sphi %s3083_s5, %s3639_s5   ;;  %s2915_s8 = sphi %s3081_s8, %s3638_s8  }
  0x14   : > { %3605 = sst [smem:[#allocation6_spill]] %s2923_s9  ;;  %s2428_s6 = sadd.s32 4294967294, %s2927_s30  }
  0x15   : > { %3606 = sst [smem:[#allocation7_spill]] %s2927_s30  ;;  %s3106_s10 = sadd.s32 1, %s2927_s30  }
  0x16   : > { %3607 = sst [smem:[#allocation8_spill]] %s3102_s3  ;;  %s641_s0 = sadd.s32 1, %s2923_s9 }
  0x17   : > { %3608 = sst [smem:[#allocation9_spill]] %s3106_s10  ;;  %s638_s11 = ssub.s32 %s2927_s30, %s3106_s10 }
  0x18   : > { %p651_p0 = scmp.ne.s32.totalorder %s2923_s9, %s2919_s5  ;;  %p639_p1 = scmp.eq.s32.totalorder %s638_s11, 0 }
  0x19   : > { %p652_p2 = scmp.eq.s32.totalorder %s3102_s3, 1  ;;  %p657_p3 = scmp.ne.s32.totalorder %s2919_s5, %s2915_s8 }
  0x1a   : > { %p658_p4 = scmp.eq.s32.totalorder %s2428_s6, 1  ;;  %p2431_p7 = scmp.ge.s32.totalorder %s2927_s30, 1 }
  0x1b   : > { %s3117_s29 = scalar_select %p639_p1, %s2923_s9, %s641_s0  }
  0x1c   : > { %p3119_p5 = por %p652_p2, %p651_p0  ;;  %p3123_p6 = por %p658_p4, %p657_p3 }
  0x1d   : > { %3609 = sst [smem:[#allocation10_spill]] %s3117_s29  ;;  %p764_p8 = scmp.lt.s32.totalorder %s2927_s30, 3 }
  0x1e   : > { %s3610_s2 = scalar_select %p3119_p5, 1, 0 }
  0x1f   : > { %s3612_s7 = scalar_select %p3123_p6, 1, 0 }
  0x20   : > { %3611 = sst [smem:[#allocation11_spill]] %s3610_s2  ;;  %p765_p9 = pnand %p2431_p7, %p764_p8 }
  0x21   : > { %3613 = sst [smem:[#allocation12_spill]] %s3612_s7  ;;  %s3614_s4 = sld [smem:[#allocation15_spill]] (!%p765_p9)  ;;  %v2929_v2 = vmov (!%p765_p9), 0   ;;  %vm944_vm0 = vcmask (!%p765_p9), 523264   ;;  %v894_v13 = vlaneseq (!%p765_p9)  ;;  %v2930_v15 = vmov (!%p765_p9), 0.0  }
  0x22   : > { %768 = sbr.rel (%p765_p9) target bundleno = 5045 (0x13b5), region = 132  ;;  %p836_p10 = scmp.lt.s32.totalorder (!%p765_p9), %s3102_s3, 1  ;;  %980 = vmatprep.mubr.bf16.mxu0 (!%p765_p9), %v2929_v2  ;;  %2580 = vmatprep.subr.bf16.mxu1 (!%p765_p9), %v2930_v15  ;;  %vm2931_vm1 = vmmov (!%p765_p9), 0   ;;  %vm994_vm2 = vcmask (!%p765_p9), 261120   ;;  %vm1059_vm3 = vcmask (!%p765_p9), 1041408   ;;  %vm1042_vm4 = vcmask (!%p765_p9), 27648  }
  0x23   : > { %s3615_s29 = sld [smem:[#allocation13_spill]] (!%p765_p9)  ;;  %v3167_v14 = vshrl.u32 (!%p765_p9), %v894_v13, 7  ;;  %s3617_s8 = sld [smem:[#allocation16_spill]] (!%p765_p9)  ;;  %2582 = vmatprep.mubr.msk.bf16.mxu1 (!%p765_p9), %vm2931_vm1, %v2930_v15  ;;  %vm1055_vm5 = vcmask (!%p765_p9), 31744   ;;  %vm1335_vm6 = vcmask (!%p765_p9), 519168  }
  0x24   : > { %s3586_s30 = smov (!%p765_p9), 96   ;;  %s2934_s2 = smov (!%p765_p9), 32  }
  0x25   : > { %v896_v16 = vsub.s32 (!%p765_p9), 0, %v3167_v14  ;;  %v900_v25 = vsub.s32 (!%p765_p9), 1, %v3167_v14  ;;  %s3618_s0 = sld [smem:[#allocation17_spill]] (!%p765_p9)  ;;  %s3621_s1 = sld [smem:[#allocation23_spill]] (!%p765_p9) }
  0x26   : > { %s3622_s12 = sld [smem:[#allocation19_spill]] (!%p765_p9)  ;;  %s3623_s27 = sld [smem:[#allocation20_spill]] (!%p765_p9) }
  0x27   : > { %v2781_v0 = vld [vmem:[%s3614_s4 + $0x4] ss:$8 sps:$4 sm:$0xff] (!%p765_p9)   ;;  %v2783_v1 = vld [vmem:[%s3614_s4] ss:$8 sps:$4 sm:$0xff] (!%p765_p9)   ;;  %v2784_v3 = vld [vmem:[%s3614_s4 + $0x14] ss:$8 sps:$4 sm:$0xff] (!%p765_p9)  }
  0x28   : > { %948 = vmatprep.subr.bf16.mxu0 (!%p765_p9), %v2781_v0  ;;  %v2786_v4 = vld [vmem:[%s3614_s4 + $0x10] ss:$8 sps:$4 sm:$0xff] (!%p765_p9)   ;;  %v2787_v5 = vld [vmem:[%s3614_s4 + $0x24] ss:$8 sps:$4 sm:$0xff] (!%p765_p9)   ;;  %v2789_v6 = vld [vmem:[%s3614_s4 + $0x20] ss:$8 sps:$4 sm:$0xff] (!%p765_p9)  }
  0x29   : > { %s837_s9 = scalar_select %p836_p10, %s3102_s3, 1  ;;  %949 = vmatpush1.bf16.msra.mxu0 %v2783_v1  ;;  %v2790_v8 = vld [vmem:[%s3614_s4 + $0x34] ss:$8 sps:$4 sm:$0xff]   ;;  %v2792_v10 = vld [vmem:[%s3614_s4 + $0x30] ss:$8 sps:$4 sm:$0xff]  }
  0x2a   : > { %950 = vmatprep.subr.bf16.mxu0 %v2784_v3  ;;  %s3616_s3 = sld [smem:[#allocation14_spill]]  ;;  %v852_v17 = vld [vmem:[%s3617_s8] sm:$0x3]  ;;  %s3619_s8 = sld [smem:[#allocation18_spill]] }
  0x2b   : > { %s2432_s6 = sshll.u32 %s837_s9, 2  ;;  %v897_v18 = vrot.slane %v852_v17, %v896_v16  ;;  %v901_v26 = vrot.slane %v852_v17, %v900_v25  ;;  %v2793_v3 = vld [vmem:[%s3618_s0] sm:$0xff]   ;;  %s3624_s9 = sld [smem:[#allocation22_spill]] }
  0x2c   : > { %s839_s11 = scalar_lea.vmem %s3615_s29, %s2432_s6  ;;  %s3620_s29 = sld [smem:[#allocation21_spill]] }
  0x2d   : > { %v841_v9 = vld [vmem:[%s839_s11] sm:$0xf]  ;;  %951 = vmatpush1.bf16.msra.mxu0 %v2786_v4  ;;  %s3625_s28 = sld [smem:[#allocation24_spill]]  ;;  %s3627_s10 = smov 96  }
  0x2e   : > { %952 = vmatprep.subr.bf16.mxu0 %v2787_v5  ;;  %v2794_v5 = vld [vmem:[%s3618_s0 + $0x8] sm:$0xff]   ;;  %s3629_s11 = sld [smem:[#allocation26_spill]]  ;;  %s3631_s7 = sld [smem:[#allocation27_spill]] }
  0x2f   : > { %s2935_s6 = smov [#allocation2]  }
  0x30   : > { %v842_v7 = vld [vmem:[%s3616_s3] sm:$0xf]  ;;  %s2933_s3 = smov 64  }
  0x31   : > { %v3162_v11 = vadd.f32 %v842_v7, %v841_v9  ;;  %953 = vmatpush1.bf16.msra.mxu0 %v2789_v6  ;;  %v2795_v6 = vld [vmem:[%s3618_s0 + $0x10] sm:$0xff]   ;;  %v2796_v7 = vld [vmem:[%s3618_s0 + $0x18] sm:$0xff]  }
  0x32   : > { %954 = vmatprep.subr.bf16.mxu0 %v2790_v8 }
  0x33   : > { %v892_v12 = vpack.c.bf16 %v3162_v11, %v3162_v11 }
  0x35   : > { %955 = vmatpush1.bf16.msra.mxu0 %v2792_v10 }
  0x36   : > { %2592 = vmatprep.subr.bf16.mxu0 %v2930_v15 }
  0x38   : > { %2441 = vmatmul.mubr.msk.bf16.vlgmr.msra.gmra.mrb[0].mxu0 %vm944_vm0, %v892_v12 }
  0x39   : > { %2594 = vmatprep.mubr.msk.bf16.mxu0 %vm2931_vm1, %v2930_v15 }
 0x10b   : > { %v982_v19 = vpop.f32.mrb[0].mxu0 }
 0x10c   : > { %v983_v20 = vadd.f32 %v982_v19, %v897_v18  ;;  %v984_v21 = vpop.f32.mrb[1].mxu0 }
 0x10d   : > { %v986_v22 = vpop.f32.mrb[2].mxu0  ;;  %v985_v28 = vadd.f32 %v984_v21, %v901_v26 }
 0x10e   : > { %v989_v23 = vpack.c.bf16 %v983_v20, %v983_v20  ;;  %v987_v24 = vpop.f32.mrb[3].mxu0 }
 0x10f   : > { %v990_v31 = vpack.c.bf16 %v985_v28, %v985_v28 }
 0x110   : > { %1104 = vrot.lane.b32.xlu1 %v989_v23, %s3586_s30  ;;  %992 = vrot.lane.b32.xlu0 %v989_v23, %s2933_s3 }
 0x111   : > { %v1061_v33 = vsel %vm1059_vm3, %v990_v31, 0 }
 0x114   : > { %1106 = vrot.lane.b32.xlu0 %v989_v23, %s2934_s2 }
 0x182   : > { %v993_v27 = vpop.permute.xlu0 %992  ;;  %v1105_v34 = vpop.permute.xlu1 %1104 }
 0x183   : > { %v999_v29 = vsel %vm994_vm2, %v993_v27, 0  ;;  %v2452_v27 = vld [vmem:[%s3619_s8] ss:$0 sm:$0xff] }
 0x184   : > { %2581 = vmatpush3.bf16.xpose.msra.mxu1 %v999_v29 }
 0x185   : > { %2586 = vmatprep.subr.bf16.mxu1 %v2930_v15 }
 0x186   : > { %v1107_v30 = vpop.permute.xlu0 %1106 }
 0x187   : > { %v1112_v32 = vsel %vm994_vm2, %v1107_v30, 0 }
 0x188   : > { %2593 = vmatpush3.bf16.xpose.msra.mxu0 %v1112_v32 }
 0x189   : > { %2604 = vmatprep.subr.bf16.mxu0 %v2930_v15 }
 0x18b   : > { %2583 = vmatmul.mubr.msk.bf16.vlgmr.msra.gmra.mrb[0].mxu1 %vm994_vm2, %v989_v23 }
 0x18c   : > { %2587 = vmatpush3.bf16.msra.mxu1 %v1061_v33  ;;  %2588 = vmatprep.mubr.msk.bf16.mxu1 %vm2931_vm1, %v2930_v15 }
 0x18d   : > { %2598 = vmatprep.subr.bf16.mxu1 %v2930_v15 }
 0x18f   : > { %2595 = vmatmul.mubr.msk.bf16.vlgmr.msra.gmra.mrb[4].mxu0 %vm994_vm2, %v1105_v34 }
 0x190   : > { %2608 = vmatprep.mubr.msk.bf16.mxu0 %vm2931_vm1, %v2930_v15  ;;  %2605 = vmatpush3.bf16.msra.mxu0 %v2795_v6  ;;  %v2461_v6 = vld [vmem:[%s3625_s28] ss:$0 sm:$0xff]  ;;  %s834_s28 = sand.u32 1, %s2919_s5  }
 0x191   : > { %2606 = vmatprep.subr.bf16.mxu0 %v2930_v15  ;;  %s2361_s8 = scalar_lea.sflag [#allocation3], %s834_s28 }
 0x194   : > { %2607 = vmatpush3.bf16.msra.mxu0 %v2796_v7 }
 0x195   : > { %2620 = vmatprep.subr.bf16.mxu0 %v2930_v15 }
 0x25e   : > { %v1035_v35 = vpop.f32.mrb[0].mxu1 }
 0x25f   : > { %v1041_v36 = vmul.f32 0.17677669, %v1035_v35  ;;  %v2584_v37 = vpop.f32.mrb[1].mxu1 }
 0x260   : > { %v1038_v38 = vpop.f32.mrb[2].mxu1 }
 0x261   : > { %v2585_v39 = vpop.f32.mrb[3].mxu1  ;;  %v1043_v40 = vsel %vm1042_vm4, %v1041_v36, -inf }
 0x262   : > { %1044 = vmax.xlane.f32.xlu1 %v1043_v40  ;;  %v1148_v41 = vpop.f32.mrb[4].mxu0 }
 0x263   : > { %v1154_v42 = vmul.f32 0.17677669, %v1148_v41  ;;  %v2596_v43 = vpop.f32.mrb[5].mxu0  ;;  %v2797_v41 = vld [vmem:[%s3620_s29] sm:$0xff]  }
 0x264   : > { %v1151_v44 = vpop.f32.mrb[6].mxu0  ;;  %v2800_v43 = vld [vmem:[%s3620_s29 + $0x18] sm:$0xff]  }
 0x265   : > { %v2597_v45 = vpop.f32.mrb[7].mxu0  ;;  %v1155_v46 = vsel %vm1042_vm4, %v1154_v42, -inf  ;;  %v2801_v44 = vld [vmem:[%s3621_s1] sm:$0xff]  }
 0x266   : > { %1156 = vmax.xlane.f32.xlu0 %v1155_v46  ;;  %v2802_v45 = vld [vmem:[%s3621_s1 + $0x8] sm:$0xff]   ;;  %v2803_v46 = vld [vmem:[%s3621_s1 + $0x10] sm:$0xff]  }
 0x2ef   : > { %v1045_v47 = vpop.xlane.xlu1 %1044 }
 0x2f0   : > { %v1046_v48 = vsub.f32 %v1041_v36, %v1045_v47  ;;  %v2804_v47 = vld [vmem:[%s3621_s1 + $0x18] sm:$0xff]  }
 0x2f2   : > { %v1047_v49 = vmul.f32 1.442695, %v1046_v48  ;;  %v2805_v48 = vld [vmem:[%s3621_s1 + $0x20] sm:$0xff]  }
 0x2f3   : > { %v1157_v50 = vpop.xlane.xlu0 %1156 }
 0x2f4   : > { %2841 = vpow2.f32 %v1047_v49  ;;  %v1158_v51 = vsub.f32 %v1154_v42, %v1157_v50  ;;  %v2799_v42 = vld [vmem:[%s3620_s29 + $0x10] sm:$0xff]   ;;  %v2806_v49 = vld [vmem:[%s3621_s1 + $0x28] sm:$0xff]  }
 0x2f6   : > { %v1159_v52 = vmul.f32 1.442695, %v1158_v51 }
 0x2f8   : > { %2843 = vpow2.f32 %v1159_v52 }
 0x2fe   : > { %v2842_v53 = vpop.eup %2841 }
 0x2ff   : > { %v1049_v54 = vsel %vm1042_vm4, %v2842_v53, 0.0 }
 0x300   : > { %1050 = vadd.xlane.f32.xlu0 %v1049_v54  ;;  %v2453_v54 = vld [vmem:[%s3622_s12] ss:$0 sm:$0xff] }
 0x302   : > { %v2844_v55 = vpop.eup %2843 }
 0x303   : > { %v1161_v56 = vsel %vm1042_vm4, %v2844_v55, 0.0 }
 0x304   : > { %1162 = vadd.xlane.f32.xlu1 %v1161_v56  ;;  %v2454_v56 = vld [vmem:[%s3623_s27] ss:$0 sm:$0xff]  ;;  %s3626_s27 = sld [smem:[#allocation25_spill]] }
 0x316   : > { %1168 = vrot.lane.b32.xlu0 %v990_v31, %s3586_s30 }
 0x38d   : > { %v1051_v57 = vpop.xlane.xlu0 %1050 }
 0x38e   : > { %2845 = vrcp.f32 %v1051_v57 }
 0x391   : > { %v1163_v58 = vpop.xlane.xlu1 %1162  ;;  %v1169_v61 = vpop.permute.xlu0 %1168 }
 0x392   : > { %2847 = vrcp.f32 %v1163_v58  ;;  %v1174_v0 = vsel %vm1059_vm3, %v1169_v61, 0  ;;  %v2808_v61 = vld [vmem:[%s3621_s1 + $0x38] sm:$0xff]  }
 0x398   : > { %v2846_v59 = vpop.eup %2845 }
 0x399   : > { %v1053_v60 = vmul.f32 %v2846_v59, %v2842_v53 }
 0x39b   : > { %v1054_v62 = vpack.c.bf16 %v1053_v60, %v1053_v60  ;;  %v2807_v60 = vld [vmem:[%s3621_s1 + $0x30] sm:$0xff]  }
 0x39c   : > { %v2848_v63 = vpop.eup %2847 }
 0x39d   : > { %2589 = vmatmul.mubr.msk.bf16.vlgmr.msra.gmra.mrb[4].mxu1 %vm1055_vm5, %v1054_v62  ;;  %v1165_v1 = vmul.f32 %v2848_v63, %v2844_v55  ;;  %v2455_v62 = vld [vmem:[%s3624_s9] ss:$0 sm:$0xff] }
 0x39e   : > { %2599 = vmatpush3.bf16.msra.mxu1 %v1174_v0  ;;  %2600 = vmatprep.mubr.msk.bf16.mxu1 %vm2931_vm1, %v2930_v15 }
 0x39f   : > { %2612 = vmatprep.subr.bf16.mxu1 %v2930_v15  ;;  %v1166_v4 = vpack.c.bf16 %v1165_v1, %v1165_v1 }
 0x3a5   : > { %2601 = vmatmul.mubr.msk.bf16.vlgmr.msra.gmra.mrb[8].mxu1 %vm1055_vm5, %v1166_v4 }
 0x3a6   : > { %2613 = vmatpush3.bf16.msra.mxu1 %v2793_v3  ;;  %2616 = vmatprep.mubr.msk.bf16.mxu1 %vm2931_vm1, %v2930_v15 }
 0x3a7   : > { %2614 = vmatprep.subr.bf16.mxu1 %v2930_v15 }
 0x3aa   : > { %2615 = vmatpush3.bf16.msra.mxu1 %v2794_v5 }
 0x3ab   : > { %2632 = vmatprep.subr.bf16.mxu1 %v2930_v15 }
 0x470   : > { %v1097_v8 = vpop.f32.mrb[4].mxu1 }
 0x471   : > { %v1103_v9 = vpack.c.bf16 %v1097_v8, %v1097_v8  ;;  %v2590_v10 = vpop.f32.mrb[5].mxu1 }
 0x472   : > { %v1100_v12 = vpop.f32.mrb[6].mxu1 }
 0x473   : > { %v2591_v13 = vpop.f32.mrb[7].mxu1  ;;  %2617 = vmatmul.mubr.msk.bf16.vlgmr.msra.gmra.mrb[12].mxu1 %vm994_vm2, %v1103_v9 }
 0x474   : > { %2648 = vmatprep.mubr.msk.bf16.mxu1 %vm2931_vm1, %v2930_v15  ;;  %2633 = vmatpush3.bf16.msra.mxu1 %v2801_v44 }
 0x475   : > { %2634 = vmatprep.subr.bf16.mxu1 %v2930_v15 }
 0x478   : > { %v1210_v17 = vpop.f32.mrb[8].mxu1  ;;  %2635 = vmatpush3.bf16.msra.mxu1 %v2802_v45 }
 0x479   : > { %v1216_v18 = vpack.c.bf16 %v1210_v17, %v1210_v17  ;;  %v2602_v19 = vpop.f32.mrb[9].mxu1  ;;  %2636 = vmatprep.subr.bf16.mxu1 %v2930_v15 }
 0x47a   : > { %v1213_v20 = vpop.f32.mrb[10].mxu1 }
 0x47b   : > { %v2603_v21 = vpop.f32.mrb[11].mxu1  ;;  %2609 = vmatmul.mubr.msk.bf16.vlgmr.msra.gmra.mrb[8].mxu0 %vm994_vm2, %v1216_v18 }
 0x47c   : > { %2628 = vmatprep.mubr.msk.bf16.mxu0 %vm2931_vm1, %v2930_v15  ;;  %2621 = vmatpush3.bf16.msra.mxu0 %v2797_v41 }
 0x47d   : > { %2622 = vmatprep.subr.bf16.mxu0 %v2930_v15  ;;  %2637 = vmatpush3.bf16.msra.mxu1 %v2803_v46 }
 0x47e   : > { %2638 = vmatprep.subr.bf16.mxu1 %v2930_v15 }
 0x481   : > { %2639 = vmatpush3.bf16.msra.mxu1 %v2804_v47 }
 0x482   : > { %2640 = vmatprep.subr.bf16.mxu1 %v2930_v15 }
 0x485   : > { %2641 = vmatpush3.bf16.msra.mxu1 %v2805_v48 }
 0x486   : > { %2642 = vmatprep.subr.bf16.mxu1 %v2930_v15 }
 0x489   : > { %2643 = vmatpush3.bf16.msra.mxu1 %v2806_v49 }
 0x48a   : > { %2644 = vmatprep.subr.bf16.mxu1 %v2930_v15 }
 0x48d   : > { %2645 = vmatpush3.bf16.msra.mxu1 %v2807_v60 }
 0x48e   : > { %2646 = vmatprep.subr.bf16.mxu1 %v2930_v15 }
 0x491   : > { %2647 = vmatpush3.bf16.msra.mxu1 %v2808_v61 }
 0x492   : > { %2658 = vmatprep.subr.bf16.mxu1 %v2930_v15 }
 0x546   : > { %v1321_v22 = vpop.f32.mrb[12].mxu1 }
 0x547   : > { %v2618_v23 = vpop.f32.mrb[13].mxu1 }
 0x548   : > { %v1324_v24 = vpop.f32.mrb[14].mxu1  ;;  %v2811_v23 = vld [vmem:[%s3557_s14 + $0x4] ss:$8 sps:$4 sm:$0xff]  }
 0x549   : > { %v2619_v26 = vpop.f32.mrb[15].mxu1  ;;  %v2809_v24 = vld [vmem:[%s3557_s14] ss:$8 sps:$4 sm:$0xff]  }
 0x54a   : > { %v2814_v26 = vld [vmem:[%s3557_s14 + $0x14] ss:$8 sps:$4 sm:$0xff]  }
 0x54e   : > { %v1266_v28 = vpop.f32.mrb[8].mxu0 }
 0x54f   : > { %v1322_v29 = vadd.f32 %v1321_v22, %v1266_v28  ;;  %v2610_v30 = vpop.f32.mrb[9].mxu0  ;;  %v2817_v28 = vld [vmem:[%s3557_s14 + $0x24] ss:$8 sps:$4 sm:$0xff]  }
 0x550   : > { %v1269_v31 = vpop.f32.mrb[10].mxu0  ;;  %v2818_v30 = vld [vmem:[%s3557_s14 + $0x30] ss:$8 sps:$4 sm:$0xff]  }
 0x551   : > { %v1333_v32 = vadd.f32 %v2452_v27, %v1322_v29  ;;  %v2611_v33 = vpop.f32.mrb[11].mxu0  ;;  %v2812_v27 = vld [vmem:[%s3557_s14 + $0x10] ss:$8 sps:$4 sm:$0xff]   ;;  %v2815_v29 = vld [vmem:[%s3557_s14 + $0x20] ss:$8 sps:$4 sm:$0xff]  }
 0x552   : > { %v2820_v31 = vld [vmem:[%s3557_s14 + $0x34] ss:$8 sps:$4 sm:$0xff]  }
 0x553   : > { %v1334_v34 = vadd.f32 %v1333_v32, %v3162_v11  ;;  %v2798_v11 = vld [vmem:[%s3620_s29 + $0x8] sm:$0xff]  }
 0x554   : > { %2623 = vmatpush3.bf16.msra.mxu0 %v2798_v11  ;;  %v1570_v11 = vld [vmem:[%s3558_s15] sm:$0x3] }
 0x555   : > { %v1336_v35 = vsel %vm1335_vm6, %v1334_v34, 0.0  ;;  %2624 = vmatprep.subr.bf16.mxu0 %v2930_v15 }
 0x556   : > { %1337 = vadd.xlane.f32.xlu1 %v1336_v35 }
 0x558   : > { %2625 = vmatpush3.bf16.msra.mxu0 %v2799_v42  ;;  %v1615_v42 = vrot.slane %v1570_v11, %v896_v16 }
 0x559   : > { %2626 = vmatprep.subr.bf16.mxu0 %v2930_v15 }
 0x55c   : > { %2627 = vmatpush3.bf16.msra.mxu0 %v2800_v43  ;;  %v1619_v43 = vrot.slane %v1570_v11, %v900_v25 }
 0x55d   : > { %1665 = vmatprep.subr.bf16.mxu0 %v2811_v23 }
 0x5e3   : > { %v1338_v36 = vpop.xlane.xlu1 %1337 }
 0x5e4   : > { %v1340_v37 = vmul.f32 0.015625, %v1338_v36  ;;  %v2470_v36 = vld [vmem:[%s3626_s27] ss:$0 sm:$0xff]  ;;  %s3628_s27 = sld [smem:[#allocation8_spill]] }
 0x5e6   : > { %v1341_v38 = vsub.f32 %v1334_v34, %v1340_v37 }
 0x5e8   : > { %v1342_v39 = vmul.f32 %v1341_v38, %v1341_v38 }
 0x5ea   : > { %v1343_v40 = vsel %vm1335_vm6, %v1342_v39, 0.0 }
 0x5eb   : > { %1344 = vadd.xlane.f32.xlu1 %v1343_v40 }
 0x678   : > { %v1345_v50 = vpop.xlane.xlu1 %1344 }
 0x679   : > { %v1346_v51 = vmul.f32 0.015625, %v1345_v50 }
 0x67b   : > { %v1347_v52 = vadd.f32 1e-05, %v1346_v51 }
 0x67d   : > { %2849 = vrsqrt.f32 %v1347_v52 }
 0x687   : > { %v2850_v53 = vpop.eup %2849 }
 0x688   : > { %v1349_v55 = vmul.f32 %v2850_v53, %v1341_v38  ;;  %v2471_v38 = vld [vmem:[%s3556_s13] ss:$0 sm:$0xff] }
 0x68a   : > { %v1356_v57 = vmul.f32 %v2453_v54, %v1349_v55 }
 0x68c   : > { %v1363_v58 = vadd.f32 %v2454_v56, %v1356_v57 }
 0x68e   : > { %v1364_v59 = vpack.c.bf16 %v1363_v58, %v1363_v58 }
 0x690   : > { %2629 = vmatmul.mubr.msk.bf16.vlgmr.msra.gmra.mrb[12].mxu0 %vm944_vm0, %v1364_v59 }
 0x691   : > { %1697 = vmatprep.mubr.bf16.mxu0 %v2929_v2  ;;  %1666 = vmatpush1.bf16.msra.mxu0 %v2809_v24 }
 0x692   : > { %1667 = vmatprep.subr.bf16.mxu0 %v2814_v26 }
 0x695   : > { %1668 = vmatpush1.bf16.msra.mxu0 %v2812_v27  ;;  %v2821_v27 = vld [vmem:[%s3559_s16] sm:$0xff]  }
 0x696   : > { %1669 = vmatprep.subr.bf16.mxu0 %v2817_v28 }
 0x699   : > { %1670 = vmatpush1.bf16.msra.mxu0 %v2815_v29  ;;  %v2822_v29 = vld [vmem:[%s3559_s16 + $0x8] sm:$0xff]  }
 0x69a   : > { %1671 = vmatprep.subr.bf16.mxu0 %v2820_v31  ;;  %v2824_v31 = vld [vmem:[%s3559_s16 + $0x18] sm:$0xff]  }
 0x69d   : > { %1672 = vmatpush1.bf16.msra.mxu0 %v2818_v30  ;;  %v2823_v30 = vld [vmem:[%s3559_s16 + $0x10] sm:$0xff]  }
 0x69e   : > { %2652 = vmatprep.subr.bf16.mxu0 %v2930_v15 }
 0x763   : > { %v1432_v63 = vpop.f32.mrb[12].mxu0 }
 0x764   : > { %v1433_v2 = vadd.f32 %v2455_v62, %v1432_v63  ;;  %v2630_v0 = vpop.f32.mrb[13].mxu0 }
 0x765   : > { %v1435_v1 = vpop.f32.mrb[14].mxu0 }
 0x766   : > { %v1438_v3 = vmax.f32 %v1433_v2, 0.0  ;;  %v2631_v4 = vpop.f32.mrb[15].mxu0 }
 0x768   : > { %v1439_v5 = vpack.c.bf16 %v1438_v3, %v1438_v3 }
 0x76a   : > { %2649 = vmatmul.mubr.bf16.vlgmr.msra.gmra.mrb[16].mxu1 %v1439_v5 }
 0x76b   : > { %2660 = vmatprep.mubr.msk.bf16.mxu1 %vm2931_vm1, %v2930_v15 }
 0x83d   : > { %v1528_v7 = vpop.f32.mrb[16].mxu1 }
 0x83e   : > { %v1529_v8 = vadd.f32 %v2461_v6, %v1528_v7  ;;  %v2650_v9 = vpop.f32.mrb[17].mxu1 }
 0x83f   : > { %v1531_v10 = vpop.f32.mrb[18].mxu1 }
 0x840   : > { %v2651_v12 = vpop.f32.mrb[19].mxu1  ;;  %v1534_v13 = vadd.f32 %v1529_v8, %v1363_v58 }
 0x842   : > { %v1535_v17 = vsel %vm1335_vm6, %v1534_v13, 0.0 }
 0x843   : > { %1536 = vadd.xlane.f32.xlu1 %v1535_v17 }
 0x8d0   : > { %v1537_v18 = vpop.xlane.xlu1 %1536 }
 0x8d1   : > { %v1538_v19 = vmul.f32 0.015625, %v1537_v18 }
 0x8d3   : > { %v1539_v20 = vsub.f32 %v1534_v13, %v1538_v19 }
 0x8d5   : > { %v1540_v21 = vmul.f32 %v1539_v20, %v1539_v20 }
 0x8d7   : > { %v1541_v22 = vsel %vm1335_vm6, %v1540_v21, 0.0 }
 0x8d8   : > { %1542 = vadd.xlane.f32.xlu1 %v1541_v22 }
 0x965   : > { %v1543_v32 = vpop.xlane.xlu1 %1542 }
 0x966   : > { %v1544_v33 = vmul.f32 0.015625, %v1543_v32 }
 0x968   : > { %v1545_v34 = vadd.f32 1e-05, %v1544_v33 }
 0x96a   : > { %2851 = vrsqrt.f32 %v1545_v34 }
 0x974   : > { %v2852_v35 = vpop.eup %2851 }
 0x975   : > { %v1547_v37 = vmul.f32 %v2852_v35, %v1539_v20 }
 0x977   : > { %v1554_v39 = vmul.f32 %v2470_v36, %v1547_v37 }
 0x979   : > { %v3336_v40 = vadd.f32 %v2471_v38, %v1554_v39 }
 0x97b   : > { %v1610_v41 = vpack.c.bf16 %v3336_v40, %v3336_v40 }
 0x97d   : > { %2480 = vmatmul.mubr.msk.bf16.vlgmr.msra.gmra.mrb[16].mxu0 %vm944_vm0, %v1610_v41 }
 0x97e   : > { %2654 = vmatprep.mubr.msk.bf16.mxu0 %vm2931_vm1, %v2930_v15 }
 0xa50   : > { %v1699_v44 = vpop.f32.mrb[16].mxu0 }
 0xa51   : > { %v1700_v45 = vadd.f32 %v1699_v44, %v1615_v42  ;;  %v1701_v46 = vpop.f32.mrb[17].mxu0 }
 0xa52   : > { %v1702_v47 = vadd.f32 %v1701_v46, %v1619_v43  ;;  %v1703_v48 = vpop.f32.mrb[18].mxu0  ;;  %v2491_v46 = vld [vmem:[%s3560_s17] ss:$0 sm:$0xff] }
 0xa53   : > { %v1706_v49 = vpack.c.bf16 %v1700_v45, %v1700_v45  ;;  %v1704_v50 = vpop.f32.mrb[19].mxu0 }
 0xa54   : > { %v1707_v51 = vpack.c.bf16 %v1702_v47, %v1702_v47 }
 0xa55   : > { %1819 = vrot.lane.b32.xlu0 %v1706_v49, %s2934_s2  ;;  %1709 = vrot.lane.b32.xlu1 %v1706_v49, %s2933_s3  ;;  %s2516_s3 = sshll.u32 %s3628_s27, 4  ;;  %s835_s2 = scalar_lea.vmem [#allocation2], %s834_s28 }
 0xa56   : > { %v1774_v52 = vsel %vm1059_vm3, %v1707_v51, 0  ;;  %s2373_s12 = sshll.u32 %s835_s2, 4  ;;  %s3501_s0 = scalar_lea.hbm %s3631_s7, %s2516_s3  ;;  %s3503_s12 = int_to_ptr.vmem [resolvable:$true] %s2373_s12 }
 0xa57   : > { %2659 = vmatpush3.bf16.msra.mxu1 %v1774_v52  ;;  %s2865_s27 = scalar_lea.vmem %s3503_s12, 16 }
 0xa58   : > { %2670 = vmatprep.subr.bf16.mxu1 %v2930_v15  ;;  %p2866_p11 = scmp.ne.s32.totalorder %s3503_s12, %s2865_s27 }
 0xa59   : > { %1817 = vrot.lane.b32.xlu0 %v1706_v49, %s3627_s10 }
 0xa5a   : > { %p2867_p12 = pnand %p2866_p11, %p3119_p5 }
 0xa5c   : > { %p2868_p13 = pneg %p2867_p12 }
 0xac7   : > { %v1710_v14 = vpop.permute.xlu1 %1709  ;;  %v1820_v25 = vpop.permute.xlu0 %1819 }
 0xac8   : > { %v1715_v16 = vsel %vm994_vm2, %v1710_v14, 0  ;;  %v1825_v53 = vsel %vm994_vm2, %v1820_v25, 0 }
 0xac9   : > { %2653 = vmatpush3.bf16.xpose.msra.mxu0 %v1715_v16 }
 0xaca   : > { %2664 = vmatprep.subr.bf16.mxu0 %v2930_v15 }
 0xacb   : > { %v1818_v54 = vpop.permute.xlu0 %1817 }
 0xad0   : > { %2655 = vmatmul.mubr.msk.bf16.vlgmr.msra.gmra.mrb[20].mxu0 %vm994_vm2, %v1706_v49 }
 0xad1   : > { %2665 = vmatpush3.bf16.xpose.msra.mxu0 %v1825_v53  ;;  %2666 = vmatprep.mubr.msk.bf16.mxu0 %vm2931_vm1, %v2930_v15 }
 0xad2   : > { %2676 = vmatprep.subr.bf16.mxu0 %v2930_v15 }
 0xad8   : > { %2667 = vmatmul.mubr.msk.bf16.vlgmr.msra.gmra.mrb[24].mxu0 %vm994_vm2, %v1818_v54 }
 0xad9   : > { %2680 = vmatprep.mubr.msk.bf16.mxu0 %vm2931_vm1, %v2930_v15  ;;  %2677 = vmatpush3.bf16.msra.mxu0 %v2823_v30 }
 0xada   : > { %2678 = vmatprep.subr.bf16.mxu0 %v2930_v15 }
 0xadd   : > { %2679 = vmatpush3.bf16.msra.mxu0 %v2824_v31 }
 0xade   : > { %2692 = vmatprep.subr.bf16.mxu0 %v2930_v15 }
 0xba3   : > { %v1751_v55 = vpop.f32.mrb[20].mxu0 }
 0xba4   : > { %v1757_v56 = vmul.f32 0.17677669, %v1751_v55  ;;  %v2656_v57 = vpop.f32.mrb[21].mxu0 }
 0xba5   : > { %v1754_v58 = vpop.f32.mrb[22].mxu0  ;;  %v2825_v57 = vld [vmem:[%s3563_s20] sm:$0xff]  }
 0xba6   : > { %v2657_v59 = vpop.f32.mrb[23].mxu0  ;;  %v1758_v60 = vsel %vm1042_vm4, %v1757_v56, -inf  ;;  %v2827_v58 = vld [vmem:[%s3563_s20 + $0x10] sm:$0xff]  }
 0xba7   : > { %1759 = vmax.xlane.f32.xlu0 %v1758_v60  ;;  %v2828_v59 = vld [vmem:[%s3563_s20 + $0x18] sm:$0xff]   ;;  %v2829_v60 = vld [vmem:[%s3565_s22] sm:$0xff]  }
 0xbab   : > { %v1861_v61 = vpop.f32.mrb[24].mxu0 }
 0xbac   : > { %v1867_v62 = vmul.f32 0.17677669, %v1861_v61  ;;  %v2668_v63 = vpop.f32.mrb[25].mxu0  ;;  %v2830_v61 = vld [vmem:[%s3565_s22 + $0x8] sm:$0xff]  }
 0xbad   : > { %v1864_v2 = vpop.f32.mrb[26].mxu0  ;;  %v2832_v63 = vld [vmem:[%s3565_s22 + $0x18] sm:$0xff]  }
 0xbae   : > { %v2669_v0 = vpop.f32.mrb[27].mxu0  ;;  %v1868_v1 = vsel %vm1042_vm4, %v1867_v62, -inf  ;;  %v2833_v2 = vld [vmem:[%s3565_s22 + $0x20] sm:$0xff]  }
 0xbaf   : > { %1869 = vmax.xlane.f32.xlu1 %v1868_v1  ;;  %v2834_v0 = vld [vmem:[%s3565_s22 + $0x28] sm:$0xff]  }
 0xc34   : > { %v1760_v3 = vpop.xlane.xlu0 %1759 }
 0xc35   : > { %v1761_v4 = vsub.f32 %v1757_v56, %v1760_v3 }
 0xc37   : > { %v1762_v5 = vmul.f32 1.442695, %v1761_v4 }
 0xc39   : > { %2853 = vpow2.f32 %v1762_v5 }
 0xc3c   : > { %v1870_v6 = vpop.xlane.xlu1 %1869 }
 0xc3d   : > { %v1871_v7 = vsub.f32 %v1867_v62, %v1870_v6  ;;  %v2831_v62 = vld [vmem:[%s3565_s22 + $0x10] sm:$0xff]   ;;  %v2492_v6 = vld [vmem:[%s3561_s18] ss:$0 sm:$0xff] }
 0xc3f   : > { %v1872_v8 = vmul.f32 1.442695, %v1871_v7 }
 0xc41   : > { %2855 = vpow2.f32 %v1872_v8  ;;  %v2493_v8 = vld [vmem:[%s3562_s19] ss:$0 sm:$0xff] }
 0xc43   : > { %v2854_v9 = vpop.eup %2853 }
 0xc44   : > { %v1764_v10 = vsel %vm1042_vm4, %v2854_v9, 0.0 }
 0xc45   : > { %1765 = vadd.xlane.f32.xlu0 %v1764_v10 }
 0xc4b   : > { %v2856_v12 = vpop.eup %2855 }
 0xc4c   : > { %v1874_v13 = vsel %vm1042_vm4, %v2856_v12, 0.0 }
 0xc4d   : > { %1875 = vadd.xlane.f32.xlu0 %v1874_v13  ;;  %v2835_v13 = vld [vmem:[%s3565_s22 + $0x30] sm:$0xff]  }
 0xc63   : > { %1881 = vrot.lane.b32.xlu0 %v1707_v51, %s3627_s10 }
 0xcd2   : > { %v1766_v17 = vpop.xlane.xlu0 %1765 }
 0xcd3   : > { %2857 = vrcp.f32 %v1766_v17  ;;  %v2836_v17 = vld [vmem:[%s3565_s22 + $0x38] sm:$0xff]  }
 0xcda   : > { %v1876_v18 = vpop.xlane.xlu0 %1875 }
 0xcdb   : > { %2859 = vrcp.f32 %v1876_v18  ;;  %v2494_v18 = vld [vmem:[%s3564_s21] ss:$0 sm:$0xff] }
 0xcdd   : > { %v2858_v19 = vpop.eup %2857 }
 0xcde   : > { %v1768_v20 = vmul.f32 %v2858_v19, %v2854_v9  ;;  %v1882_v21 = vpop.permute.xlu0 %1881 }
 0xcdf   : > { %v1887_v23 = vsel %vm1059_vm3, %v1882_v21, 0 }
 0xce0   : > { %v1769_v22 = vpack.c.bf16 %v1768_v20, %v1768_v20 }
 0xce2   : > { %2661 = vmatmul.mubr.msk.bf16.vlgmr.msra.gmra.mrb[20].mxu1 %vm1055_vm5, %v1769_v22 }
 0xce3   : > { %2671 = vmatpush3.bf16.msra.mxu1 %v1887_v23  ;;  %2672 = vmatprep.mubr.msk.bf16.mxu1 %vm2931_vm1, %v2930_v15 }
 0xce4   : > { %2684 = vmatprep.subr.bf16.mxu1 %v2930_v15 }
 0xce5   : > { %v2860_v24 = vpop.eup %2859 }
 0xce6   : > { %v1878_v26 = vmul.f32 %v2860_v24, %v2856_v12 }
 0xce8   : > { %v1879_v28 = vpack.c.bf16 %v1878_v26, %v1878_v26 }
 0xcea   : > { %2673 = vmatmul.mubr.msk.bf16.vlgmr.msra.gmra.mrb[24].mxu1 %vm1055_vm5, %v1879_v28 }
 0xceb   : > { %2685 = vmatpush3.bf16.msra.mxu1 %v2821_v27  ;;  %2688 = vmatprep.mubr.msk.bf16.mxu1 %vm2931_vm1, %v2930_v15  ;;  %v2500_v27 = vld [vmem:[%s3566_s23] ss:$0 sm:$0xff] }
 0xcec   : > { %2686 = vmatprep.subr.bf16.mxu1 %v2930_v15 }
 0xcef   : > { %2687 = vmatpush3.bf16.msra.mxu1 %v2822_v29 }
 0xcf0   : > { %2704 = vmatprep.subr.bf16.mxu1 %v2930_v15 }
 0xdb5   : > { %v1810_v32 = vpop.f32.mrb[20].mxu1 }
 0xdb6   : > { %v1816_v33 = vpack.c.bf16 %v1810_v32, %v1810_v32  ;;  %v2662_v34 = vpop.f32.mrb[21].mxu1 }
 0xdb7   : > { %v1813_v35 = vpop.f32.mrb[22].mxu1 }
 0xdb8   : > { %v2663_v36 = vpop.f32.mrb[23].mxu1  ;;  %2689 = vmatmul.mubr.msk.bf16.vlgmr.msra.gmra.mrb[28].mxu1 %vm994_vm2, %v1816_v33 }
 0xdb9   : > { %2720 = vmatprep.mubr.msk.bf16.mxu1 %vm2931_vm1, %v2930_v15  ;;  %2705 = vmatpush3.bf16.msra.mxu1 %v2829_v60 }
 0xdba   : > { %2706 = vmatprep.subr.bf16.mxu1 %v2930_v15 }
 0xdbd   : > { %v1923_v37 = vpop.f32.mrb[24].mxu1  ;;  %2707 = vmatpush3.bf16.msra.mxu1 %v2830_v61 }
 0xdbe   : > { %v1929_v38 = vpack.c.bf16 %v1923_v37, %v1923_v37  ;;  %v2674_v39 = vpop.f32.mrb[25].mxu1  ;;  %2708 = vmatprep.subr.bf16.mxu1 %v2930_v15 }
 0xdbf   : > { %v1926_v41 = vpop.f32.mrb[26].mxu1 }
 0xdc0   : > { %v2675_v11 = vpop.f32.mrb[27].mxu1  ;;  %2681 = vmatmul.mubr.msk.bf16.vlgmr.msra.gmra.mrb[28].mxu0 %vm994_vm2, %v1929_v38  ;;  %v2837_v41 = vld [vmem:[%s3569_s26] sm:$0xff]  }
 0xdc1   : > { %2700 = vmatprep.mubr.msk.bf16.mxu0 %vm2931_vm1, %v2930_v15  ;;  %2693 = vmatpush3.bf16.msra.mxu0 %v2825_v57  ;;  %v2838_v11 = vld [vmem:[%s3569_s26 + $0x8] sm:$0xff]  }
 0xdc2   : > { %2694 = vmatprep.subr.bf16.mxu0 %v2930_v15  ;;  %2709 = vmatpush3.bf16.msra.mxu1 %v2831_v62 }
 0xdc3   : > { %2710 = vmatprep.subr.bf16.mxu1 %v2930_v15 }
 0xdc6   : > { %2711 = vmatpush3.bf16.msra.mxu1 %v2832_v63 }
 0xdc7   : > { %2712 = vmatprep.subr.bf16.mxu1 %v2930_v15 }
 0xdca   : > { %2713 = vmatpush3.bf16.msra.mxu1 %v2833_v2 }
 0xdcb   : > { %2714 = vmatprep.subr.bf16.mxu1 %v2930_v15 }
 0xdce   : > { %2715 = vmatpush3.bf16.msra.mxu1 %v2834_v0 }
 0xdcf   : > { %2716 = vmatprep.subr.bf16.mxu1 %v2930_v15 }
 0xdd2   : > { %2717 = vmatpush3.bf16.msra.mxu1 %v2835_v13 }
 0xdd3   : > { %2718 = vmatprep.subr.bf16.mxu1 %v2930_v15 }
 0xdd6   : > { %2719 = vmatpush3.bf16.msra.mxu1 %v2836_v17 }
 0xe8b   : > { %v2034_v42 = vpop.f32.mrb[28].mxu1 }
 0xe8c   : > { %v2690_v43 = vpop.f32.mrb[29].mxu1 }
 0xe8d   : > { %v2037_v44 = vpop.f32.mrb[30].mxu1  ;;  %v2840_v43 = vld [vmem:[%s3569_s26 + $0x18] sm:$0xff]  }
 0xe8e   : > { %v2691_v45 = vpop.f32.mrb[31].mxu1 }
 0xe93   : > { %v1979_v47 = vpop.f32.mrb[28].mxu0 }
 0xe94   : > { %v2035_v48 = vadd.f32 %v2034_v42, %v1979_v47  ;;  %v2682_v49 = vpop.f32.mrb[29].mxu0  ;;  %v2839_v42 = vld [vmem:[%s3569_s26 + $0x10] sm:$0xff]  }
 0xe95   : > { %v1982_v50 = vpop.f32.mrb[30].mxu0 }
 0xe96   : > { %v2046_v51 = vadd.f32 %v2491_v46, %v2035_v48  ;;  %v2683_v52 = vpop.f32.mrb[31].mxu0  ;;  %v2509_v48 = vld [vmem:[%s3567_s24] ss:$0 sm:$0xff] }
 0xe97   : > { %v2510_v50 = vld [vmem:[%s3568_s25] ss:$0 sm:$0xff] }
 0xe98   : > { %v2047_v14 = vadd.f32 %v2046_v51, %v3336_v40  ;;  %v2826_v40 = vld [vmem:[%s3563_s20 + $0x8] sm:$0xff]  }
 0xe99   : > { %2695 = vmatpush3.bf16.msra.mxu0 %v2826_v40  ;;  %v2281_v40 = vld [vmem:[%s3629_s11] sm:$0x1]  ;;  %s2869_s11 = sshll.u32 %s2935_s6, 4  ;;  %s2870_s11 = int_to_ptr.vmem [resolvable:$false] %s2869_s11 }
 0xe9a   : > { %v2048_v16 = vsel %vm1335_vm6, %v2047_v14, 0.0  ;;  %2696 = vmatprep.subr.bf16.mxu0 %v2930_v15  ;;  %s2871_s9 = scalar_lea.vmem %s2870_s11, 32  ;;  %p2872_p0 = scmp.lt.s32.totalorder %s3503_s12, %s2870_s11 }
 0xe9b   : > { %2049 = vadd.xlane.f32.xlu1 %v2048_v16  ;;  %p2873_p1 = scmp.lt.s32.totalorder %s2871_s9, %s2865_s27 }
 0xe9d   : > { %2697 = vmatpush3.bf16.msra.mxu0 %v2827_v58  ;;  %p2874_p2 = por %p2873_p1, %p2872_p0 }
 0xe9e   : > { %2698 = vmatprep.subr.bf16.mxu0 %v2930_v15 }
 0xe9f   : > { %p2875_p3 = pnand %p2874_p2, %p2868_p13 }
 0xea1   : > { %2699 = vmatpush3.bf16.msra.mxu0 %v2828_v59 }
 0xea2   : > { %2724 = vmatprep.subr.bf16.mxu0 %v2930_v15 }
 0xf28   : > { %v2050_v25 = vpop.xlane.xlu1 %2049 }
 0xf29   : > { %v2051_v53 = vmul.f32 0.015625, %v2050_v25 }
 0xf2b   : > { %v2052_v54 = vsub.f32 %v2047_v14, %v2051_v53 }
 0xf2d   : > { %v2053_v55 = vmul.f32 %v2052_v54, %v2052_v54 }
 0xf2f   : > { %v2054_v56 = vsel %vm1335_vm6, %v2053_v55, 0.0 }
 0xf30   : > { %2055 = vadd.xlane.f32.xlu1 %v2054_v56 }
 0xfbd   : > { %v2056_v1 = vpop.xlane.xlu1 %2055 }
 0xfbe   : > { %v2057_v3 = vmul.f32 0.015625, %v2056_v1 }
 0xfc0   : > { %v2058_v4 = vadd.f32 1e-05, %v2057_v3 }
 0xfc2   : > { %2861 = vrsqrt.f32 %v2058_v4 }
 0xfcc   : > { %v2862_v5 = vpop.eup %2861 }
 0xfcd   : > { %v2060_v7 = vmul.f32 %v2862_v5, %v2052_v54 }
 0xfcf   : > { %v2067_v9 = vmul.f32 %v2492_v6, %v2060_v7 }
 0xfd1   : > { %v2074_v10 = vadd.f32 %v2493_v8, %v2067_v9 }
 0xfd3   : > { %v2075_v12 = vpack.c.bf16 %v2074_v10, %v2074_v10 }
 0xfd5   : > { %2701 = vmatmul.mubr.msk.bf16.vlgmr.msra.gmra.mrb[32].mxu0 %vm944_vm0, %v2075_v12 }
 0xfd6   : > { %2732 = vmatprep.mubr.msk.bf16.mxu0 %vm2931_vm1, %v2930_v15  ;;  %2725 = vmatpush3.bf16.msra.mxu0 %v2837_v41 }
 0xfd7   : > { %2726 = vmatprep.subr.bf16.mxu0 %v2930_v15 }
 0xfda   : > { %2727 = vmatpush3.bf16.msra.mxu0 %v2838_v11 }
 0xfdb   : > { %2728 = vmatprep.subr.bf16.mxu0 %v2930_v15 }
 0xfde   : > { %2729 = vmatpush3.bf16.msra.mxu0 %v2839_v42 }
 0xfdf   : > { %2730 = vmatprep.subr.bf16.mxu0 %v2930_v15 }
 0xfe2   : > { %2731 = vmatpush3.bf16.msra.mxu0 %v2840_v43 }
0x10a8   : > { %v2143_v19 = vpop.f32.mrb[32].mxu0 }
0x10a9   : > { %v2144_v20 = vadd.f32 %v2494_v18, %v2143_v19  ;;  %v2702_v21 = vpop.f32.mrb[33].mxu0 }
0x10aa   : > { %v2146_v22 = vpop.f32.mrb[34].mxu0 }
0x10ab   : > { %v2149_v23 = vmax.f32 %v2144_v20, 0.0  ;;  %v2703_v24 = vpop.f32.mrb[35].mxu0 }
0x10ad   : > { %v2150_v26 = vpack.c.bf16 %v2149_v23, %v2149_v23 }
0x10af   : > { %2721 = vmatmul.mubr.bf16.vlgmr.msra.gmra.mrb[32].mxu1 %v2150_v26 }
0x1182   : > { %v2239_v28 = vpop.f32.mrb[32].mxu1 }
0x1183   : > { %v2240_v29 = vadd.f32 %v2500_v27, %v2239_v28  ;;  %v2722_v30 = vpop.f32.mrb[33].mxu1 }
0x1184   : > { %v2242_v31 = vpop.f32.mrb[34].mxu1 }
0x1185   : > { %v2723_v32 = vpop.f32.mrb[35].mxu1  ;;  %v2245_v33 = vadd.f32 %v2240_v29, %v2074_v10 }
0x1187   : > { %v2246_v34 = vsel %vm1335_vm6, %v2245_v33, 0.0 }
0x1188   : > { %2247 = vadd.xlane.f32.xlu1 %v2246_v34 }
0x1215   : > { %v2248_v35 = vpop.xlane.xlu1 %2247 }
0x1216   : > { %v2249_v36 = vmul.f32 0.015625, %v2248_v35 }
0x1218   : > { %v2250_v37 = vsub.f32 %v2245_v33, %v2249_v36 }
0x121a   : > { %v2251_v38 = vmul.f32 %v2250_v37, %v2250_v37 }
0x121c   : > { %v2252_v39 = vsel %vm1335_vm6, %v2251_v38, 0.0 }
0x121d   : > { %2253 = vadd.xlane.f32.xlu1 %v2252_v39 }
0x12aa   : > { %v2254_v44 = vpop.xlane.xlu1 %2253 }
0x12ab   : > { %v2255_v45 = vmul.f32 0.015625, %v2254_v44 }
0x12ad   : > { %v2256_v46 = vadd.f32 1e-05, %v2255_v45 }
0x12af   : > { %2863 = vrsqrt.f32 %v2256_v46 }
0x12b9   : > { %v2864_v47 = vpop.eup %2863 }
0x12ba   : > { %v2258_v49 = vmul.f32 %v2864_v47, %v2250_v37 }
0x12bc   : > { %v2265_v51 = vmul.f32 %v2509_v48, %v2258_v49 }
0x12be   : > { %v2272_v52 = vadd.f32 %v2510_v50, %v2265_v51 }
0x12c0   : > { %v2282_v15 = vsel %vm1335_vm6, %v2272_v52, 0.0 }
0x12c1   : > { %v2283_v14 = vrot.slane %v2282_v15, 4 }
0x12c3   : > { %v2284_v16 = vadd.f32 %v2283_v14, %v2282_v15 }
0x12c5   : > { %v2285_v25 = vrot.slane %v2284_v16, 2 }
0x12c7   : > { %v2286_v53 = vadd.f32 %v2285_v25, %v2284_v16 }
0x12c9   : > { %v2287_v54 = vrot.slane %v2286_v53, 1 }
0x12cb   : > { %v2288_v55 = vadd.f32 %v2287_v54, %v2286_v53 }
0x12cd   : > { %v2290_v56 = vmul.f32 0.25, %v2288_v55 }
0x12cf   : > { %v2291_v57 = vpack.c.bf16 %v2290_v56, %v2290_v56 }
0x12d1   : > { %2733 = vmatmul.mubr.msk.bf16.vlgmr.msra.gmra.mrb[36].mxu0 %vm944_vm0, %v2291_v57 }
0x13a4   : > { %v2353_v58 = vpop.f32.mrb[36].mxu0 }
0x13a5   : > { %v2354_v59 = vadd.f32 %v2353_v58, %v2281_v40  ;;  %v2734_v60 = vpop.f32.mrb[37].mxu0 }
0x13a6   : > { %v2356_v61 = vpop.f32.mrb[38].mxu0 }
0x13a7   : > { %2359 = vst [vmem:[%s835_s2] sm:$0x1] %v2354_v59  ;;  %v2735_v62 = vpop.f32.mrb[39].mxu0 }
0x13a8   : > { %2878 = shalt.err (!%p2875_p3)
}
0x13a9   : > { %s2879_s28 = scalar_lea.hbm %s3501_s0, 16  ;;  %s2883_s30 = scalar_lea.hbm %s3631_s7, 32 }
0x13aa   : > { %p2880_p4 = scmp.ne.s32.totalorder %s3501_s0, %s2879_s28  ;;  %p2884_p9 = scmp.lt.u32.totalorder %s3501_s0, %s3631_s7 }
0x13ab   : > { %p2885_p10 = scmp.lt.u32.totalorder %s2883_s30, %s2879_s28  ;;  %p2887_p12 = scmp.lt.u32.totalorder %s2879_s28, %s3501_s0 }
0x13ac   : > { %p2881_p7 = pnand %p2880_p4, %p3119_p5 }
0x13ad   : > { %p2886_p11 = por %p2885_p10, %p2884_p9 }
0x13ae   : > { %p2882_p8 = pneg %p2881_p7 }
0x13af   : > { %p2888_p13 = por %p2887_p12, %p2886_p11 }
0x13b1   : > { %p2889_p0 = pnand %p2888_p13, %p2882_p8 }
0x13b3   : > { %2892 = shalt.err (!%p2889_p0)
}
0x13b4   : > { %2736 = dma.vmem_to_hbm [thread:$0]  (%p3119_p5), %s3503_s12, 16, %s3501_s0, %s2361_s8  }
0x13b5 PF: > { %s3632_s27 = sld [smem:[#allocation7_spill]]  ;;  %s3633_s9 = sld [smem:[#allocation5_spill]] }
0x13bb   : > { %p2742_p1 = scmp.ge.s32.totalorder %s3632_s27, 2  ;;  %s2385_s2 = sand.u32 1, %s3633_s9  }
0x13bc   : > { %s2386_s6 = scalar_lea.sflag [#allocation3], %s2385_s2 }
0x13bd   : > { %p2739_p2 = pnand %p2742_p1, %p3123_p6 }
0x13bf   : > { %2910 = dma.done.wait (!%p2739_p2), %s2386_s6, 16  }
0x13c0   : > { %2912 = vsyncadd (!%p2739_p2), %s2386_s6, 4294967280  ;;  %s3635_s30 = sld [smem:[#allocation9_spill]]  ;;  %s3636_s28 = sld [smem:[#allocation6_spill]] }
0x13c1   : > { %s3637_s9 = sld [smem:[#allocation10_spill]]  ;;  %s3638_s8 = smov %s2919_s5 }
0x13c6   : > { %p38_p3 = scmp.ge.s32.totalorder %s3635_s30, 4   ;;  %s3639_s5 = smov %s3636_s28 }
0x13c8   :  { %40 = sbr.rel (!%p38_p3) target bundleno = 19 (0x13), region = 167 }
0x13cf   :  { %2390 = vsyncpa [#allocation3], 1 }
0x13d0   :  { %2392 = vsyncpa [#allocation3 + $0x1], 1 }

</bundles_post_ra>
